<compile_context>
chip_gen: v7x
topology: tpu7x:2x2x1
jax: 0.10.0
libtpu: 0.0.40
codegen_flags: <defaults>
</compile_context>

<pallas_src>
import jax
import jax.numpy as jnp
from jax import lax
from jax.experimental import pallas as pl
from jax.experimental.pallas import tpu as pltpu

EPS = 1e-5
LANE = 128


def _round_up(v, m):
    return (v + m - 1) // m * m


def bottleneck_kernel(x_ref, w1_ref, b1_ref, w2_ref, b2_ref, w3_ref, b3_ref,
                      o_ref):
    """One (batch, row-block) tile.

    x_ref : (1, H+2, W+2, Cin_p) bf16  whole spatially padded image (batch-resident)
    w1    : (Cin_p, Cw_p)        bf16  1x1 conv, BN1 scale folded into columns
    w2    : (9*Cw_p, Cw_p)       bf16  3x3 taps stacked on K (ky, kx), BN2 scale folded
    w3    : (Cw_p, Cout_p)       bf16  1x1 conv, BN3 scale folded into columns
    b*    : (1, C_p)             f32   folded BatchNorm biases
    o_ref : (1, TH, W, Cout_p)   bf16
    """
    _, _, W2, Cin_p = x_ref.shape
    _, TH, W, Cout_p = o_ref.shape
    TH2 = TH + 2
    Cw_p = w1_ref.shape[1]

    hb = pl.program_id(1)
    row0 = hb * TH                                    # top halo row in padded image
    xp = x_ref[0, pl.ds(row0, TH2), :, :]             # (TH2, W2, Cin_p) bf16

    # ---- conv1 (1x1) + bn1 bias + relu, fused with the global-pad mask ------
    h1 = jnp.dot(xp.reshape(TH2 * W2, Cin_p), w1_ref[...],
                 preferred_element_type=jnp.float32).reshape(TH2, W2, Cw_p)
    # conv2's zero-padding must see zeros, not relu(conv1(0) + b1): zero the
    # positions on the global spatial zero-pad border in the same epilogue pass.
    H_total = pl.num_programs(1) * TH
    r = lax.broadcasted_iota(jnp.int32, (TH2, W2, 1), 0)
    c = lax.broadcasted_iota(jnp.int32, (TH2, W2, 1), 1)
    valid = (c >= 1) & (c <= W) & (row0 + r >= 1) & (row0 + r <= H_total)
    h1 = jnp.where(valid, jnp.maximum(h1 + b1_ref[...], 0.0),
                   0.0).astype(jnp.bfloat16)

    # ---- conv2 (3x3, stride 1, pad 1): 9 accumulating K=Cw_p matmuls --------
    acc = jnp.broadcast_to(b2_ref[...], (TH * W, Cw_p)).astype(jnp.float32)
    for ky in range(3):
        for kx in range(3):
            t = ky * 3 + kx
            tap = h1[ky:ky + TH, kx:kx + W, :].reshape(TH * W, Cw_p)
            acc = acc + jnp.dot(tap, w2_ref[t * Cw_p:(t + 1) * Cw_p, :],
                                preferred_element_type=jnp.float32)
    h2 = jnp.maximum(acc, 0.0).astype(jnp.bfloat16)

    # ---- conv3 (1x1) + bn3 bias + identity residual + relu ------------------
    h3 = jnp.dot(h2, w3_ref[...], preferred_element_type=jnp.float32) + b3_ref[...]
    ident = xp[1:TH + 1, 1:W + 1, :].reshape(TH * W, Cin_p).astype(jnp.float32)
    o_ref[...] = jnp.maximum(h3 + ident, 0.0).reshape(
        1, TH, W, Cout_p).astype(o_ref.dtype)


def _fold_bn(gamma, beta, mean, var):
    scale = gamma / jnp.sqrt(var + EPS)
    return scale.astype(jnp.float32), (beta - mean * scale).astype(jnp.float32)


def _pad_bias(b, c_pad):
    return jnp.pad(b, (0, c_pad - b.shape[0])).reshape(1, -1).astype(jnp.float32)


def prepare_bottleneck_params(params, inplanes):
    """Fold BN scales into the conv weights, lane-pad, cast to bf16 (one-off)."""
    w1_t, w2_t, w3_t = params["conv1_w"], params["conv2_w"], params["conv3_w"]
    Cw = w1_t.shape[0]
    Cout = w3_t.shape[0]
    Cin = inplanes
    Cin_p, Cw_p, Cout_p = (_round_up(c, LANE) for c in (Cin, Cw, Cout))

    s1, b1 = _fold_bn(params["bn1_g"], params["bn1_b"], params["bn1_m"], params["bn1_v"])
    s2, b2 = _fold_bn(params["bn2_g"], params["bn2_b"], params["bn2_m"], params["bn2_v"])
    s3, b3 = _fold_bn(params["bn3_g"], params["bn3_b"], params["bn3_m"], params["bn3_v"])

    # conv1 (torch OIHW 1x1) -> (Cin, Cw), BN1 scale folded into output columns
    w1 = jnp.transpose(w1_t[:, :, 0, 0], (1, 0)) * s1[None, :]
    w1 = jnp.pad(w1, ((0, Cin_p - Cin), (0, Cw_p - Cw))).astype(jnp.bfloat16)
    # conv2 (OIHW 3x3) -> (3, 3, ci, co) -> (9*Cw_p, Cw_p), BN2 scale folded
    w2 = jnp.transpose(w2_t, (2, 3, 1, 0)) * s2[None, None, None, :]
    w2 = jnp.pad(w2, ((0, 0), (0, 0), (0, Cw_p - Cw), (0, Cw_p - Cw)))
    w2 = w2.reshape(9 * Cw_p, Cw_p).astype(jnp.bfloat16)
    # conv3 (OIHW 1x1) -> (Cw, Cout), BN3 scale folded
    w3 = jnp.transpose(w3_t[:, :, 0, 0], (1, 0)) * s3[None, :]
    w3 = jnp.pad(w3, ((0, Cw_p - Cw), (0, Cout_p - Cout))).astype(jnp.bfloat16)

    return dict(w1=w1, b1=_pad_bias(b1, Cw_p),
                w2=w2, b2=_pad_bias(b2, Cw_p),
                w3=w3, b3=_pad_bias(b3, Cout_p),
                Cin=Cin, Cout=Cout, Cin_p=Cin_p, Cw_p=Cw_p, Cout_p=Cout_p)


def _pick_tile_h(H, n_batch, target=64):
    # Largest divisor of H up to `target` rows: big tiles amortise the per-step
    # pipeline overhead; whole image for small H (demo shapes -> 1 tile/image).
    t = min(H, target)
    while H % t:
        t -= 1
    # v7x megacore balance: prefer an even number of parallel grid steps.
    if (n_batch * (H // t)) % 2 == 1 and t % 2 == 0 and t >= 16:
        t //= 2
    return t


def bottleneck_pallas_nhwc(x_pad, prep, *, tile_h=None):
    """x_pad: (N, H+2, W+2, Cin_p) bf16 NHWC, 1-px spatial zero-pad, lane-padded
    channels.  Returns (N, H, W, Cout_p) bf16 lane-padded NHWC — feed this
    (after a cheap re-pad) straight into the next block; no NCHW/f32 round-trip."""
    N, Hp2, Wp2, Cin_p = x_pad.shape
    H, W = Hp2 - 2, Wp2 - 2
    Cw_p, Cout_p = prep["Cw_p"], prep["Cout_p"]
    assert Cin_p == prep["Cin_p"]
    assert prep["Cin"] == prep["Cout"], \
        "identity residual requires Cin == Cout (no downsample)"

    if tile_h is None:
        tile_h = _pick_tile_h(H, N)
    assert H % tile_h == 0
    HB = H // tile_h

    const = lambda n, h: (0, 0)
    return pl.pallas_call(
        bottleneck_kernel,
        out_shape=jax.ShapeDtypeStruct((N, H, W, Cout_p), jnp.bfloat16),
        grid=(N, HB),
        in_specs=[
            # Whole padded image per batch element; index_map ignores the row
            # block so Pallas fetches it once per image, and the kernel takes
            # the haloed (tile_h+2)-row window with a dynamic pl.ds slice.
            pl.BlockSpec((1, Hp2, Wp2, Cin_p), lambda n, h: (n, 0, 0, 0)),
            # Weights / folded-BN biases: constant index_map -> VMEM-resident.
            # (pl.Buffered(1) would halve their footprint; kept at the default
            # buffering for lowering robustness — negligible at these widths.)
            pl.BlockSpec((Cin_p, Cw_p), const),
            pl.BlockSpec((1, Cw_p), const),
            pl.BlockSpec((9 * Cw_p, Cw_p), const),
            pl.BlockSpec((1, Cw_p), const),
            pl.BlockSpec((Cw_p, Cout_p), const),
            pl.BlockSpec((1, Cout_p), const),
        ],
        out_specs=pl.BlockSpec((1, tile_h, W, Cout_p), lambda n, h: (n, h, 0, 0)),
        compiler_params=pltpu.CompilerParams(
            dimension_semantics=("parallel", "parallel"),
            vmem_limit_bytes=48 * 1024 * 1024),
    )(x_pad, prep["w1"], prep["b1"], prep["w2"], prep["b2"],
      prep["w3"], prep["b3"])


def bottleneck_pallas(x_nchw, params, *, tile_h=None):
    """Bottleneck forward (stride=1, groups=1, dilation=1, no downsample) from
    NCHW f32 — thin conversion wrapper around the NHWC lane-padded kernel path."""
    N, Cin, H, W = x_nchw.shape
    prep = prepare_bottleneck_params(params, Cin)

    # NCHW f32 -> NHWC bf16, 1-px spatial zero-pad + lane-pad channels (one pass).
    x = jnp.transpose(x_nchw, (0, 2, 3, 1)).astype(jnp.bfloat16)
    x = jnp.pad(x, ((0, 0), (1, 1), (1, 1), (0, prep["Cin_p"] - Cin)))

    out = bottleneck_pallas_nhwc(x, prep, tile_h=tile_h)   # (N,H,W,Cout_p) bf16
    # Standalone test path only: back to NCHW f32.  When chaining Bottlenecks,
    # keep the lane-padded NHWC bf16 output and skip this conversion entirely.
    return jnp.transpose(out[..., :prep["Cout"]].astype(jnp.float32), (0, 3, 1, 2))


def bottleneck_ref(x_nchw, params):
    """Pure-JAX NCHW reference (mirrors the PyTorch forward in eval mode)."""
    dn = ("NCHW", "OIHW", "NCHW")
    hi = lax.Precision.HIGHEST

    def bn(h, g, b, m, v):
        scale = (g / jnp.sqrt(v + EPS))[None, :, None, None]
        bias = (b - m * g / jnp.sqrt(v + EPS))[None, :, None, None]
        return h * scale + bias

    h = lax.conv_general_dilated(x_nchw, params["conv1_w"], (1, 1), "VALID",
                                 dimension_numbers=dn, precision=hi)
    h = jax.nn.relu(bn(h, params["bn1_g"], params["bn1_b"], params["bn1_m"], params["bn1_v"]))
    h = lax.conv_general_dilated(h, params["conv2_w"], (1, 1), ((1, 1), (1, 1)),
                                 dimension_numbers=dn, precision=hi)
    h = jax.nn.relu(bn(h, params["bn2_g"], params["bn2_b"], params["bn2_m"], params["bn2_v"]))
    h = lax.conv_general_dilated(h, params["conv3_w"], (1, 1), "VALID",
                                 dimension_numbers=dn, precision=hi)
    h = bn(h, params["bn3_g"], params["bn3_b"], params["bn3_m"], params["bn3_v"])
    return jax.nn.relu(h + x_nchw)


def make_params(key, inplanes, planes, base_width=64, groups=1):
    width = int(planes * (base_width / 64.0)) * groups
    cout = planes * 4  # expansion
    ks = jax.random.split(key, 16)

    def u(k, shape, lo=-0.3, hi=0.3):
        return jax.random.uniform(k, shape, jnp.float32, lo, hi)

    return dict(
        conv1_w=u(ks[0], (width, inplanes, 1, 1)),
        conv2_w=u(ks[1], (width, width, 3, 3)),
        conv3_w=u(ks[2], (cout, width, 1, 1)),
        bn1_g=u(ks[3], (width,), 0.5, 1.5), bn1_b=u(ks[4], (width,)),
        bn1_m=u(ks[5], (width,)),           bn1_v=u(ks[6], (width,), 0.5, 1.5),
        bn2_g=u(ks[7], (width,), 0.5, 1.5), bn2_b=u(ks[8], (width,)),
        bn2_m=u(ks[9], (width,)),           bn2_v=u(ks[10], (width,), 0.5, 1.5),
        bn3_g=u(ks[11], (cout,), 0.5, 1.5), bn3_b=u(ks[12], (cout,)),
        bn3_m=u(ks[13], (cout,)),           bn3_v=u(ks[14], (cout,), 0.5, 1.5),
    )


if __name__ == "__main__":
    key = jax.random.PRNGKey(0)
    kx, kp = jax.random.split(key)

    # Bottleneck(inplanes=16, planes=4): width=4, planes*expansion=16 (== inplanes)
    N, inplanes, planes, H, W = 2, 16, 4, 16, 16
    x = jax.random.normal(kx, (N, inplanes, H, W), jnp.float32)
    params = make_params(kp, inplanes, planes)

    out = jax.block_until_ready(bottleneck_pallas(x, params))

    # reference on bf16-rounded inputs/weights (what the kernel's MXU consumes)
    q = lambda a: a.astype(jnp.bfloat16).astype(jnp.float32)
    params_q = dict(params)
    for k in ("conv1_w", "conv2_w", "conv3_w"):
        params_q[k] = q(params[k])
    ref = jax.block_until_ready(bottleneck_ref(q(x), params_q))

    assert out.shape == (N, planes * 4, H, W)
    err = float(jnp.max(jnp.abs(out - ref)))
    # kernel keeps bf16 intermediates, folds BN scale into bf16 weights and
    # emits bf16 output -> compare with bf16-level tolerances.
    assert jnp.allclose(out, ref, rtol=3e-2, atol=1e-1), \
        f"mismatch, max abs err {err:.4e}"

    print("KERNEL_OK")
</pallas_src>

<mosaic_0001>
module attributes {stable_mosaic.version = 11 : i64} {
  func.func @bottleneck_kernel(%arg0: i32, %arg1: i32, %arg2: memref<1x18x18x128xbf16, #tpu.memory_space<vmem>>, %arg3: memref<128x128xbf16, #tpu.memory_space<vmem>>, %arg4: memref<1x128xf32, #tpu.memory_space<vmem>>, %arg5: memref<1152x128xbf16, #tpu.memory_space<vmem>>, %arg6: memref<1x128xf32, #tpu.memory_space<vmem>>, %arg7: memref<128x128xbf16, #tpu.memory_space<vmem>>, %arg8: memref<1x128xf32, #tpu.memory_space<vmem>>, %arg9: memref<1x16x16x128xbf16, #tpu.memory_space<vmem>>) attributes {dimension_semantics = [#tpu.dimension_semantics<parallel>, #tpu.dimension_semantics<parallel>], iteration_bounds = array<i64: 2, 1>, scalar_prefetch = 0 : i64, scratch_operands = 0 : i64, tpu.core_type = #tpu.core_type<tc>, window_params = [{transform_indices = @transform_0, window_bounds = array<i64: 1, 18, 18, 128>}, {pipeline_mode = #tpu.pipeline_mode<synchronous>, transform_indices = @transform_1, window_bounds = array<i64: 128, 128>}, {pipeline_mode = #tpu.pipeline_mode<synchronous>, transform_indices = @transform_2, window_bounds = array<i64: 1, 128>}, {pipeline_mode = #tpu.pipeline_mode<synchronous>, transform_indices = @transform_3, window_bounds = array<i64: 1152, 128>}, {pipeline_mode = #tpu.pipeline_mode<synchronous>, transform_indices = @transform_4, window_bounds = array<i64: 1, 128>}, {pipeline_mode = #tpu.pipeline_mode<synchronous>, transform_indices = @transform_5, window_bounds = array<i64: 128, 128>}, {pipeline_mode = #tpu.pipeline_mode<synchronous>, transform_indices = @transform_6, window_bounds = array<i64: 1, 128>}, {transform_indices = @transform_7, window_bounds = array<i64: 1, 16, 16, 128>}]} {
    %c16_i32 = arith.constant 16 : i32
    %0 = arith.muli %arg1, %c16_i32 : i32
    %c0 = arith.constant 0 : index
    %1 = arith.index_cast %0 : i32 to index
    %c0_0 = arith.constant 0 : index
    %c0_1 = arith.constant 0 : index
    %2 = vector.load %arg2[%c0, %1, %c0_0, %c0_1] : memref<1x18x18x128xbf16, #tpu.memory_space<vmem>>, vector<1x18x18x128xbf16>
    %3 = vector.shape_cast %2 : vector<1x18x18x128xbf16> to vector<18x18x128xbf16>
    %4 = vector.shape_cast %3 : vector<18x18x128xbf16> to vector<324x128xbf16>
    %c0_2 = arith.constant 0 : index
    %c0_3 = arith.constant 0 : index
    %5 = vector.load %arg3[%c0_2, %c0_3] : memref<128x128xbf16, #tpu.memory_space<vmem>>, vector<128x128xbf16>
    %cst = arith.constant dense<0.000000e+00> : vector<324x128xf32>
    %6 = tpu.matmul %4, %5, %cst {dimension_numbers = #tpu.dot_dimension_numbers<[1], [0], [0], [1], [0, 0, 1, 1], [], []>} : vector<324x128xbf16>, vector<128x128xbf16>, vector<324x128xf32> -> vector<324x128xf32>
    %7 = vector.shape_cast %6 : vector<324x128xf32> to vector<18x18x128xf32>
    %8 = tpu.iota {dimensions = array<i32: 0>} : vector<18x18x1xi32>
    %9 = tpu.iota {dimensions = array<i32: 1>} : vector<18x18x1xi32>
    %c1_i32 = arith.constant 1 : i32
    %10 = vector.broadcast %c1_i32 : i32 to vector<18x18x1xi32>
    %11 = arith.cmpi sge, %9, %10 : vector<18x18x1xi32>
    %c16_i32_4 = arith.constant 16 : i32
    %12 = vector.broadcast %c16_i32_4 : i32 to vector<18x18x1xi32>
    %13 = arith.cmpi sle, %9, %12 : vector<18x18x1xi32>
    %14 = arith.andi %11, %13 : vector<18x18x1xi1>
    %15 = vector.broadcast %0 : i32 to vector<18x18x1xi32>
    %16 = arith.addi %15, %8 : vector<18x18x1xi32>
    %c1_i32_5 = arith.constant 1 : i32
    %17 = vector.broadcast %c1_i32_5 : i32 to vector<18x18x1xi32>
    %18 = arith.cmpi sge, %16, %17 : vector<18x18x1xi32>
    %19 = arith.andi %14, %18 : vector<18x18x1xi1>
    %20 = vector.broadcast %0 : i32 to vector<18x18x1xi32>
    %21 = arith.addi %20, %8 : vector<18x18x1xi32>
    %c16_i32_6 = arith.constant 16 : i32
    %22 = vector.broadcast %c16_i32_6 : i32 to vector<18x18x1xi32>
    %23 = arith.cmpi sle, %21, %22 : vector<18x18x1xi32>
    %24 = arith.andi %19, %23 : vector<18x18x1xi1>
    %c0_7 = arith.constant 0 : index
    %c0_8 = arith.constant 0 : index
    %25 = vector.load %arg4[%c0_7, %c0_8] : memref<1x128xf32, #tpu.memory_space<vmem>>, vector<1x128xf32>
    %26 = vector.shape_cast %25 : vector<1x128xf32> to vector<1x1x128xf32>
    %27 = vector.broadcast %26 : vector<1x1x128xf32> to vector<18x18x128xf32>
    %28 = arith.addf %7, %27 : vector<18x18x128xf32>
    %cst_9 = arith.constant 0.000000e+00 : f32
    %29 = vector.broadcast %cst_9 : f32 to vector<18x18x128xf32>
    %30 = arith.maximumf %28, %29 : vector<18x18x128xf32>
    %cst_10 = arith.constant 0.000000e+00 : f32
    %31 = vector.shape_cast %24 : vector<18x18x1xi1> to vector<18x18x1xi1>
    %32 = vector.broadcast %31 : vector<18x18x1xi1> to vector<18x18x128xi1>
    %33 = vector.broadcast %cst_10 : f32 to vector<18x18x128xf32>
    %34 = arith.select %32, %30, %33 : vector<18x18x128xi1>, vector<18x18x128xf32>
    %35 = arith.truncf %34 : vector<18x18x128xf32> to vector<18x18x128xbf16>
    %c0_11 = arith.constant 0 : index
    %c0_12 = arith.constant 0 : index
    %36 = vector.load %arg6[%c0_11, %c0_12] : memref<1x128xf32, #tpu.memory_space<vmem>>, vector<1x128xf32>
    %37 = vector.shape_cast %36 : vector<1x128xf32> to vector<1x128xf32>
    %38 = vector.broadcast %37 : vector<1x128xf32> to vector<256x128xf32>
    %39 = vector.extract_strided_slice %35 {offsets = [0, 0, 0], sizes = [16, 16, 128], strides = [1, 1, 1]} : vector<18x18x128xbf16> to vector<16x16x128xbf16>
    %40 = vector.shape_cast %39 : vector<16x16x128xbf16> to vector<256x128xbf16>
    %c0_13 = arith.constant 0 : index
    %c0_14 = arith.constant 0 : index
    %41 = vector.load %arg5[%c0_13, %c0_14] : memref<1152x128xbf16, #tpu.memory_space<vmem>>, vector<128x128xbf16>
    %cst_15 = arith.constant dense<0.000000e+00> : vector<256x128xf32>
    %42 = tpu.matmul %40, %41, %cst_15 {dimension_numbers = #tpu.dot_dimension_numbers<[1], [0], [0], [1], [0, 0, 1, 1], [], []>} : vector<256x128xbf16>, vector<128x128xbf16>, vector<256x128xf32> -> vector<256x128xf32>
    %43 = arith.addf %38, %42 : vector<256x128xf32>
    %44 = vector.extract_strided_slice %35 {offsets = [0, 1, 0], sizes = [16, 16, 128], strides = [1, 1, 1]} : vector<18x18x128xbf16> to vector<16x16x128xbf16>
    %45 = vector.shape_cast %44 : vector<16x16x128xbf16> to vector<256x128xbf16>
    %c128 = arith.constant 128 : index
    %c0_16 = arith.constant 0 : index
    %46 = vector.load %arg5[%c128, %c0_16] : memref<1152x128xbf16, #tpu.memory_space<vmem>>, vector<128x128xbf16>
    %cst_17 = arith.constant dense<0.000000e+00> : vector<256x128xf32>
    %47 = tpu.matmul %45, %46, %cst_17 {dimension_numbers = #tpu.dot_dimension_numbers<[1], [0], [0], [1], [0, 0, 1, 1], [], []>} : vector<256x128xbf16>, vector<128x128xbf16>, vector<256x128xf32> -> vector<256x128xf32>
    %48 = arith.addf %43, %47 : vector<256x128xf32>
    %49 = vector.extract_strided_slice %35 {offsets = [0, 2, 0], sizes = [16, 16, 128], strides = [1, 1, 1]} : vector<18x18x128xbf16> to vector<16x16x128xbf16>
    %50 = vector.shape_cast %49 : vector<16x16x128xbf16> to vector<256x128xbf16>
    %c256 = arith.constant 256 : index
    %c0_18 = arith.constant 0 : index
    %51 = vector.load %arg5[%c256, %c0_18] : memref<1152x128xbf16, #tpu.memory_space<vmem>>, vector<128x128xbf16>
    %cst_19 = arith.constant dense<0.000000e+00> : vector<256x128xf32>
    %52 = tpu.matmul %50, %51, %cst_19 {dimension_numbers = #tpu.dot_dimension_numbers<[1], [0], [0], [1], [0, 0, 1, 1], [], []>} : vector<256x128xbf16>, vector<128x128xbf16>, vector<256x128xf32> -> vector<256x128xf32>
    %53 = arith.addf %48, %52 : vector<256x128xf32>
    %54 = vector.extract_strided_slice %35 {offsets = [1, 0, 0], sizes = [16, 16, 128], strides = [1, 1, 1]} : vector<18x18x128xbf16> to vector<16x16x128xbf16>
    %55 = vector.shape_cast %54 : vector<16x16x128xbf16> to vector<256x128xbf16>
    %c384 = arith.constant 384 : index
    %c0_20 = arith.constant 0 : index
    %56 = vector.load %arg5[%c384, %c0_20] : memref<1152x128xbf16, #tpu.memory_space<vmem>>, vector<128x128xbf16>
    %cst_21 = arith.constant dense<0.000000e+00> : vector<256x128xf32>
    %57 = tpu.matmul %55, %56, %cst_21 {dimension_numbers = #tpu.dot_dimension_numbers<[1], [0], [0], [1], [0, 0, 1, 1], [], []>} : vector<256x128xbf16>, vector<128x128xbf16>, vector<256x128xf32> -> vector<256x128xf32>
    %58 = arith.addf %53, %57 : vector<256x128xf32>
    %59 = vector.extract_strided_slice %35 {offsets = [1, 1, 0], sizes = [16, 16, 128], strides = [1, 1, 1]} : vector<18x18x128xbf16> to vector<16x16x128xbf16>
    %60 = vector.shape_cast %59 : vector<16x16x128xbf16> to vector<256x128xbf16>
    %c512 = arith.constant 512 : index
    %c0_22 = arith.constant 0 : index
    %61 = vector.load %arg5[%c512, %c0_22] : memref<1152x128xbf16, #tpu.memory_space<vmem>>, vector<128x128xbf16>
    %cst_23 = arith.constant dense<0.000000e+00> : vector<256x128xf32>
    %62 = tpu.matmul %60, %61, %cst_23 {dimension_numbers = #tpu.dot_dimension_numbers<[1], [0], [0], [1], [0, 0, 1, 1], [], []>} : vector<256x128xbf16>, vector<128x128xbf16>, vector<256x128xf32> -> vector<256x128xf32>
    %63 = arith.addf %58, %62 : vector<256x128xf32>
    %64 = vector.extract_strided_slice %35 {offsets = [1, 2, 0], sizes = [16, 16, 128], strides = [1, 1, 1]} : vector<18x18x128xbf16> to vector<16x16x128xbf16>
    %65 = vector.shape_cast %64 : vector<16x16x128xbf16> to vector<256x128xbf16>
    %c640 = arith.constant 640 : index
    %c0_24 = arith.constant 0 : index
    %66 = vector.load %arg5[%c640, %c0_24] : memref<1152x128xbf16, #tpu.memory_space<vmem>>, vector<128x128xbf16>
    %cst_25 = arith.constant dense<0.000000e+00> : vector<256x128xf32>
    %67 = tpu.matmul %65, %66, %cst_25 {dimension_numbers = #tpu.dot_dimension_numbers<[1], [0], [0], [1], [0, 0, 1, 1], [], []>} : vector<256x128xbf16>, vector<128x128xbf16>, vector<256x128xf32> -> vector<256x128xf32>
    %68 = arith.addf %63, %67 : vector<256x128xf32>
    %69 = vector.extract_strided_slice %35 {offsets = [2, 0, 0], sizes = [16, 16, 128], strides = [1, 1, 1]} : vector<18x18x128xbf16> to vector<16x16x128xbf16>
    %70 = vector.shape_cast %69 : vector<16x16x128xbf16> to vector<256x128xbf16>
    %c768 = arith.constant 768 : index
    %c0_26 = arith.constant 0 : index
    %71 = vector.load %arg5[%c768, %c0_26] : memref<1152x128xbf16, #tpu.memory_space<vmem>>, vector<128x128xbf16>
    %cst_27 = arith.constant dense<0.000000e+00> : vector<256x128xf32>
    %72 = tpu.matmul %70, %71, %cst_27 {dimension_numbers = #tpu.dot_dimension_numbers<[1], [0], [0], [1], [0, 0, 1, 1], [], []>} : vector<256x128xbf16>, vector<128x128xbf16>, vector<256x128xf32> -> vector<256x128xf32>
    %73 = arith.addf %68, %72 : vector<256x128xf32>
    %74 = vector.extract_strided_slice %35 {offsets = [2, 1, 0], sizes = [16, 16, 128], strides = [1, 1, 1]} : vector<18x18x128xbf16> to vector<16x16x128xbf16>
    %75 = vector.shape_cast %74 : vector<16x16x128xbf16> to vector<256x128xbf16>
    %c896 = arith.constant 896 : index
    %c0_28 = arith.constant 0 : index
    %76 = vector.load %arg5[%c896, %c0_28] : memref<1152x128xbf16, #tpu.memory_space<vmem>>, vector<128x128xbf16>
    %cst_29 = arith.constant dense<0.000000e+00> : vector<256x128xf32>
    %77 = tpu.matmul %75, %76, %cst_29 {dimension_numbers = #tpu.dot_dimension_numbers<[1], [0], [0], [1], [0, 0, 1, 1], [], []>} : vector<256x128xbf16>, vector<128x128xbf16>, vector<256x128xf32> -> vector<256x128xf32>
    %78 = arith.addf %73, %77 : vector<256x128xf32>
    %79 = vector.extract_strided_slice %35 {offsets = [2, 2, 0], sizes = [16, 16, 128], strides = [1, 1, 1]} : vector<18x18x128xbf16> to vector<16x16x128xbf16>
    %80 = vector.shape_cast %79 : vector<16x16x128xbf16> to vector<256x128xbf16>
    %c1024 = arith.constant 1024 : index
    %c0_30 = arith.constant 0 : index
    %81 = vector.load %arg5[%c1024, %c0_30] : memref<1152x128xbf16, #tpu.memory_space<vmem>>, vector<128x128xbf16>
    %cst_31 = arith.constant dense<0.000000e+00> : vector<256x128xf32>
    %82 = tpu.matmul %80, %81, %cst_31 {dimension_numbers = #tpu.dot_dimension_numbers<[1], [0], [0], [1], [0, 0, 1, 1], [], []>} : vector<256x128xbf16>, vector<128x128xbf16>, vector<256x128xf32> -> vector<256x128xf32>
    %83 = arith.addf %78, %82 : vector<256x128xf32>
    %cst_32 = arith.constant 0.000000e+00 : f32
    %84 = vector.broadcast %cst_32 : f32 to vector<256x128xf32>
    %85 = arith.maximumf %83, %84 : vector<256x128xf32>
    %86 = arith.truncf %85 : vector<256x128xf32> to vector<256x128xbf16>
    %c0_33 = arith.constant 0 : index
    %c0_34 = arith.constant 0 : index
    %87 = vector.load %arg7[%c0_33, %c0_34] : memref<128x128xbf16, #tpu.memory_space<vmem>>, vector<128x128xbf16>
    %cst_35 = arith.constant dense<0.000000e+00> : vector<256x128xf32>
    %88 = tpu.matmul %86, %87, %cst_35 {dimension_numbers = #tpu.dot_dimension_numbers<[1], [0], [0], [1], [0, 0, 1, 1], [], []>} : vector<256x128xbf16>, vector<128x128xbf16>, vector<256x128xf32> -> vector<256x128xf32>
    %c0_36 = arith.constant 0 : index
    %c0_37 = arith.constant 0 : index
    %89 = vector.load %arg8[%c0_36, %c0_37] : memref<1x128xf32, #tpu.memory_space<vmem>>, vector<1x128xf32>
    %90 = vector.broadcast %89 : vector<1x128xf32> to vector<256x128xf32>
    %91 = arith.addf %88, %90 : vector<256x128xf32>
    %92 = vector.extract_strided_slice %3 {offsets = [1, 1, 0], sizes = [16, 16, 128], strides = [1, 1, 1]} : vector<18x18x128xbf16> to vector<16x16x128xbf16>
    %93 = vector.shape_cast %92 : vector<16x16x128xbf16> to vector<256x128xbf16>
    %94 = arith.extf %93 : vector<256x128xbf16> to vector<256x128xf32>
    %95 = arith.addf %91, %94 : vector<256x128xf32>
    %cst_38 = arith.constant 0.000000e+00 : f32
    %96 = vector.broadcast %cst_38 : f32 to vector<256x128xf32>
    %97 = arith.maximumf %95, %96 : vector<256x128xf32>
    %98 = vector.shape_cast %97 : vector<256x128xf32> to vector<1x16x16x128xf32>
    %99 = arith.truncf %98 : vector<1x16x16x128xf32> to vector<1x16x16x128xbf16>
    %c0_39 = arith.constant 0 : index
    %c0_40 = arith.constant 0 : index
    %c0_41 = arith.constant 0 : index
    %c0_42 = arith.constant 0 : index
    %100 = vector.load %arg9[%c0_39, %c0_40, %c0_41, %c0_42] : memref<1x16x16x128xbf16, #tpu.memory_space<vmem>>, vector<1x16x16x128xbf16>
    tpu.vector_store %arg9[%c0_39, %c0_40, %c0_41, %c0_42], %99 {strides = array<i32>} : memref<1x16x16x128xbf16, #tpu.memory_space<vmem>>, vector<1x16x16x128xbf16>,
    return
  }
  func.func @transform_0(%arg0: i32, %arg1: i32) -> (i32, i32, i32, i32) {
    %c0_i32 = arith.constant 0 : i32
    %c0_i32_0 = arith.constant 0 : i32
    %c0_i32_1 = arith.constant 0 : i32
    %c0_i32_2 = arith.constant 0 : i32
    return %arg0, %c0_i32, %c0_i32_0, %c0_i32_1 : i32, i32, i32, i32
  }
  func.func @transform_1(%arg0: i32, %arg1: i32) -> (i32, i32) {
    %c0_i32 = arith.constant 0 : i32
    %c0_i32_0 = arith.constant 0 : i32
    %c0_i32_1 = arith.constant 0 : i32
    return %c0_i32, %c0_i32_0 : i32, i32
  }
  func.func @transform_2(%arg0: i32, %arg1: i32) -> (i32, i32) {
    %c0_i32 = arith.constant 0 : i32
    %c0_i32_0 = arith.constant 0 : i32
    %c0_i32_1 = arith.constant 0 : i32
    return %c0_i32, %c0_i32_0 : i32, i32
  }
  func.func @transform_3(%arg0: i32, %arg1: i32) -> (i32, i32) {
    %c0_i32 = arith.constant 0 : i32
    %c0_i32_0 = arith.constant 0 : i32
    %c0_i32_1 = arith.constant 0 : i32
    return %c0_i32, %c0_i32_0 : i32, i32
  }
  func.func @transform_4(%arg0: i32, %arg1: i32) -> (i32, i32) {
    %c0_i32 = arith.constant 0 : i32
    %c0_i32_0 = arith.constant 0 : i32
    %c0_i32_1 = arith.constant 0 : i32
    return %c0_i32, %c0_i32_0 : i32, i32
  }
  func.func @transform_5(%arg0: i32, %arg1: i32) -> (i32, i32) {
    %c0_i32 = arith.constant 0 : i32
    %c0_i32_0 = arith.constant 0 : i32
    %c0_i32_1 = arith.constant 0 : i32
    return %c0_i32, %c0_i32_0 : i32, i32
  }
  func.func @transform_6(%arg0: i32, %arg1: i32) -> (i32, i32) {
    %c0_i32 = arith.constant 0 : i32
    %c0_i32_0 = arith.constant 0 : i32
    %c0_i32_1 = arith.constant 0 : i32
    return %c0_i32, %c0_i32_0 : i32, i32
  }
  func.func @transform_7(%arg0: i32, %arg1: i32) -> (i32, i32, i32, i32) {
    %c0_i32 = arith.constant 0 : i32
    %c0_i32_0 = arith.constant 0 : i32
    %c0_i32_1 = arith.constant 0 : i32
    return %arg0, %arg1, %c0_i32, %c0_i32_0 : i32, i32, i32, i32
  }
}

</mosaic_0001>

<bundles_post_ra>
// kernel: tpu_custom_call.1
= control target key start
LH: loop header
LB: loop body
LE: loop exit
PB: predicated region body
PF: predicated region fallthrough
CT: control target
= control target key end

     0   :  { %12 = vsyncpa [#allocation3], 0  ;;  %s13601_s0 = inlined_call_operand.vmem [shape: bf16[2,18,18,128], index: 0, kind: input, shape index: {}]   ;;  %s13602_s1 = inlined_call_operand.vmem [shape: bf16[128,128], index: 1, kind: input, shape index: {}]   ;;  %s13603_s2 = inlined_call_operand.vmem [shape: f32[1,128], index: 2, kind: input, shape index: {}]   ;;  %s13604_s3 = inlined_call_operand.vmem [shape: bf16[1152,128], index: 3, kind: input, shape index: {}]   ;;  %s13605_s4 = inlined_call_operand.vmem [shape: f32[1,128], index: 4, kind: input, shape index: {}]   ;;  %s13606_s5 = inlined_call_operand.vmem [shape: bf16[128,128], index: 5, kind: input, shape index: {}]   ;;  %s13607_s6 = inlined_call_operand.vmem [shape: f32[1,128], index: 6, kind: input, shape index: {}]   ;;  %s13608_s7 = inlined_call_operand.hbm [shape: bf16[2,16,16,128], index: 7, kind: output, shape index: {}]  }
   0x1   :  { %14 = vsyncpa [#allocation3 + $0x1], 0  ;;  %s11040_s24 = smov 0   ;;  %s11042_s25 = smov 0  }
   0x2   :  { %s11044_s26 = smov 0   ;;  %s11046_s27 = smov 0  }
   0x3   :  { %s11048_s28 = smov 0   ;;  %s11050_s29 = smov 0  }
   0x4 LB: > { %s9081_s30 = sadd.s32 4294967295, %s10988_s29   ;;  %s9082_s8 = sadd.s32 4294967294, %s10988_s29   ;;  %s10988_s29 = sphi %s11050_s29, %s20_s29   ;;  %s10984_s28 = sphi %s11048_s28, %s13775_s28   ;;  %s10980_s27 = sphi %s11046_s27, %s13774_s27   ;;  %s10976_s26 = sphi %s11044_s26, %s13773_s26   ;;  %s10972_s25 = sphi %s11042_s25, %s13772_s25   ;;  %s10968_s24 = sphi %s11040_s24, %s13771_s24  }
   0x5   : > { %s32_s9 = sadd.s32 1, %s10984_s28  ;;  %s193_s10 = sadd.s32 1, %s10976_s26 }
   0x6   : > { %p34_p0 = scmp.ge.s32.totalorder %s32_s9, 2  ;;  %p203_p1 = scmp.ne.s32.totalorder %s10976_s26, %s10972_s25 }
   0x7   : > { %p204_p2 = scmp.eq.s32.totalorder %s9081_s30, 1  ;;  %p209_p3 = scmp.ne.s32.totalorder %s10972_s25, %s10968_s24 }
   0x8   : > { %s13777_s9 = smov (%p34_p0, %s32_s9), 0  ;;  %p210_p5 = scmp.eq.s32.totalorder %s9082_s8, 1 }
   0x9   : > { %p11080_p4 = por %p204_p2, %p203_p1  ;;  %s188_s12 = ssub.s32 %s10984_s28, %s13777_s9 }
   0xa   : > { %p9085_p6 = scmp.ge.s32.totalorder %s10988_s29, 1  ;;  %p191_p7 = scmp.eq.s32.totalorder %s188_s12, 0 }
   0xb   : > { %p11087_p8 = por %p210_p5, %p209_p3  ;;  %p254_p9 = scmp.lt.s32.totalorder %s10988_s29, 3 }
   0xc   : > { %s11093_s14 = scalar_select %p191_p7, %s10976_s26, %s193_s10  }
   0xd   : > { %p255_p10 = pnand %p9085_p6, %p254_p9 }
   0xf   : > { %258 = sbr.rel (%p255_p10) target bundleno = 1271 (0x4f7), region = 48 }
  0x16   : > { %v10724_v0 = vld [vmem:[%s13602_s1] sm:$0xff]   ;;  %v10990_v1 = vmov 0.0   ;;  %v10725_v2 = vld [vmem:[%s13602_s1 + $0x8] sm:$0xff]   ;;  %vm10991_vm0 = vmmov 0   ;;  %p286_p11 = scmp.lt.s32.totalorder %s10980_s27, 1  ;;  %v416_v3 = vlaneseq  ;;  %v10726_v4 = vld [vmem:[%s13602_s1 + $0x10] sm:$0xff]  }
  0x17   : > { %9775 = vmatprep.subr.bf16.mxu0 %v10990_v1  ;;  %9791 = vmatprep.mubr.msk.bf16.mxu0 %vm10991_vm0, %v10990_v1  ;;  %v10992_v6 = vmov 1966171168   ;;  %v10727_v9 = vld [vmem:[%s13602_s1 + $0x18] sm:$0xff]   ;;  %v10728_v19 = vld [vmem:[%s13602_s1 + $0x20] sm:$0xff]   ;;  %v10729_v29 = vld [vmem:[%s13602_s1 + $0x28] sm:$0xff]   ;;  %vm10995_vm2 = vmmov 1  }
  0x18   : > { %9776 = vmatpush3.bf16.msra.mxu0 %v10724_v0  ;;  %s287_s19 = scalar_select %p286_p11, %s10980_s27, 1  ;;  %v414_v7 = vunpack.c.l.s4 %v10992_v6  ;;  %v11117_v8 = vshrl.u32 %v416_v3, 7  ;;  %v10730_v47 = vld [vmem:[%s13602_s1 + $0x30] sm:$0xff]   ;;  %v10731_v0 = vld [vmem:[%s13602_s1 + $0x38] sm:$0xff]   ;;  %vm6132_vm5 = vcmask 1046528  }
  0x19   : > { %9777 = vmatprep.subr.bf16.mxu0 %v10990_v1  ;;  %vm5634_vm6 = vsmask.f32 7424  ;;  %vm8314_vm7 = vsmask.f32 3328  ;;  %vm8315_vm8 = vsmask.f32 7440 }
  0x1a   : > { %s10659_s22 = smul.u32 216, %s287_s19  ;;  %v415_v12 = vunpack.c.0.s8 %v414_v7  ;;  %vm3696_vm1 = vcmp.ge.s32.totalorder %v11117_v8, 1  ;;  %vm13332_vm9 = vmor %vm8314_vm7, %vm8315_vm8  ;;  %s283_s10 = sand.u32 1, %s10972_s25  }
  0x1b   : > { %vm11573_vm3 = vmpackc.low %vm10995_vm2, %vm3696_vm1  ;;  %s9086_s12 = sshll.u32 %s283_s10, 7  ;;  %s10997_s21 = smov [#allocation2]  }
  0x1c   : > { %9778 = vmatpush3.bf16.msra.mxu0 %v10725_v2  ;;  %s11114_s8 = scalar_lea.vmem %s13601_s0, %s10659_s22  ;;  %v11127_v16 = vsub.s32 %v415_v12, %v11117_v8  ;;  %s13421_s15 = scalar_lea.vmem [#allocation2], %s9086_s12 }
  0x1d   : > { %9779 = vmatprep.subr.bf16.mxu0 %v10990_v1  ;;  %v9088_v5 = vld.sshfl [vmem:[%s11114_s8] sm:$0x33 pattern:$0x75316420]  ;;  %s9006_s16 = sshll.u32 %s13421_s15, 4  ;;  %s10914_s22 = sshll.u32 %s10997_s21, 4  ;;  %s13549_s16 = int_to_ptr.vmem [resolvable:$true] %s9006_s16  ;;  %s10915_s22 = int_to_ptr.vmem [resolvable:$false] %s10914_s22 }
  0x1e   : > { %v9089_v10 = vld.sshfl [vmem:[%s11114_s8 + $0x4] sm:$0x33 pattern:$0x75316420]  ;;  %v412_v11 = vcombine.high %v9088_v5, %v9088_v5  ;;  %v419_v20 = vrot.slane %v9088_v5, %v11127_v16  ;;  %s10910_s20 = scalar_lea.vmem %s13549_s16, 2048  ;;  %s10916_s23 = scalar_lea.vmem %s10915_s22, 4096 }
  0x1f   : > { %v436_v13 = vcombine.high %v9089_v10, %v9089_v10  ;;  %v10862_v14 = vld.sshfl [vmem:[%s11114_s8 + $0xc] sm:$0x33 pattern:$0x75316420]  ;;  %v443_v22 = vrot.slane %v9089_v10, %v11127_v16  ;;  %p10911_p12 = scmp.ne.s32.totalorder %s13549_s16, %s10910_s20  ;;  %p10917_p1 = scmp.lt.s32.totalorder %s13549_s16, %s10915_s22 }
  0x20   : > { %9780 = vmatpush3.bf16.msra.mxu0 %v10726_v4  ;;  %v10863_v15 = vld.sshfl [vmem:[%s11114_s8 + $0x10] sm:$0x33 pattern:$0x75316420]  ;;  %v426_v21 = vrot.slane %v412_v11, %v11127_v16  ;;  %v474_v30 = vcombine.high %v10862_v14, %v10862_v14  ;;  %v481_v31 = vrot.slane %v10862_v14, %v11127_v16  ;;  %p10918_p2 = scmp.lt.s32.totalorder %s10916_s23, %s10910_s20 }
  0x21   : > { %9781 = vmatprep.subr.bf16.mxu0 %v10990_v1  ;;  %v9090_v17 = vld.sshfl [vmem:[%s11114_s8 + $0x8] sm:$0x1 pattern:$0x75316420]  ;;  %v450_v23 = vrot.slane %v436_v13, %v11127_v16  ;;  %v498_v32 = vcombine.high %v10863_v15, %v10863_v15  ;;  %v505_v33 = vrot.slane %v10863_v15, %v11127_v16  ;;  %p10912_p13 = pnand %p10911_p12, %p11080_p4 }
  0x22   : > { %v10864_v18 = vld.sshfl [vmem:[%s11114_s8 + $0x14] sm:$0x1 pattern:$0x75316420]  ;;  %v466_v24 = vrot.slane %v9090_v17, %v11127_v16  ;;  %v1537_v25 = vcombine.low %v419_v20, %v426_v21  ;;  %v9094_v26 = vcombine.high %v419_v20, %v426_v21  ;;  %v488_v38 = vrot.slane %v474_v30, %v11127_v16  ;;  %p10919_p3 = por %p10918_p2, %p10917_p1 }
  0x23   : > { %v1539_v27 = vcombine.low %v443_v22, %v450_v23  ;;  %v9095_v28 = vcombine.high %v443_v22, %v450_v23  ;;  %v489_v39 = vcombine.high %v481_v31, %v481_v31  ;;  %v512_v40 = vrot.slane %v498_v32, %v11127_v16  ;;  %v10865_v42 = vld.sshfl [vmem:[%s11114_s8 + $0x18] sm:$0x33 pattern:$0x75316420]  ;;  %p10913_p0 = pneg %p10912_p13 }
  0x24   : > { %9782 = vmatpush3.bf16.msra.mxu0 %v10727_v9  ;;  %v1547_v34 = vrot.slane %v1537_v25, %v11127_v16  ;;  %v1554_v35 = vrot.slane %v9094_v26, %v11127_v16  ;;  %v513_v41 = vcombine.high %v505_v33, %v505_v33  ;;  %v1586_v45 = vcombine.low %v466_v24, %v481_v31  ;;  %v10866_v46 = vld.sshfl [vmem:[%s11114_s8 + $0x1c] sm:$0x33 pattern:$0x75316420] }
  0x25   : > { %9783 = vmatprep.subr.bf16.mxu0 %v10990_v1  ;;  %v1561_v36 = vrot.slane %v1539_v27, %v11127_v16  ;;  %v1568_v37 = vrot.slane %v9095_v28, %v11127_v16  ;;  %v490_v48 = vcombine.high %v488_v38, %v488_v38  ;;  %v1587_v49 = vcombine.low %v488_v38, %v489_v39  ;;  %v10867_v57 = vld.sshfl [vmem:[%s11114_s8 + $0x20] sm:$0x1 pattern:$0x75316420]  ;;  %p10920_p5 = pnand %p10919_p3, %p10913_p0 }
  0x26   : > { %v1569_v43 = vcombine.low %v1547_v34, %v1554_v35  ;;  %v1589_v50 = vcombine.low %v512_v40, %v513_v41  ;;  %v1596_v51 = vrot.slane %v1586_v45, %v11127_v16  ;;  %v514_v52 = vcombine.high %v512_v40, %v512_v40  ;;  %v10868_v58 = vld.sshfl [vmem:[%s11114_s8 + $0x24] sm:$0x33 pattern:$0x75316420] }
  0x27   : > { %v1570_v44 = vcombine.low %v1561_v36, %v1568_v37  ;;  %v528_v53 = vrot.slane %v10864_v18, %v11127_v16  ;;  %v1588_v54 = vcombine.low %v490_v48, %v505_v33  ;;  %v1603_v55 = vrot.slane %v1587_v49, %v11127_v16  ;;  %v10869_v63 = vld.sshfl [vmem:[%s11114_s8 + $0x28] sm:$0x33 pattern:$0x75316420] }
  0x28   : > { %9784 = vmatpush3.bf16.msra.mxu0 %v10728_v19  ;;  %v1617_v56 = vrot.slane %v1589_v50, %v11127_v16  ;;  %v1577_v59 = vrot.slane %v1569_v43, %v11127_v16  ;;  %v536_v61 = vcombine.high %v10865_v42, %v10865_v42  ;;  %v543_v62 = vrot.slane %v10865_v42, %v11127_v16  ;;  %v10870_v19 = vld.sshfl [vmem:[%s11114_s8 + $0x2c] sm:$0x1 pattern:$0x75316420] }
  0x29   : > { %9785 = vmatprep.subr.bf16.mxu0 %v10990_v1  ;;  %v1584_v60 = vrot.slane %v1570_v44, %v11127_v16  ;;  %v1610_v2 = vrot.slane %v1588_v54, %v11127_v16  ;;  %v560_v3 = vcombine.high %v10866_v46, %v10866_v46  ;;  %v567_v4 = vrot.slane %v10866_v46, %v11127_v16  ;;  %v10871_v23 = vld.sshfl [vmem:[%s11114_s8 + $0x30] sm:$0x33 pattern:$0x75316420] }
  0x2a   : > { %v550_v5 = vrot.slane %v536_v61, %v11127_v16  ;;  %v1635_v6 = vcombine.low %v514_v52, %v528_v53  ;;  %v1618_v7 = vcombine.low %v1596_v51, %v1603_v55  ;;  %v598_v14 = vcombine.high %v10868_v58, %v10868_v58  ;;  %v10872_v37 = vld.sshfl [vmem:[%s11114_s8 + $0x34] sm:$0x33 pattern:$0x75316420] }
  0x2b   : > { %v1619_v9 = vcombine.low %v1610_v2, %v1617_v56  ;;  %v574_v10 = vrot.slane %v560_v3, %v11127_v16  ;;  %v1585_v11 = vcombine.low %v1577_v59, %v1584_v60  ;;  %v590_v17 = vrot.slane %v10867_v57, %v11127_v16  ;;  %v10873_v38 = vld.sshfl [vmem:[%s11114_s8 + $0x3c] sm:$0x33 pattern:$0x75316420] }
  0x2c   : > { %9786 = vmatpush3.bf16.msra.mxu0 %v10729_v29  ;;  %v1636_v12 = vcombine.low %v543_v62, %v550_v5  ;;  %v9096_v13 = vcombine.high %v543_v62, %v550_v5  ;;  %v605_v18 = vrot.slane %v10868_v58, %v11127_v16  ;;  %v1645_v20 = vrot.slane %v1635_v6, %v11127_v16  ;;  %v10874_v46 = vld.sshfl [vmem:[%s11114_s8 + $0x40] sm:$0x33 pattern:$0x75316420] }
  0x2d   : > { %9787 = vmatprep.subr.bf16.mxu0 %v10990_v1  ;;  %v1638_v15 = vcombine.low %v567_v4, %v574_v10  ;;  %v612_v21 = vrot.slane %v598_v14, %v11127_v16  ;;  %v629_v22 = vrot.slane %v10869_v63, %v11127_v16  ;;  %v1626_v24 = vrot.slane %v1618_v7, %v11127_v16  ;;  %v10875_v51 = vld.sshfl [vmem:[%s11114_s8 + $0x38] sm:$0x1 pattern:$0x75316420] }
  0x2e   : > { %v1633_v25 = vrot.slane %v1619_v9, %v11127_v16  ;;  %v1652_v26 = vrot.slane %v1636_v12, %v11127_v16  ;;  %v613_v27 = vcombine.high %v605_v18, %v605_v18  ;;  %v1659_v28 = vrot.slane %v9096_v13, %v11127_v16  ;;  %v10876_v62 = vld.sshfl [vmem:[%s11114_s8 + $0x48] sm:$0x33 pattern:$0x75316420] }
  0x2f   : > { %v1666_v29 = vrot.slane %v1638_v15, %v11127_v16  ;;  %v614_v30 = vcombine.high %v612_v21, %v612_v21  ;;  %v622_v31 = vcombine.high %v10869_v63, %v10869_v63  ;;  %v9097_v32 = vcombine.high %v567_v4, %v574_v10  ;;  %v10877_v5 = vld.sshfl [vmem:[%s11114_s8 + $0x44] sm:$0x1 pattern:$0x75316420] }
  0x30   : > { %9788 = vmatpush3.bf16.msra.mxu0 %v10730_v47  ;;  %v1685_v33 = vcombine.low %v590_v17, %v605_v18  ;;  %v1686_v34 = vcombine.low %v612_v21, %v613_v27  ;;  %v1634_v39 = vcombine.low %v1626_v24, %v1633_v25  ;;  %v1667_v40 = vcombine.low %v1645_v20, %v1652_v26 }
  0x31   : > { %9789 = vmatprep.subr.bf16.mxu0 %v10990_v1  ;;  %v1687_v35 = vcombine.low %v614_v30, %v629_v22  ;;  %v636_v36 = vrot.slane %v622_v31, %v11127_v16  ;;  %v1668_v41 = vcombine.low %v1659_v28, %v1666_v29  ;;  %v1694_v42 = vrot.slane %v9097_v32, %v11127_v16 }
  0x32   : > { %v1701_v43 = vrot.slane %v1685_v33, %v11127_v16  ;;  %v637_v44 = vcombine.high %v629_v22, %v629_v22  ;;  %v660_v45 = vcombine.high %v10871_v23, %v10871_v23  ;;  %v1708_v47 = vrot.slane %v1686_v34, %v11127_v16  ;;  %v10878_v22 = vld.sshfl [vmem:[%s11114_s8 + $0x4c] sm:$0x33 pattern:$0x75316420] }
  0x33   : > { %v1715_v48 = vrot.slane %v1687_v35, %v11127_v16  ;;  %v638_v49 = vcombine.high %v636_v36, %v636_v36  ;;  %v652_v50 = vrot.slane %v10870_v19, %v11127_v16  ;;  %v667_v52 = vrot.slane %v10871_v23, %v11127_v16  ;;  %v10879_v35 = vld.sshfl [vmem:[%s11114_s8 + $0x50] sm:$0x1 pattern:$0x75316420] }
  0x34   : > { %9790 = vmatpush3.bf16.msra.mxu0 %v10731_v0  ;;  %v674_v53 = vrot.slane %v660_v45, %v11127_v16  ;;  %v1675_v54 = vrot.slane %v1667_v40, %v11127_v16  ;;  %v1682_v55 = vrot.slane %v1668_v41, %v11127_v16  ;;  %v1716_v56 = vcombine.low %v1694_v42, %v1701_v43  ;;  %v10881_v40 = vld.sshfl [vmem:[%s11114_s8 + $0x58] sm:$0x33 pattern:$0x75316420]  ;;  %v10732_v45 = vld [vmem:[%s13604_s3] sm:$0xff]  }
  0x35   : > { %v1717_v57 = vcombine.low %v1708_v47, %v1715_v48  ;;  %v1733_v58 = vcombine.low %v636_v36, %v637_v44  ;;  %v1734_v59 = vcombine.low %v638_v49, %v652_v50  ;;  %v684_v61 = vcombine.high %v10872_v37, %v10872_v37  ;;  %v10880_v36 = vld.sshfl [vmem:[%s11114_s8 + $0x54] sm:$0x33 pattern:$0x75316420]  ;;  %9875 = vmatprep.subr.bf16.mxu0 %v10732_v45 }
  0x36   : > { %v1735_v60 = vcombine.low %v667_v52, %v674_v53  ;;  %v1683_v63 = vcombine.low %v1675_v54, %v1682_v55  ;;  %v9098_v0 = vcombine.high %v667_v52, %v674_v53  ;;  %v722_v2 = vcombine.high %v10873_v38, %v10873_v38 }
  0x37   : > { %9792 = vmatmul.mubr.bf16.vlgmr.msra.gmra.mrb[0].mxu0 %v1585_v11  ;;  %v729_v3 = vrot.slane %v10873_v38, %v11127_v16  ;;  %v1724_v4 = vrot.slane %v1716_v56, %v11127_v16  ;;  %v1731_v6 = vrot.slane %v1717_v57, %v11127_v16  ;;  %v1743_v7 = vrot.slane %v1733_v58, %v11127_v16 }
  0x38   : > { %9795 = vmatprep.mubr.msk.bf16.mxu0 %vm10991_vm0, %v10990_v1  ;;  %v1750_v9 = vrot.slane %v1734_v59, %v11127_v16  ;;  %v746_v10 = vcombine.high %v10874_v46, %v10874_v46  ;;  %v1757_v11 = vrot.slane %v1735_v60, %v11127_v16  ;;  %v691_v12 = vrot.slane %v10872_v37, %v11127_v16 }
  0x39   : > { %v698_v13 = vrot.slane %v684_v61, %v11127_v16  ;;  %v714_v14 = vrot.slane %v10875_v51, %v11127_v16  ;;  %v1764_v15 = vrot.slane %v9098_v0, %v11127_v16  ;;  %v736_v17 = vrot.slane %v722_v2, %v11127_v16  ;;  %9876 = vmatpush3.bf16.msra.mxu0 %v10732_v45 }
  0x3a   : > { %v737_v18 = vcombine.high %v729_v3, %v729_v3  ;;  %v753_v19 = vrot.slane %v10874_v46, %v11127_v16  ;;  %v1765_v20 = vcombine.low %v1743_v7, %v1750_v9  ;;  %v760_v21 = vrot.slane %v746_v10, %v11127_v16 }
  0x3b   : > { %v1732_v23 = vcombine.low %v1724_v4, %v1731_v6  ;;  %v1782_v24 = vcombine.low %v691_v12, %v698_v13  ;;  %v784_v25 = vcombine.high %v10876_v62, %v10876_v62  ;;  %v1766_v26 = vcombine.low %v1757_v11, %v1764_v15 }
  0x3c   : > { %v9099_v27 = vcombine.high %v691_v12, %v698_v13  ;;  %v1784_v28 = vcombine.low %v714_v14, %v729_v3  ;;  %v1785_v29 = vcombine.low %v736_v17, %v737_v18  ;;  %v738_v30 = vcombine.high %v736_v17, %v736_v17  ;;  %v10884_v13 = vld.sshfl [vmem:[%s11114_s8 + $0x64] sm:$0x33 pattern:$0x75316420] }
  0x3d   : > { %v761_v31 = vcombine.high %v753_v19, %v753_v19  ;;  %v1773_v32 = vrot.slane %v1765_v20, %v11127_v16  ;;  %v762_v33 = vcombine.high %v760_v21, %v760_v21  ;;  %v776_v34 = vrot.slane %v10877_v5, %v11127_v16  ;;  %v10883_v5 = vld.sshfl [vmem:[%s11114_s8 + $0x60] sm:$0x33 pattern:$0x75316420] }
  0x3e   : > { %v1792_v37 = vrot.slane %v1782_v24, %v11127_v16  ;;  %v791_v38 = vrot.slane %v10876_v62, %v11127_v16  ;;  %v1780_v41 = vrot.slane %v1766_v26, %v11127_v16  ;;  %v1799_v42 = vrot.slane %v9099_v27, %v11127_v16 }
  0x3f   : > { %9796 = vmatmul.mubr.bf16.gmra.mrb[4].mxu0 %v1634_v39  ;;  %v798_v39 = vrot.slane %v784_v25, %v11127_v16  ;;  %v1806_v43 = vrot.slane %v1784_v28, %v11127_v16  ;;  %v1813_v44 = vrot.slane %v1785_v29, %v11127_v16  ;;  %v1831_v46 = vcombine.low %v738_v30, %v753_v19 }
  0x40   : > { %9799 = vmatprep.mubr.msk.bf16.mxu0 %vm10991_vm0, %v10990_v1  ;;  %v1832_v47 = vcombine.low %v760_v21, %v761_v31  ;;  %v1833_v48 = vcombine.low %v762_v33, %v776_v34  ;;  %v808_v50 = vcombine.high %v10878_v22, %v10878_v22  ;;  %v1781_v51 = vcombine.low %v1773_v32, %v1780_v41  ;;  %v10886_v33 = vld.sshfl [vmem:[%s11114_s8 + $0x70] sm:$0x33 pattern:$0x75316420] }
  0x41   : > { %v1834_v49 = vcombine.low %v791_v38, %v798_v39  ;;  %v1814_v52 = vcombine.low %v1792_v37, %v1799_v42  ;;  %v1815_v53 = vcombine.low %v1806_v43, %v1813_v44  ;;  %v1841_v54 = vrot.slane %v1831_v46, %v11127_v16 }
  0x42   : > { %v1848_v55 = vrot.slane %v1832_v47, %v11127_v16  ;;  %v1855_v56 = vrot.slane %v1833_v48, %v11127_v16  ;;  %v815_v57 = vrot.slane %v10878_v22, %v11127_v16  ;;  %v846_v58 = vcombine.high %v10880_v36, %v10880_v36  ;;  %v10885_v22 = vld.sshfl [vmem:[%s11114_s8 + $0x6c] sm:$0x33 pattern:$0x75316420] }
  0x43   : > { %v1862_v59 = vrot.slane %v1834_v49, %v11127_v16  ;;  %v822_v60 = vrot.slane %v808_v50, %v11127_v16  ;;  %v838_v61 = vrot.slane %v10879_v35, %v11127_v16  ;;  %v853_v62 = vrot.slane %v10880_v36, %v11127_v16 }
  0x44   : > { %v1822_v0 = vrot.slane %v1814_v52, %v11127_v16  ;;  %v1829_v2 = vrot.slane %v1815_v53, %v11127_v16  ;;  %v870_v3 = vcombine.high %v10881_v40, %v10881_v40  ;;  %v1863_v4 = vcombine.low %v1841_v54, %v1848_v55 }
  0x45   : > { %v9100_v6 = vcombine.high %v791_v38, %v798_v39  ;;  %v860_v7 = vrot.slane %v846_v58, %v11127_v16  ;;  %v1864_v9 = vcombine.low %v1855_v56, %v1862_v59  ;;  %v1881_v10 = vcombine.low %v815_v57, %v822_v60 }
  0x46   : > { %v9101_v11 = vcombine.high %v815_v57, %v822_v60  ;;  %v1883_v12 = vcombine.low %v838_v61, %v853_v62  ;;  %v1830_v14 = vcombine.low %v1822_v0, %v1829_v2  ;;  %v877_v15 = vrot.slane %v10881_v40, %v11127_v16  ;;  %v10887_v40 = vld.sshfl [vmem:[%s11114_s8 + $0x68] sm:$0x1 pattern:$0x75316420] }
  0x47   : > { %9800 = vmatmul.mubr.bf16.gmra.mrb[8].mxu0 %v1683_v63  ;;  %v10882_v63 = vld.sshfl [vmem:[%s11114_s8 + $0x5c] sm:$0x1 pattern:$0x75316420]  ;;  %v884_v17 = vrot.slane %v870_v3, %v11127_v16  ;;  %v1871_v18 = vrot.slane %v1863_v4, %v11127_v16  ;;  %v1890_v19 = vrot.slane %v9100_v6, %v11127_v16  ;;  %v861_v20 = vcombine.high %v853_v62, %v853_v62 }
  0x48   : > { %9803 = vmatprep.mubr.msk.bf16.mxu0 %vm10991_vm0, %v10990_v1  ;;  %v862_v21 = vcombine.high %v860_v7, %v860_v7  ;;  %v1897_v24 = vrot.slane %v1881_v10, %v11127_v16  ;;  %v1904_v25 = vrot.slane %v9101_v11, %v11127_v16  ;;  %v1911_v26 = vrot.slane %v1883_v12, %v11127_v16  ;;  %v10889_v2 = vld.sshfl [vmem:[%s11114_s8 + $0x7c] sm:$0x33 pattern:$0x75316420] }
  0x49   : > { %v885_v27 = vcombine.high %v877_v15, %v877_v15  ;;  %v886_v28 = vcombine.high %v884_v17, %v884_v17  ;;  %v900_v29 = vrot.slane %v10882_v63, %v11127_v16  ;;  %v1929_v30 = vcombine.low %v860_v7, %v861_v20  ;;  %v10888_v63 = vld.sshfl [vmem:[%s11114_s8 + $0x78] sm:$0x33 pattern:$0x75316420] }
  0x4a   : > { %v1930_v31 = vcombine.low %v862_v21, %v877_v15  ;;  %v908_v32 = vcombine.high %v10883_v5, %v10883_v5  ;;  %v1912_v34 = vcombine.low %v1890_v19, %v1897_v24  ;;  %v1913_v35 = vcombine.low %v1904_v25, %v1911_v26  ;;  %v10890_v7 = vld.sshfl [vmem:[%s11114_s8 + $0x74] sm:$0x1 pattern:$0x75316420] }
  0x4b   : > { %v1931_v37 = vcombine.low %v884_v17, %v885_v27  ;;  %v1932_v38 = vcombine.low %v886_v28, %v900_v29  ;;  %v932_v39 = vcombine.high %v10884_v13, %v10884_v13  ;;  %v1939_v41 = vrot.slane %v1929_v30, %v11127_v16  ;;  %v10891_v15 = vld.sshfl [vmem:[%s11114_s8 + $0x84] sm:$0x33 pattern:$0x75316420] }
  0x4c   : > { %v1946_v42 = vrot.slane %v1930_v31, %v11127_v16  ;;  %v915_v43 = vrot.slane %v10883_v5, %v11127_v16  ;;  %v922_v44 = vrot.slane %v908_v32, %v11127_v16  ;;  %v1920_v45 = vrot.slane %v1912_v34, %v11127_v16 }
  0x4d   : > { %v1927_v46 = vrot.slane %v1913_v35, %v11127_v16  ;;  %v970_v47 = vcombine.high %v10885_v22, %v10885_v22  ;;  %v1953_v48 = vrot.slane %v1931_v37, %v11127_v16  ;;  %v1960_v49 = vrot.slane %v1932_v38, %v11127_v16  ;;  %v10892_v35 = vld.sshfl [vmem:[%s11114_s8 + $0x80] sm:$0x1 pattern:$0x75316420] }
  0x4e   : > { %v939_v50 = vrot.slane %v10884_v13, %v11127_v16  ;;  %v1961_v52 = vcombine.low %v1939_v41, %v1946_v42  ;;  %v1978_v53 = vcombine.low %v915_v43, %v922_v44  ;;  %v9102_v54 = vcombine.high %v915_v43, %v922_v44 }
  0x4f   : > { %9804 = vmatmul.mubr.bf16.gmra.mrb[12].mxu0 %v1732_v23  ;;  %v1878_v23 = vrot.slane %v1864_v9, %v11127_v16  ;;  %v977_v55 = vrot.slane %v10885_v22, %v11127_v16  ;;  %v984_v56 = vrot.slane %v970_v47, %v11127_v16  ;;  %v994_v57 = vcombine.high %v10886_v33, %v10886_v33 }
  0x50   : > { %9807 = vmatprep.mubr.msk.bf16.mxu0 %vm10991_vm0, %v10990_v1  ;;  %v1001_v58 = vrot.slane %v10886_v33, %v11127_v16  ;;  %v1928_v59 = vcombine.low %v1920_v45, %v1927_v46  ;;  %v1962_v60 = vcombine.low %v1953_v48, %v1960_v49  ;;  %v962_v0 = vrot.slane %v10887_v40, %v11127_v16  ;;  %v10894_v46 = vld.sshfl [vmem:[%s11114_s8 + $0x90] sm:$0x33 pattern:$0x75316420] }
  0x51   : > { %v1879_v36 = vcombine.low %v1871_v18, %v1878_v23  ;;  %v1969_v3 = vrot.slane %v1961_v52, %v11127_v16  ;;  %v1988_v4 = vrot.slane %v1978_v53, %v11127_v16  ;;  %v1995_v5 = vrot.slane %v9102_v54, %v11127_v16  ;;  %v10895_v54 = vld.sshfl [vmem:[%s11114_s8 + $0x8c] sm:$0x1 pattern:$0x75316420] }
  0x52   : > { %v985_v6 = vcombine.high %v977_v55, %v977_v55  ;;  %v986_v9 = vcombine.high %v984_v56, %v984_v56  ;;  %v1008_v10 = vrot.slane %v994_v57, %v11127_v16  ;;  %v1009_v11 = vcombine.high %v1001_v58, %v1001_v58 }
  0x53   : > { %v1976_v12 = vrot.slane %v1962_v60, %v11127_v16  ;;  %v2010_v17 = vcombine.low %v1988_v4, %v1995_v5  ;;  %v2027_v18 = vcombine.low %v962_v0, %v977_v55  ;;  %v1032_v22 = vcombine.high %v10888_v63, %v10888_v63  ;;  %v10896_v5 = vld.sshfl [vmem:[%s11114_s8 + $0x94] sm:$0x33 pattern:$0x75316420] }
  0x54   : > { %v2028_v19 = vcombine.low %v984_v56, %v985_v6  ;;  %v2029_v20 = vcombine.low %v986_v9, %v1001_v58  ;;  %v2030_v21 = vcombine.low %v1008_v10, %v1009_v11  ;;  %v1056_v25 = vcombine.high %v10889_v2, %v10889_v2  ;;  %v10897_v11 = vld.sshfl [vmem:[%s11114_s8 + $0x9c] sm:$0x33 pattern:$0x75316420] }
  0x55   : > { %v1977_v23 = vcombine.low %v1969_v3, %v1976_v12  ;;  %v1024_v26 = vrot.slane %v10890_v7, %v11127_v16  ;;  %v2018_v27 = vrot.slane %v2010_v17, %v11127_v16  ;;  %v2037_v28 = vrot.slane %v2027_v18, %v11127_v16 }
  0x56   : > { %v2044_v29 = vrot.slane %v2028_v19, %v11127_v16  ;;  %v1010_v30 = vcombine.high %v1008_v10, %v1008_v10  ;;  %v2051_v31 = vrot.slane %v2029_v20, %v11127_v16  ;;  %v2058_v32 = vrot.slane %v2030_v21, %v11127_v16 }
  0x57   : > { %9808 = vmatmul.mubr.bf16.gmra.mrb[16].mxu0 %v1781_v51  ;;  %v946_v51 = vrot.slane %v932_v39, %v11127_v16  ;;  %v1039_v33 = vrot.slane %v10888_v63, %v11127_v16  ;;  %v1046_v34 = vrot.slane %v1032_v22, %v11127_v16  ;;  %v1063_v37 = vrot.slane %v10889_v2, %v11127_v16  ;;  %v10893_v39 = vld.sshfl [vmem:[%s11114_s8 + $0x88] sm:$0x33 pattern:$0x75316420] }
  0x58   : > { %9811 = vmatprep.mubr.msk.bf16.mxu0 %vm10991_vm0, %v10990_v1  ;;  %v1070_v38 = vrot.slane %v1056_v25, %v11127_v16  ;;  %v1094_v40 = vcombine.high %v10891_v15, %v10891_v15  ;;  %v2059_v41 = vcombine.low %v2037_v28, %v2044_v29  ;;  %v2076_v42 = vcombine.low %v1010_v30, %v1024_v26 }
  0x59   : > { %v1980_v61 = vcombine.low %v939_v50, %v946_v51  ;;  %v9103_v62 = vcombine.high %v939_v50, %v946_v51  ;;  %v2060_v43 = vcombine.low %v2051_v31, %v2058_v32  ;;  %v2077_v44 = vcombine.low %v1039_v33, %v1046_v34 }
  0x5a   : > { %v9104_v45 = vcombine.high %v1039_v33, %v1046_v34  ;;  %v2079_v48 = vcombine.low %v1063_v37, %v1070_v38  ;;  %v1101_v49 = vrot.slane %v10891_v15, %v11127_v16  ;;  %v1108_v50 = vrot.slane %v1094_v40, %v11127_v16  ;;  %v10733_v33 = vld [vmem:[%s13604_s3 + $0x80] sm:$0xff]   ;;  %v10900_v40 = vld.sshfl [vmem:[%s11114_s8 + $0xa8] sm:$0x33 pattern:$0x75316420] }
  0x5b   : > { %v2002_v13 = vrot.slane %v1980_v61, %v11127_v16  ;;  %v1118_v51 = vcombine.high %v10893_v39, %v10893_v39  ;;  %v2067_v52 = vrot.slane %v2059_v41, %v11127_v16  ;;  %v2086_v53 = vrot.slane %v2076_v42, %v11127_v16  ;;  %9971 = vmatprep.subr.bf16.mxu1 %v10733_v33 }
  0x5c   : > { %v2074_v55 = vrot.slane %v2060_v43, %v11127_v16  ;;  %v2093_v56 = vrot.slane %v2077_v44, %v11127_v16  ;;  %v2100_v57 = vrot.slane %v9104_v45, %v11127_v16  ;;  %v1086_v58 = vrot.slane %v10892_v35, %v11127_v16  ;;  %9972 = vmatpush3.bf16.msra.mxu1 %v10733_v33 }
  0x5d   : > { %v1109_v60 = vcombine.high %v1101_v49, %v1101_v49  ;;  %v1110_v61 = vcombine.high %v1108_v50, %v1108_v50  ;;  %v1132_v63 = vrot.slane %v1118_v51, %v11127_v16  ;;  %v1156_v0 = vcombine.high %v10894_v46, %v10894_v46 }
  0x5e   : > { %v2075_v2 = vcombine.low %v2067_v52, %v2074_v55  ;;  %v2108_v3 = vcombine.low %v2086_v53, %v2093_v56  ;;  %v9105_v4 = vcombine.high %v1063_v37, %v1070_v38  ;;  %v2126_v7 = vcombine.low %v1086_v58, %v1101_v49  ;;  %v10734_v37 = vld [vmem:[%s13604_s3 + $0x8] sm:$0xff]   ;;  %v10736_v52 = vld [vmem:[%s13604_s3 + $0x10] sm:$0xff]  }
  0x5f   : > { %9812 = vmatmul.mubr.bf16.gmra.mrb[20].mxu0 %v1830_v14  ;;  %v2009_v14 = vrot.slane %v9103_v62, %v11127_v16  ;;  %v1125_v62 = vrot.slane %v10893_v39, %v11127_v16  ;;  %v2127_v9 = vcombine.low %v1108_v50, %v1109_v60  ;;  %v1163_v15 = vrot.slane %v10894_v46, %v11127_v16  ;;  %v10902_v58 = vld.sshfl [vmem:[%s11114_s8 + $0xac] sm:$0x33 pattern:$0x75316420] }
  0x60   : > { %9815 = vmatprep.mubr.msk.bf16.mxu0 %vm10991_vm0, %v10990_v1  ;;  %v1170_v17 = vrot.slane %v1156_v0, %v11127_v16  ;;  %v2116_v18 = vrot.slane %v2108_v3, %v11127_v16  ;;  %v2135_v19 = vrot.slane %v9105_v4, %v11127_v16  ;;  %v2142_v21 = vrot.slane %v2126_v7, %v11127_v16  ;;  %v10738_v4 = vld [vmem:[%s13604_s3 + $0x18] sm:$0xff]  }
  0x61   : > { %v2011_v24 = vcombine.low %v2002_v13, %v2009_v14  ;;  %v2128_v10 = vcombine.low %v1110_v61, %v1125_v62  ;;  %v1133_v12 = vcombine.high %v1125_v62, %v1125_v62  ;;  %v1134_v13 = vcombine.high %v1132_v63, %v1132_v63  ;;  %9877 = vmatprep.subr.bf16.mxu0 %v10734_v37 }
  0x62   : > { %v1148_v14 = vrot.slane %v10895_v54, %v11127_v16  ;;  %v2149_v22 = vrot.slane %v2127_v9, %v11127_v16  ;;  %v2176_v28 = vcombine.low %v1163_v15, %v1170_v17  ;;  %v9106_v29 = vcombine.high %v1163_v15, %v1170_v17  ;;  %v10901_v54 = vld.sshfl [vmem:[%s11114_s8 + $0xa4] sm:$0x1 pattern:$0x75316420]  ;;  %9878 = vmatpush3.bf16.msra.mxu0 %v10734_v37 }
  0x63   : > { %v2174_v25 = vcombine.low %v1132_v63, %v1133_v12  ;;  %v1180_v30 = vcombine.high %v10896_v5, %v10896_v5  ;;  %v1218_v31 = vcombine.high %v10897_v11, %v10897_v11  ;;  %v1225_v32 = vrot.slane %v10897_v11, %v11127_v16  ;;  %9879 = vmatprep.subr.bf16.mxu0 %v10736_v52  ;;  %v10904_v11 = vld.sshfl [vmem:[%s11114_s8 + $0xb4] sm:$0x33 pattern:$0x75316420]  ;;  %v10741_v37 = vld [vmem:[%s13604_s3 + $0xa0] sm:$0xff]  }
  0x64   : > { %v2175_v26 = vcombine.low %v1134_v13, %v1148_v14  ;;  %v2157_v35 = vcombine.low %v2135_v19, %v2142_v21  ;;  %v2198_v41 = vrot.slane %v2176_v28, %v11127_v16  ;;  %v2205_v42 = vrot.slane %v9106_v29, %v11127_v16  ;;  %v10739_v21 = vld [vmem:[%s13604_s3 + $0x98] sm:$0xff]  }
  0x65   : > { %v2184_v38 = vrot.slane %v2174_v25, %v11127_v16  ;;  %v1187_v43 = vrot.slane %v10896_v5, %v11127_v16  ;;  %v1194_v44 = vrot.slane %v1180_v30, %v11127_v16  ;;  %v1232_v46 = vrot.slane %v1218_v31, %v11127_v16 }
  0x66   : > { %v2191_v39 = vrot.slane %v2175_v26, %v11127_v16  ;;  %v2165_v49 = vrot.slane %v2157_v35, %v11127_v16  ;;  %v2207_v55 = vcombine.low %v2198_v41, %v2205_v42  ;;  %v1280_v0 = vcombine.high %v10900_v40, %v10900_v40  ;;  %9880 = vmatpush3.bf16.msra.mxu0 %v10736_v52  ;;  %v10742_v42 = vld [vmem:[%s13604_s3 + $0x28] sm:$0xff]  }
  0x67   : > { %9816 = vmatmul.mubr.bf16.gmra.mrb[24].mxu0 %v1879_v36  ;;  %v2025_v36 = vrot.slane %v2011_v24, %v11127_v16  ;;  %v10898_v24 = vld.sshfl [vmem:[%s11114_s8 + $0x98] sm:$0x1 pattern:$0x75316420]  ;;  %v2223_v56 = vcombine.low %v1187_v43, %v1194_v44  ;;  %v1234_v9 = vcombine.high %v1232_v46, %v1232_v46  ;;  %9881 = vmatprep.subr.bf16.mxu0 %v10738_v4 }
  0x68   : > { %9819 = vmatprep.mubr.msk.bf16.mxu0 %vm10991_vm0, %v10990_v1  ;;  %v1210_v45 = vrot.slane %v10898_v24, %v11127_v16  ;;  %v2206_v53 = vcombine.low %v2184_v38, %v2191_v39  ;;  %v2221_v5 = vrot.slane %v2207_v55, %v11127_v16  ;;  %v1272_v17 = vrot.slane %v10901_v54, %v11127_v16  ;;  %v10744_v54 = vld [vmem:[%s13604_s3 + $0x30] sm:$0xff]  }
  0x69   : > { %v2026_v47 = vcombine.low %v2018_v27, %v2025_v36  ;;  %v10899_v27 = vld.sshfl [vmem:[%s11114_s8 + $0xa0] sm:$0x33 pattern:$0x75316420]  ;;  %v1294_v19 = vrot.slane %v1280_v0, %v11127_v16  ;;  %v1311_v31 = vrot.slane %v10902_v58, %v11127_v16 }
  0x6a   : > { %v1242_v51 = vcombine.high %v10899_v27, %v10899_v27  ;;  %v1249_v61 = vrot.slane %v10899_v27, %v11127_v16  ;;  %v2214_v3 = vrot.slane %v2206_v53, %v11127_v16  ;;  %9882 = vmatpush3.bf16.msra.mxu0 %v10738_v4 }
  0x6c   : > { %v1256_v63 = vrot.slane %v1242_v51, %v11127_v16  ;;  %v1257_v14 = vcombine.high %v1249_v61, %v1249_v61  ;;  %v2272_v26 = vcombine.low %v1234_v9, %v1249_v61  ;;  %v2222_v28 = vcombine.low %v2214_v3, %v2221_v5  ;;  %v10743_v51 = vld [vmem:[%s13604_s3 + $0xa8] sm:$0xff]  }
  0x6e   : > { %v1258_v15 = vcombine.high %v1256_v63, %v1256_v63  ;;  %v2273_v27 = vcombine.low %v1256_v63, %v1257_v14  ;;  %v2282_v39 = vrot.slane %v2272_v26, %v11127_v16  ;;  %v10908_v63 = vld.sshfl [vmem:[%s11114_s8 + $0xc4] sm:$0x33 pattern:$0x75316420] }
  0x6f   : > { %9820 = vmatmul.mubr.bf16.gmra.mrb[28].mxu0 %v1928_v59  ;;  %v2107_v59 = vrot.slane %v2079_v48, %v11127_v16  ;;  %v10735_v48 = vld [vmem:[%s13604_s3 + $0x88] sm:$0xff]  }
  0x70   : > { %9823 = vmatprep.mubr.msk.bf16.mxu0 %vm10991_vm0, %v10990_v1  ;;  %9973 = vmatprep.subr.bf16.mxu1 %v10735_v48  ;;  %v2274_v29 = vcombine.low %v1258_v15, %v1272_v17 }
  0x71   : > { %v2109_v6 = vcombine.low %v2100_v57, %v2107_v59  ;;  %v9107_v57 = vcombine.high %v1187_v43, %v1194_v44  ;;  %v2225_v59 = vcombine.low %v1210_v45, %v1225_v32  ;;  %9974 = vmatpush3.bf16.msra.mxu1 %v10735_v48 }
  0x72   : > { %v2296_v43 = vrot.slane %v2274_v29, %v11127_v16 }
  0x73   : > { %v2123_v20 = vrot.slane %v2109_v6, %v11127_v16  ;;  %v2233_v6 = vrot.slane %v2223_v56, %v11127_v16  ;;  %v2240_v7 = vrot.slane %v9107_v57, %v11127_v16  ;;  %v2247_v12 = vrot.slane %v2225_v59, %v11127_v16 }
  0x75   : > { %v2124_v34 = vcombine.low %v2116_v18, %v2123_v20  ;;  %v1287_v18 = vrot.slane %v10900_v40, %v11127_v16  ;;  %v10905_v20 = vld.sshfl [vmem:[%s11114_s8 + $0xb8] sm:$0x33 pattern:$0x75316420]  ;;  %v2255_v24 = vcombine.low %v2233_v6, %v2240_v7  ;;  %v2289_v40 = vrot.slane %v2273_v27, %v11127_v16  ;;  %v10745_v6 = vld [vmem:[%s13604_s3 + $0xb0] sm:$0xff]  }
  0x76   : > { %v1366_v41 = vcombine.high %v10905_v20, %v10905_v20  ;;  %v1373_v52 = vrot.slane %v10905_v20, %v11127_v16 }
  0x77   : > { %9824 = vmatmul.mubr.bf16.gmra.mrb[32].mxu0 %v1977_v23  ;;  %v2156_v23 = vrot.slane %v2128_v10, %v11127_v16  ;;  %v10903_v10 = vld.sshfl [vmem:[%s11114_s8 + $0xb0] sm:$0x1 pattern:$0x75316420]  ;;  %v2275_v30 = vcombine.low %v1287_v18, %v1294_v19  ;;  %v2263_v35 = vrot.slane %v2255_v24, %v11127_v16  ;;  %v9108_v45 = vcombine.high %v1287_v18, %v1294_v19  ;;  %v10747_v19 = vld [vmem:[%s13604_s3 + $0xb8] sm:$0xff]  }
  0x78   : > { %9827 = vmatprep.mubr.msk.bf16.mxu0 %vm10991_vm0, %v10990_v1  ;;  %v1334_v33 = vrot.slane %v10903_v10, %v11127_v16  ;;  %v1380_v53 = vrot.slane %v1366_v41, %v11127_v16  ;;  %v2304_v56 = vcombine.low %v2282_v39, %v2289_v40  ;;  %v1381_v3 = vcombine.high %v1373_v52, %v1373_v52  ;;  %v10746_v10 = vld [vmem:[%s13604_s3 + $0x38] sm:$0xff]  }
  0x79   : > { %v2158_v36 = vcombine.low %v2149_v22, %v2156_v23  ;;  %v1304_v22 = vcombine.high %v10902_v58, %v10902_v58  ;;  %v10740_v23 = vld [vmem:[%s13604_s3 + $0x20] sm:$0xff]   ;;  %v2303_v44 = vrot.slane %v2275_v30, %v11127_v16  ;;  %v2331_v59 = vrot.slane %v9108_v45, %v11127_v16 }
  0x7a   : > { %9883 = vmatprep.subr.bf16.mxu0 %v10740_v23  ;;  %v10907_v58 = vld.sshfl [vmem:[%s11114_s8 + $0xc0] sm:$0x33 pattern:$0x75316420]  ;;  %v1382_v4 = vcombine.high %v1380_v53, %v1380_v53  ;;  %v2312_v7 = vrot.slane %v2304_v56, %v11127_v16  ;;  %v2372_v15 = vcombine.low %v1380_v53, %v1381_v3 }
  0x7b   : > { %v2172_v50 = vrot.slane %v2158_v36, %v11127_v16  ;;  %v1342_v36 = vcombine.high %v10904_v11, %v10904_v11  ;;  %9884 = vmatpush3.bf16.msra.mxu0 %v10740_v23  ;;  %v2305_v57 = vcombine.low %v2296_v43, %v2303_v44  ;;  %v1404_v18 = vcombine.high %v10907_v58, %v10907_v58 }
  0x7c   : > { %9885 = vmatprep.subr.bf16.mxu0 %v10742_v42  ;;  %v1411_v27 = vrot.slane %v10907_v58, %v11127_v16  ;;  %v2394_v30 = vrot.slane %v2372_v15, %v11127_v16 }
  0x7d   : > { %v2173_v62 = vcombine.low %v2165_v49, %v2172_v50  ;;  %v1356_v50 = vrot.slane %v1342_v36, %v11127_v16  ;;  %v2319_v9 = vrot.slane %v2305_v57, %v11127_v16 }
  0x7f   : > { %9828 = vmatmul.mubr.bf16.gmra.mrb[36].mxu0 %v2026_v47  ;;  %v1233_v47 = vcombine.high %v1225_v32, %v1225_v32  ;;  %v1318_v32 = vrot.slane %v1304_v22, %v11127_v16  ;;  %v2320_v20 = vcombine.low %v2312_v7, %v2319_v9  ;;  %v9091_v22 = vld.sshfl [vmem:[%s11114_s8 + $0xcc] sm:$0x33 pattern:$0x75316420] }
  0x80   : > { %9831 = vmatprep.mubr.msk.bf16.mxu0 %vm10991_vm0, %v10990_v1  ;;  %9886 = vmatpush3.bf16.msra.mxu0 %v10742_v42  ;;  %v1473_v40 = vrot.slane %v9091_v22, %v11127_v16 }
  0x81   : > { %v2226_v60 = vcombine.low %v1232_v46, %v1233_v47  ;;  %v10906_v46 = vld.sshfl [vmem:[%s11114_s8 + $0xbc] sm:$0x1 pattern:$0x75316420]  ;;  %v2322_v47 = vcombine.low %v1311_v31, %v1318_v32  ;;  %v9109_v48 = vcombine.high %v1311_v31, %v1318_v32  ;;  %9887 = vmatprep.subr.bf16.mxu0 %v10744_v54  ;;  %v1418_v32 = vrot.slane %v1404_v18, %v11127_v16 }
  0x82   : > { %v1396_v5 = vrot.slane %v10906_v46, %v11127_v16 }
  0x83   : > { %v2254_v13 = vrot.slane %v2226_v60, %v11127_v16  ;;  %v2338_v60 = vrot.slane %v2322_v47, %v11127_v16  ;;  %v2345_v61 = vrot.slane %v9109_v48, %v11127_v16  ;;  %v2419_v42 = vcombine.low %v1411_v27, %v1418_v32 }
  0x84   : > { %9888 = vmatpush3.bf16.msra.mxu0 %v10744_v54  ;;  %v2373_v17 = vcombine.low %v1382_v4, %v1396_v5  ;;  %v9110_v43 = vcombine.high %v1411_v27, %v1418_v32  ;;  %v9120_v27 = vld [vmem:[%s13603_s2] ss:$0 sm:$0xff] }
  0x85   : > { %v2256_v25 = vcombine.low %v2247_v12, %v2254_v13  ;;  %9889 = vmatprep.subr.bf16.mxu0 %v10746_v10  ;;  %v2429_v53 = vrot.slane %v2419_v42, %v11127_v16 }
  0x86   : > { %v2401_v31 = vrot.slane %v2373_v17, %v11127_v16  ;;  %v2436_v54 = vrot.slane %v9110_v43, %v11127_v16 }
  0x87   : > { %9832 = vmatmul.mubr.bf16.gmra.mrb[40].mxu0 %v2075_v2  ;;  %v10737_v2 = vld [vmem:[%s13604_s3 + $0x90] sm:$0xff]   ;;  %v2270_v38 = vrot.slane %v2256_v25, %v11127_v16 }
  0x88   : > { %9835 = vmatprep.mubr.msk.bf16.mxu0 %vm10991_vm0, %v10990_v1  ;;  %9975 = vmatprep.subr.bf16.mxu1 %v10737_v2  ;;  %v2403_v41 = vcombine.low %v2394_v30, %v2401_v31 }
  0x89   : > { %9976 = vmatpush3.bf16.msra.mxu1 %v10737_v2  ;;  %v2271_v55 = vcombine.low %v2263_v35, %v2270_v38  ;;  %v1358_v2 = vcombine.high %v1356_v50, %v1356_v50  ;;  %9890 = vmatpush3.bf16.msra.mxu0 %v10746_v10  ;;  %v1435_v35 = vrot.slane %v10908_v63, %v11127_v16 }
  0x8a   : > { %9977 = vmatprep.subr.bf16.mxu1 %v10739_v21 }
  0x8b   : > { %v2371_v14 = vcombine.low %v1358_v2, %v1373_v52  ;;  %v2417_v52 = vrot.slane %v2403_v41, %v11127_v16  ;;  %v11520_v41 = vld [vmem:[%s13604_s3 + $0xc0] sm:$0xff]  }
  0x8d   : > { %9978 = vmatpush3.bf16.msra.mxu1 %v10739_v21  ;;  %v1428_v21 = vcombine.high %v10908_v63, %v10908_v63  ;;  %v2387_v26 = vrot.slane %v2371_v14, %v11127_v16  ;;  %v9093_v14 = vld.sshfl [vmem:[%s11114_s8 + $0xd4] sm:$0x1 pattern:$0x75316420] }
  0x8e   : > { %9979 = vmatprep.subr.bf16.mxu1 %v10741_v37 }
  0x8f   : > { %9836 = vmatmul.mubr.bf16.gmra.mrb[44].mxu0 %v2124_v34  ;;  %v1349_v34 = vrot.slane %v10904_v11, %v11127_v16  ;;  %v2353_v11 = vcombine.low %v2331_v59, %v2338_v60  ;;  %v1442_v36 = vrot.slane %v1428_v21, %v11127_v16 }
  0x90   : > { %9839 = vmatprep.mubr.msk.bf16.mxu0 %vm10991_vm0, %v10990_v1 }
  0x91   : > { %v2324_v49 = vcombine.low %v1334_v33, %v1349_v34  ;;  %9980 = vmatpush3.bf16.msra.mxu1 %v10741_v37  ;;  %v1357_v0 = vcombine.high %v1349_v34, %v1349_v34  ;;  %v2361_v23 = vrot.slane %v2353_v11, %v11127_v16  ;;  %v10909_v33 = vld.sshfl [vmem:[%s11114_s8 + $0xc8] sm:$0x1 pattern:$0x75316420]  ;;  %v1466_v34 = vcombine.high %v9091_v22, %v9091_v22 }
  0x92   : > { %9981 = vmatprep.subr.bf16.mxu1 %v10743_v51  ;;  %v9092_v37 = vld.sshfl [vmem:[%s11114_s8 + $0xd0] sm:$0x33 pattern:$0x75316420]  ;;  %v2421_v45 = vcombine.low %v1435_v35, %v1442_v36  ;;  %v9111_v46 = vcombine.high %v1435_v35, %v1442_v36 }
  0x93   : > { %v2370_v13 = vcombine.low %v1356_v50, %v1357_v0  ;;  %v1480_v44 = vrot.slane %v1466_v34, %v11127_v16  ;;  %v1490_v47 = vcombine.high %v9092_v37, %v9092_v37  ;;  %v1497_v48 = vrot.slane %v9092_v37, %v11127_v16 }
  0x94   : > { %v1458_v50 = vrot.slane %v10909_v33, %v11127_v16  ;;  %v2443_v56 = vrot.slane %v2421_v45, %v11127_v16  ;;  %v2450_v57 = vrot.slane %v9111_v46, %v11127_v16  ;;  %v3873_v34 = vcombine.high %v9120_v27, %v9120_v27 }
  0x95   : > { %9982 = vmatpush3.bf16.msra.mxu1 %v10743_v51  ;;  %v2380_v25 = vrot.slane %v2370_v13, %v11127_v16  ;;  %v1481_v51 = vcombine.high %v1473_v40, %v1473_v40  ;;  %v1504_v58 = vrot.slane %v1490_v47, %v11127_v16  ;;  %v1505_v59 = vcombine.high %v1497_v48, %v1497_v48 }
  0x96   : > { %9983 = vmatprep.subr.bf16.mxu1 %v10745_v6  ;;  %v2452_v63 = vcombine.low %v2443_v56, %v2450_v57 }
  0x97   : > { %9840 = vmatmul.mubr.bf16.gmra.mrb[48].mxu0 %v2173_v62  ;;  %v2352_v62 = vrot.slane %v2324_v49, %v11127_v16  ;;  %v2402_v39 = vcombine.low %v2380_v25, %v2387_v26  ;;  %v2469_v0 = vcombine.low %v1480_v44, %v1481_v51  ;;  %v2471_v3 = vcombine.low %v1504_v58, %v1505_v59 }
  0x98   : > { %9843 = vmatprep.mubr.msk.bf16.mxu0 %vm10991_vm0, %v10990_v1  ;;  %v1506_v18 = vcombine.high %v1504_v58, %v1504_v58 }
  0x99   : > { %v2354_v12 = vcombine.low %v2345_v61, %v2352_v62  ;;  %9984 = vmatpush3.bf16.msra.mxu1 %v10745_v6  ;;  %v2410_v49 = vrot.slane %v2402_v39, %v11127_v16  ;;  %v2451_v61 = vcombine.low %v2429_v53, %v2436_v54  ;;  %v2468_v62 = vcombine.low %v1458_v50, %v1473_v40 }
  0x9a   : > { %9985 = vmatprep.subr.bf16.mxu1 %v10747_v19  ;;  %v2466_v6 = vrot.slane %v2452_v63, %v11127_v16  ;;  %v2485_v7 = vrot.slane %v2469_v0, %v11127_v16  ;;  %v2499_v10 = vrot.slane %v2471_v3, %v11127_v16 }
  0x9b   : > { %v2368_v24 = vrot.slane %v2354_v12, %v11127_v16  ;;  %v2418_v60 = vcombine.low %v2410_v49, %v2417_v52  ;;  %v2459_v4 = vrot.slane %v2451_v61, %v11127_v16  ;;  %v2478_v5 = vrot.slane %v2468_v62, %v11127_v16 }
  0x9d   : > { %9986 = vmatpush3.bf16.msra.mxu1 %v10747_v19  ;;  %v2369_v38 = vcombine.low %v2361_v23, %v2368_v24  ;;  %v2467_v11 = vcombine.low %v2459_v4, %v2466_v6  ;;  %v2500_v12 = vcombine.low %v2478_v5, %v2485_v7  ;;  %v1520_v19 = vrot.slane %v9093_v14, %v11127_v16 }
  0x9e   : > { %v10994_v24 = vmov 1983009808   ;;  %10019 = vmatprep.subr.bf16.mxu1 %v11520_v41 }
  0x9f   : > { %9844 = vmatmul.mubr.bf16.gmra.mrb[52].mxu0 %v2222_v28  ;;  %v13609_v28 = vmov 0.0|0.0   ;;  %v2508_v15 = vrot.slane %v2500_v12, %v11127_v16  ;;  %v2517_v21 = vcombine.low %v1506_v18, %v1520_v19  ;;  %v2878_v25 = vunpack.c.l.s4 %v10994_v24 }
  0xa0   : > { %9847 = vmatprep.mubr.msk.bf16.mxu0 %vm10991_vm0, %v10990_v1  ;;  %v11456_v29 = vrot.slane %v13609_v28, 1 }
  0xa1   : > { %v2524_v22 = vrot.slane %v2517_v21, %v11127_v16  ;;  %v2879_v26 = vunpack.c.0.s8 %v2878_v25 }
  0xa2   : > { %13665 = vst [vmem:[#allocation5_spill] sm:$0xff] %v11456_v29  ;;  %9987 = vmatprep.mubr.bf16.mxu1 %v11456_v29 }
  0xa3   : > { %v2531_v23 = vrot.slane %v2524_v22, %v11127_v16  ;;  %v11504_v32 = vsub.s32 %v2879_v26, %v11117_v8 }
  0xa5   : > { %v11510_v35 = vrot.slane %v3873_v34, %v11504_v32 }
  0xa7   : > { %9848 = vmatmul.mubr.bf16.gmra.mrb[56].mxu0 %v2271_v55  ;;  %v1482_v55 = vcombine.high %v1480_v44, %v1480_v44  ;;  %v11524_v43 = vcombine.high %v11510_v35, %v11510_v35 }
  0xa8   : > { %9851 = vmatprep.mubr.msk.bf16.mxu0 %vm10991_vm0, %v10990_v1 }
  0xa9   : > { %v2470_v2 = vcombine.low %v1482_v55, %v1497_v48 }
  0xab   : > { %v2492_v9 = vrot.slane %v2470_v2, %v11127_v16 }
  0xad   : > { %v2501_v13 = vcombine.low %v2492_v9, %v2499_v10  ;;  %v11539_v10 = vadd.s32 16, %v11117_v8 }
  0xaf   : > { %9852 = vmatmul.mubr.bf16.gmra.mrb[60].mxu0 %v2320_v20  ;;  %v2515_v17 = vrot.slane %v2501_v13, %v11127_v16  ;;  %v11507_v16 = vrot.slane %v9120_v27, %v11504_v32  ;;  %vm3701_vm4 = vcmp.le.s32.totalorder %v11539_v10, 16  ;;  %v10778_v10 = vld [vmem:[%s13604_s3 + $0x138] sm:$0xff]  }
  0xb0   : > { %9855 = vmatprep.mubr.msk.bf16.mxu0 %vm10991_vm0, %v10990_v1 }
  0xb1   : > { %v2516_v20 = vcombine.low %v2508_v15, %v2515_v17  ;;  %v11515_v39 = vcombine.high %v11507_v16, %v11507_v16 }
  0xb7   : > { %9856 = vmatmul.mubr.bf16.gmra.mrb[64].mxu0 %v2369_v38 }
  0xb8   : > { %9859 = vmatprep.mubr.msk.bf16.mxu0 %vm10991_vm0, %v10990_v1 }
  0xbf   : > { %9860 = vmatmul.mubr.bf16.gmra.mrb[68].mxu0 %v2418_v60 }
  0xc0   : > { %9863 = vmatprep.mubr.msk.bf16.mxu0 %vm10991_vm0, %v10990_v1 }
  0xc7   : > { %9864 = vmatmul.mubr.bf16.gmra.mrb[72].mxu0 %v2467_v11 }
  0xc8   : > { %9867 = vmatprep.mubr.msk.bf16.mxu0 %vm10991_vm0, %v10990_v1 }
  0xcf   : > { %9868 = vmatmul.mubr.bf16.gmra.mrb[76].mxu0 %v2516_v20 }
  0xd0   : > { %9871 = vmatprep.mubr.msk.bf16.mxu0 %vm10991_vm0, %v10990_v1 }
  0xd7   : > { %9872 = vmatmul.mubr.bf16.gmra.mrb[80].mxu0 %v2531_v23 }
  0xd8   : > { %9891 = vmatprep.mubr.bf16.mxu0 %v13609_v28 }
 0x10a   : > { %v2635_v30 = vpop.f32.mrb[0].mxu0 }
 0x10b   : > { %v9793_v31 = vpop.f32.mrb[1].mxu0 }
 0x10c   : > { %v2638_v33 = vpop.f32.mrb[2].mxu0 }
 0x10d   : > { %v9794_v1 = vpop.f32.mrb[3].mxu0 }
 0x112   : > { %v2643_v36 = vpop.f32.mrb[4].mxu0 }
 0x113   : > { %v2876_v37 = vcombine.high %v2643_v36, %v2643_v36  ;;  %v2883_v38 = vrot.slane %v2643_v36, %v11504_v32  ;;  %v9797_v40 = vpop.f32.mrb[5].mxu0 }
 0x114   : > { %v2646_v42 = vpop.f32.mrb[6].mxu0 }
 0x115   : > { %v2890_v44 = vrot.slane %v2876_v37, %v11504_v32  ;;  %v2891_v45 = vcombine.high %v2883_v38, %v2883_v38  ;;  %v2893_v46 = vcombine.high %v2646_v42, %v2646_v42  ;;  %v2900_v47 = vrot.slane %v2646_v42, %v11504_v32  ;;  %v9798_v48 = vpop.f32.mrb[7].mxu0 }
 0x117   : > { %v2892_v49 = vcombine.high %v2890_v44, %v2890_v44  ;;  %v3903_v50 = vadd.f32 %v11507_v16, %v2891_v45  ;;  %v3904_v51 = vadd.f32 %v11515_v39, %v2890_v44  ;;  %v2907_v52 = vrot.slane %v2893_v46, %v11504_v32 }
 0x118   : > { %v2908_v53 = vcombine.high %v2900_v47, %v2900_v47  ;;  %v3906_v54 = vadd.f32 %v11524_v43, %v2900_v47 }
 0x119   : > { %v3905_v55 = vadd.f32 %v11510_v35, %v2892_v49  ;;  %v4065_v56 = vmax.f32 %v3903_v50, 0.0  ;;  %v4066_v57 = vmax.f32 %v3904_v51, 0.0  ;;  %v2909_v58 = vcombine.high %v2907_v52, %v2907_v52 }
 0x11a   : > { %v3907_v59 = vadd.f32 %v11507_v16, %v2908_v53  ;;  %v3908_v60 = vadd.f32 %v11515_v39, %v2907_v52  ;;  %v4068_v61 = vmax.f32 %v3906_v54, 0.0  ;;  %v2651_v62 = vpop.f32.mrb[8].mxu0 }
 0x11b   : > { %v4529_v63 = vcombine.low %v4065_v56, %v4066_v57  ;;  %v3909_v0 = vadd.f32 %v11510_v35, %v2909_v58  ;;  %v4067_v2 = vmax.f32 %v3905_v55, 0.0  ;;  %v2910_v3 = vcombine.high %v2651_v62, %v2651_v62  ;;  %v9801_v4 = vpop.f32.mrb[9].mxu0 }
 0x11c   : > { %v4069_v5 = vmax.f32 %v3907_v59, 0.0  ;;  %v4070_v6 = vmax.f32 %v3908_v60, 0.0  ;;  %v2917_v7 = vrot.slane %v2651_v62, %v11504_v32  ;;  %v2654_v9 = vpop.f32.mrb[10].mxu0 }
 0x11d   : > { %v4537_v11 = vrot.slane %v4529_v63, %v11504_v32  ;;  %v4530_v12 = vcombine.low %v4067_v2, %v4068_v61  ;;  %v2924_v13 = vrot.slane %v2910_v3, %v11504_v32  ;;  %v9802_v14 = vpop.f32.mrb[11].mxu0  ;;  %v4071_v18 = vmax.f32 %v3909_v0, 0.0 }
 0x11e   : > { %v2925_v15 = vcombine.high %v2917_v7, %v2917_v7  ;;  %v3910_v17 = vadd.f32 %v11524_v43, %v2917_v7  ;;  %v2927_v19 = vcombine.high %v2654_v9, %v2654_v9  ;;  %v2934_v23 = vrot.slane %v2654_v9, %v11504_v32 }
 0x11f   : > { %v4544_v20 = vrot.slane %v4530_v12, %v11504_v32  ;;  %v2926_v21 = vcombine.high %v2924_v13, %v2924_v13  ;;  %v3912_v22 = vadd.f32 %v11507_v16, %v2924_v13  ;;  %v4546_v24 = vcombine.low %v4069_v5, %v4070_v6 }
 0x120   : > { %v3911_v25 = vadd.f32 %v11507_v16, %v2925_v15  ;;  %v4072_v26 = vmax.f32 %v3910_v17, 0.0  ;;  %v2941_v27 = vrot.slane %v2927_v19, %v11504_v32  ;;  %v2942_v34 = vcombine.high %v2934_v23, %v2934_v23 }
 0x121   : > { %v11550_v30 = vcombine.low %v4537_v11, %v4544_v20  ;;  %v3913_v31 = vadd.f32 %v11515_v39, %v2926_v21  ;;  %v4074_v33 = vmax.f32 %v3912_v22, 0.0  ;;  %v3914_v38 = vadd.f32 %v11510_v35, %v2934_v23 }
 0x122   : > { %v4073_v1 = vmax.f32 %v3911_v25, 0.0  ;;  %v4547_v36 = vcombine.low %v4071_v18, %v4072_v26  ;;  %v2943_v37 = vcombine.high %v2941_v27, %v2941_v27  ;;  %v2659_v40 = vpop.f32.mrb[12].mxu0  ;;  %v3915_v44 = vadd.f32 %v11524_v43, %v2942_v34 }
 0x123   : > { %v4075_v42 = vmax.f32 %v3913_v31, 0.0  ;;  %v3916_v45 = vadd.f32 %v11507_v16, %v2941_v27  ;;  %v2944_v46 = vcombine.high %v2659_v40, %v2659_v40  ;;  %v9805_v47 = vpop.f32.mrb[13].mxu0  ;;  %v4554_v48 = vrot.slane %v4546_v24, %v11504_v32 }
 0x124   : > { %v4561_v49 = vrot.slane %v4547_v36, %v11504_v32  ;;  %v3917_v50 = vadd.f32 %v11515_v39, %v2943_v37  ;;  %v4076_v51 = vmax.f32 %v3914_v38, 0.0  ;;  %v2662_v52 = vpop.f32.mrb[14].mxu0  ;;  %v4077_v54 = vmax.f32 %v3915_v44, 0.0 }
 0x125   : > { %v11559_v53 = vcombine.low %v4074_v33, %v4075_v42  ;;  %v4078_v55 = vmax.f32 %v3916_v45, 0.0  ;;  %v2951_v56 = vrot.slane %v2659_v40, %v11504_v32  ;;  %v9806_v57 = vpop.f32.mrb[15].mxu0  ;;  %v2958_v60 = vrot.slane %v2944_v46, %v11504_v32 }
 0x126   : > { %v11562_v58 = vcombine.low %v4554_v48, %v4561_v49  ;;  %v4079_v59 = vmax.f32 %v3917_v50, 0.0  ;;  %v2961_v61 = vcombine.high %v2662_v52, %v2662_v52  ;;  %v11566_v62 = vrot.slane %v4073_v1, %v11504_v32 }
 0x127   : > { %v11568_v63 = vcombine.low %v4076_v51, %v4077_v54  ;;  %v2959_v0 = vcombine.high %v2951_v56, %v2951_v56  ;;  %v3918_v2 = vadd.f32 %v11510_v35, %v2951_v56  ;;  %v2960_v6 = vcombine.high %v2958_v60, %v2958_v60 }
 0x128   : > { %v11579_v4 = vpack.c.bf16 %v11562_v58, %v11550_v30  ;;  %v11581_v5 = vcombine.low %v4078_v55, %v4079_v59  ;;  %v3920_v7 = vadd.f32 %v11507_v16, %v2958_v60  ;;  %v4578_v9 = vrot.slane %v11559_v53, %v11504_v32 }
 0x129   : > { %v4585_v11 = vrot.slane %v11568_v63, %v11504_v32  ;;  %v3919_v12 = vadd.f32 %v11524_v43, %v2959_v0  ;;  %v2968_v13 = vrot.slane %v2662_v52, %v11504_v32  ;;  %v3921_v14 = vadd.f32 %v11507_v16, %v2960_v6 }
 0x12a   : > { %v4080_v15 = vmax.f32 %v3918_v2, 0.0  ;;  %v4082_v17 = vmax.f32 %v3920_v7, 0.0  ;;  %v2975_v18 = vrot.slane %v2961_v61, %v11504_v32  ;;  %9892 = vmatmul.mubr.msk.bf16.vlgmr.msra.gmra.mrb[84].mxu0 %vm11573_vm3, %v11579_v4  ;;  %v2667_v19 = vpop.f32.mrb[16].mxu0  ;;  %v4595_v25 = vrot.slane %v11581_v5, %v11504_v32 }
 0x12b   : > { %v4081_v20 = vmax.f32 %v3919_v12, 0.0  ;;  %v2976_v21 = vcombine.high %v2968_v13, %v2968_v13  ;;  %v3922_v22 = vadd.f32 %v11515_v39, %v2968_v13  ;;  %v2978_v23 = vcombine.high %v2667_v19, %v2667_v19  ;;  %v9809_v24 = vpop.f32.mrb[17].mxu0 }
 0x12c   : > { %v2977_v26 = vcombine.high %v2975_v18, %v2975_v18  ;;  %v3924_v27 = vadd.f32 %v11524_v43, %v2975_v18  ;;  %v4083_v31 = vmax.f32 %v3921_v14, 0.0  ;;  %v2670_v33 = vpop.f32.mrb[18].mxu0  ;;  %v2985_v37 = vrot.slane %v2667_v19, %v11504_v32 }
 0x12d   : > { %v4588_v34 = vcombine.low %v4080_v15, %v4081_v20  ;;  %v3923_v1 = vadd.f32 %v11510_v35, %v2976_v21  ;;  %v4084_v36 = vmax.f32 %v3922_v22, 0.0  ;;  %v9810_v38 = vpop.f32.mrb[19].mxu0  ;;  %v2992_v44 = vrot.slane %v2978_v23, %v11504_v32 }
 0x12e   : > { %v3925_v40 = vadd.f32 %v11507_v16, %v2977_v26  ;;  %v4086_v42 = vmax.f32 %v3924_v27, 0.0  ;;  %v2995_v45 = vcombine.high %v2670_v33, %v2670_v33  ;;  %v11605_v46 = vrot.slane %v4082_v17, %v11504_v32 }
 0x12f   : > { %v4085_v47 = vmax.f32 %v3923_v1, 0.0  ;;  %v11607_v48 = vcombine.low %v4083_v31, %v4084_v36  ;;  %v2993_v49 = vcombine.high %v2985_v37, %v2985_v37  ;;  %v4602_v50 = vrot.slane %v4588_v34, %v11504_v32 }
 0x130   : > { %v2994_v51 = vcombine.high %v2992_v44, %v2992_v44  ;;  %v3926_v52 = vadd.f32 %v11515_v39, %v2985_v37  ;;  %v3928_v54 = vadd.f32 %v11524_v43, %v2992_v44  ;;  %v4087_v57 = vmax.f32 %v3925_v40, 0.0 }
 0x131   : > { %v11612_v55 = vcombine.low %v4085_v47, %v4086_v42  ;;  %v3927_v56 = vadd.f32 %v11510_v35, %v2993_v49  ;;  %v3002_v59 = vrot.slane %v2670_v33, %v11504_v32  ;;  %v3009_v2 = vrot.slane %v2995_v45, %v11504_v32 }
 0x132   : > { %v3929_v60 = vadd.f32 %v11507_v16, %v2994_v51  ;;  %v4088_v61 = vmax.f32 %v3926_v52, 0.0  ;;  %v4090_v0 = vmax.f32 %v3928_v54, 0.0  ;;  %v2675_v6 = vpop.f32.mrb[20].mxu0  ;;  %v4619_v7 = vrot.slane %v11607_v48, %v11504_v32  ;;  %v10753_v48 = vld [vmem:[%s13604_s3 + $0xe0] sm:$0xff]  }
 0x133   : > { %v4089_v12 = vmax.f32 %v3927_v56, 0.0  ;;  %v3010_v13 = vcombine.high %v3002_v59, %v3002_v59  ;;  %v3930_v14 = vadd.f32 %v11507_v16, %v3002_v59  ;;  %v9813_v15 = vpop.f32.mrb[21].mxu0  ;;  %v3011_v19 = vcombine.high %v3009_v2, %v3009_v2 }
 0x134   : > { %v4091_v17 = vmax.f32 %v3929_v60, 0.0  ;;  %v11621_v18 = vcombine.low %v4087_v57, %v4088_v61  ;;  %v3932_v20 = vadd.f32 %v11510_v35, %v3009_v2  ;;  %v2678_v21 = vpop.f32.mrb[22].mxu0  ;;  %v4626_v22 = vrot.slane %v11612_v55, %v11504_v32  ;;  %v10752_v2 = vld [vmem:[%s13604_s3 + $0x40] sm:$0xff]  }
 0x135   : > { %v11626_v23 = vcombine.low %v4089_v12, %v4090_v0  ;;  %v3931_v24 = vadd.f32 %v11515_v39, %v3010_v13  ;;  %v4092_v26 = vmax.f32 %v3930_v14, 0.0  ;;  %v9814_v27 = vpop.f32.mrb[23].mxu0  ;;  %v3933_v34 = vadd.f32 %v11524_v43, %v3011_v19  ;;  %9923 = vmatprep.subr.bf16.mxu0 %v10752_v2 }
 0x136   : > { %v4636_v31 = vrot.slane %v11621_v18, %v11504_v32  ;;  %v11632_v33 = vrot.slane %v4091_v17, %v11504_v32  ;;  %v5283_v1 = vsel %vm3696_vm1, %v11550_v30, 0.0  ;;  %v4094_v37 = vmax.f32 %v3932_v20, 0.0  ;;  %9924 = vmatpush3.bf16.msra.mxu0 %v10752_v2  ;;  %v10751_v2 = vld [vmem:[%s13604_s3 + $0xd8] sm:$0xff]  }
 0x137   : > { %v4093_v36 = vmax.f32 %v3931_v24, 0.0  ;;  %v5285_v38 = vsel %vm3701_vm4, %v11566_v62, 0.0  ;;  %v11642_v40 = vpack.c.bf16 %v11562_v58, %v5283_v1  ;;  %v4095_v42 = vmax.f32 %v3933_v34, 0.0 }
 0x138   : > { %v11644_v44 = vpack.c.bf16 %v5285_v38, %v5285_v38  ;;  %v3012_v45 = vcombine.high %v2675_v6, %v2675_v6  ;;  %v3019_v47 = vrot.slane %v2675_v6, %v11504_v32  ;;  %v4586_v30 = vcombine.low %v4578_v9, %v4585_v11 }
 0x139   : > { %v11647_v49 = vcombine.low %v4092_v26, %v4093_v36  ;;  %v6136_v51 = vrot.slane %v11642_v40, 1  ;;  %v4603_v58 = vcombine.low %v4595_v25, %v4602_v50  ;;  %v4643_v62 = vrot.slane %v11626_v23, %v11504_v32  ;;  %v10749_v25 = vld [vmem:[%s13604_s3 + $0xc8] sm:$0xff]  }
 0x13a   : > { %v11661_v52 = vcombine.low %v4094_v37, %v4095_v42  ;;  %v6137_v54 = vrot.slane %v11644_v44, 1  ;;  %v3026_v56 = vrot.slane %v3012_v45, %v11504_v32  ;;  %v11665_v57 = vpop.f32.mrb[24].mxu0  ;;  %v3027_v53 = vcombine.high %v3019_v47, %v3019_v47  ;;  %v10754_v26 = vld [vmem:[%s13604_s3 + $0x48] sm:$0xff]  }
 0x13b   : > { %v4660_v63 = vrot.slane %v11647_v49, %v11504_v32  ;;  %v3934_v9 = vadd.f32 %v11507_v16, %v3019_v47  ;;  %v5286_v5 = vsel %vm3696_vm1, %v4586_v30, 0.0  ;;  %v9817_v11 = vpop.f32.mrb[25].mxu0  ;;  %v11688_v13 = vpack.c.bf16 %v4603_v58, %v4586_v30  ;;  %9925 = vmatprep.subr.bf16.mxu0 %v10754_v26 }
 0x13c   : > { %v4667_v50 = vrot.slane %v11661_v52, %v11504_v32  ;;  %v11678_v59 = vsel %vm6132_vm5, %v6136_v51, %v6137_v54  ;;  %v3028_v60 = vcombine.high %v3026_v56, %v3026_v56  ;;  %v3936_v61 = vadd.f32 %v11510_v35, %v3026_v56  ;;  %v11681_v0 = vpop.f32.mrb[26].mxu0  ;;  %9926 = vmatpush3.bf16.msra.mxu0 %v10754_v26 }
 0x13d   : > { %13668 = vst [vmem:[#allocation6_spill] sm:$0xff] %v11678_v59  ;;  %9988 = vmatmul.mubr.bf16.vlgmr.msra.gmra.mrb[0].mxu1 %v11678_v59  ;;  %v3935_v6 = vadd.f32 %v11515_v39, %v3027_v53  ;;  %v4096_v12 = vmax.f32 %v3934_v9, 0.0  ;;  %v3029_v14 = vcombine.high %v2678_v21, %v2678_v21  ;;  %v9818_v15 = vpop.f32.mrb[27].mxu0  ;;  %v3036_v20 = vrot.slane %v2678_v21, %v11504_v32 }
 0x13e   : > { %v3937_v17 = vadd.f32 %v11524_v43, %v3028_v60  ;;  %v4098_v19 = vmax.f32 %v3936_v61, 0.0  ;;  %v5288_v24 = vsel %vm3701_vm4, %v11605_v46, 0.0  ;;  %10020 = vmatpush3.bf16.msra.mxu1 %v11520_v41  ;;  %9895 = vmatprep.mubr.msk.bf16.mxu0 %vm11573_vm3, %v11688_v13  ;;  %v11703_v1 = vpack.c.bf16 %v4603_v58, %v5286_v5  ;;  %v10750_v41 = vld [vmem:[%s13604_s3 + $0xd0] sm:$0xff]  }
 0x13f   : > { %v4097_v27 = vmax.f32 %v3935_v6, 0.0  ;;  %v3043_v34 = vrot.slane %v3029_v14, %v11504_v32  ;;  %v11705_v21 = vpack.c.bf16 %v5288_v24, %v5288_v24  ;;  %10021 = vmatprep.subr.bf16.mxu1 %v10749_v25  ;;  %v3044_v36 = vcombine.high %v3036_v20, %v3036_v20 }
 0x140   : > { %v4099_v46 = vmax.f32 %v3937_v17, 0.0  ;;  %v3938_v37 = vadd.f32 %v11507_v16, %v3036_v20  ;;  %v3046_v38 = vcombine.high %v11665_v57, %v11665_v57  ;;  %v6139_v51 = vrot.slane %v11703_v1, 1 }
 0x141   : > { %v11713_v42 = vcombine.low %v4096_v12, %v4097_v27  ;;  %v3045_v45 = vcombine.high %v3043_v34, %v3043_v34  ;;  %v3940_v47 = vadd.f32 %v11515_v39, %v3043_v34  ;;  %v3939_v58 = vadd.f32 %v11507_v16, %v3044_v36  ;;  %v10755_v36 = vld [vmem:[%s13604_s3 + $0x50] sm:$0xff]  }
 0x142   : > { %v11717_v30 = vcombine.low %v4098_v19, %v4099_v46  ;;  %v4100_v54 = vmax.f32 %v3938_v37, 0.0  ;;  %v6140_v56 = vrot.slane %v11705_v21, 1  ;;  %v11721_v53 = vpop.f32.mrb[28].mxu0  ;;  %10022 = vmatpush3.bf16.msra.mxu1 %v10749_v25  ;;  %v3053_v60 = vrot.slane %v11665_v57, %v11504_v32  ;;  %9927 = vmatprep.subr.bf16.mxu0 %v10755_v36 }
 0x143   : > { %v4677_v9 = vrot.slane %v11713_v42, %v11504_v32  ;;  %v3941_v5 = vadd.f32 %v11510_v35, %v3045_v45  ;;  %v4102_v11 = vmax.f32 %v3940_v47, 0.0  ;;  %v9821_v61 = vpop.f32.mrb[29].mxu0  ;;  %10023 = vmatprep.subr.bf16.mxu1 %v10750_v41  ;;  %v4101_v12 = vmax.f32 %v3939_v58, 0.0  ;;  %9928 = vmatpush3.bf16.msra.mxu0 %v10755_v36  ;;  %v10764_v42 = vld [vmem:[%s13604_s3 + $0x100] sm:$0xff]  }
 0x144   : > { %v4684_v6 = vrot.slane %v11717_v30, %v11504_v32  ;;  %v4692_v25 = vrot.slane %v4100_v54, %v11504_v32  ;;  %v11735_v14 = vsel %vm6132_vm5, %v6139_v51, %v6140_v56  ;;  %v11737_v15 = vpop.f32.mrb[30].mxu0  ;;  %v3060_v57 = vrot.slane %v3046_v38, %v11504_v32 }
 0x145   : > { %13669 = vst [vmem:[#allocation7_spill] sm:$0xff] %v11735_v14  ;;  %9991 = vmatprep.mubr.bf16.mxu1 %v11735_v14  ;;  %v3061_v17 = vcombine.high %v3053_v60, %v3053_v60  ;;  %v3942_v19 = vadd.f32 %v11524_v43, %v3053_v60  ;;  %v4103_v20 = vmax.f32 %v3941_v5, 0.0  ;;  %v9822_v24 = vpop.f32.mrb[31].mxu0  ;;  %v11742_v27 = vcombine.low %v4101_v12, %v4102_v11  ;;  %v10757_v11 = vld [vmem:[%s13604_s3 + $0x58] sm:$0xff]   ;;  %v10758_v60 = vld [vmem:[%s13604_s3 + $0x60] sm:$0xff]  }
 0x146   : > { %v11746_v34 = vsel %vm3701_vm4, %v4692_v25, 0.0  ;;  %v4627_v26 = vcombine.low %v4619_v7, %v4626_v22  ;;  %v4644_v46 = vcombine.low %v4636_v31, %v4643_v62  ;;  %10024 = vmatpush3.bf16.msra.mxu1 %v10750_v41  ;;  %v3062_v37 = vcombine.high %v3060_v57, %v3060_v57  ;;  %9929 = vmatprep.subr.bf16.mxu0 %v10757_v11 }
 0x147   : > { %v3943_v38 = vadd.f32 %v11507_v16, %v3061_v17  ;;  %v3944_v55 = vadd.f32 %v11515_v39, %v3060_v57  ;;  %v4104_v45 = vmax.f32 %v3942_v19, 0.0  ;;  %10025 = vmatprep.subr.bf16.mxu1 %v10751_v2  ;;  %v4701_v7 = vrot.slane %v11742_v27, %v11504_v32  ;;  %9930 = vmatpush3.bf16.msra.mxu0 %v10757_v11 }
 0x148   : > { %v5289_v18 = vsel %vm3696_vm1, %v4627_v26, 0.0  ;;  %v11772_v22 = vpack.c.bf16 %v4644_v46, %v4627_v26  ;;  %v3063_v23 = vcombine.high %v11681_v0, %v11681_v0  ;;  %v3945_v31 = vadd.f32 %v11510_v35, %v3062_v37  ;;  %9931 = vmatprep.subr.bf16.mxu0 %v10758_v60 }
 0x149   : > { %v4105_v62 = vmax.f32 %v3943_v38, 0.0  ;;  %v4106_v41 = vmax.f32 %v3944_v55, 0.0  ;;  %v11777_v47 = vcombine.low %v4103_v20, %v4104_v45  ;;  %v3070_v51 = vrot.slane %v11681_v0, %v11504_v32 }
 0x14a   : > { %13670 = vst [vmem:[#allocation8_spill] sm:$0xff] %v11772_v22  ;;  %9896 = vmatmul.mubr.msk.bf16.gmra.mrb[88].mxu0 %vm11573_vm3, %v11772_v22  ;;  %v3077_v58 = vrot.slane %v3063_v23, %v11504_v32  ;;  %v5291_v54 = vsel %vm3701_vm4, %v11632_v33, 0.0  ;;  %v11788_v56 = vpack.c.bf16 %v4644_v46, %v5289_v18  ;;  %v11790_v5 = vpop.f32.mrb[32].mxu0  ;;  %10026 = vmatpush3.bf16.msra.mxu1 %v10751_v2  ;;  %v4107_v12 = vmax.f32 %v3945_v31, 0.0  ;;  %v10756_v2 = vld [vmem:[%s13604_s3 + $0xe8] sm:$0xff]  }
 0x14b   : > { %v4708_v0 = vrot.slane %v11777_v47, %v11504_v32  ;;  %v11800_v61 = vcombine.low %v4105_v62, %v4106_v41  ;;  %v11802_v33 = vpack.c.bf16 %v5291_v54, %v5291_v54  ;;  %v9825_v25 = vpop.f32.mrb[33].mxu0  ;;  %10027 = vmatprep.subr.bf16.mxu1 %v10753_v48  ;;  %v3078_v57 = vcombine.high %v3070_v51, %v3070_v51 }
 0x14c   : > { %v3079_v17 = vcombine.high %v3077_v58, %v3077_v58  ;;  %v3946_v19 = vadd.f32 %v11524_v43, %v3070_v51  ;;  %v3948_v20 = vadd.f32 %v11507_v16, %v3077_v58  ;;  %v11809_v24 = vpop.f32.mrb[34].mxu0  ;;  %v6142_v46 = vrot.slane %v11788_v56, 1  ;;  %v10759_v58 = vld [vmem:[%s13604_s3 + $0xf0] sm:$0xff]   ;;  %9932 = vmatpush3.bf16.msra.mxu0 %v10758_v60 }
 0x14d   : > { %v4718_v26 = vrot.slane %v11800_v61, %v11504_v32  ;;  %v6143_v36 = vrot.slane %v11802_v33, 1  ;;  %v3080_v37 = vcombine.high %v11721_v53, %v11721_v53  ;;  %v9826_v38 = vpop.f32.mrb[35].mxu0  ;;  %v3947_v55 = vadd.f32 %v11507_v16, %v3078_v57 }
 0x14e   : > { %v3949_v45 = vadd.f32 %v11515_v39, %v3079_v17  ;;  %v4108_v18 = vmax.f32 %v3946_v19, 0.0  ;;  %v4110_v23 = vmax.f32 %v3948_v20, 0.0  ;;  %10028 = vmatpush3.bf16.msra.mxu1 %v10753_v48  ;;  %v3087_v62 = vrot.slane %v11721_v53, %v11504_v32  ;;  %v10760_v48 = vld [vmem:[%s13604_s3 + $0x68] sm:$0xff]  }
 0x14f   : > { %v11820_v31 = vsel %vm6132_vm5, %v6142_v46, %v6143_v36  ;;  %v3094_v41 = vrot.slane %v3080_v37, %v11504_v32  ;;  %v3097_v51 = vcombine.high %v11737_v15, %v11737_v15  ;;  %10029 = vmatprep.subr.bf16.mxu1 %v10756_v2  ;;  %v4109_v54 = vmax.f32 %v3947_v55, 0.0  ;;  %9933 = vmatprep.subr.bf16.mxu0 %v10760_v48 }
 0x150   : > { %13671 = vst [vmem:[#allocation9_spill] sm:$0xff] %v11820_v31  ;;  %v4111_v11 = vmax.f32 %v3949_v45, 0.0  ;;  %v11833_v25 = vcombine.low %v4107_v12, %v4108_v18  ;;  %9992 = vmatmul.mubr.bf16.gmra.mrb[4].mxu1 %v11820_v31  ;;  %v3104_v53 = vrot.slane %v11737_v15, %v11504_v32  ;;  %v3095_v57 = vcombine.high %v3087_v62, %v3087_v62  ;;  %v10761_v15 = vld [vmem:[%s13604_s3 + $0x70] sm:$0xff]  }
 0x151   : > { %v3096_v17 = vcombine.high %v3094_v41, %v3094_v41  ;;  %v3950_v19 = vadd.f32 %v11510_v35, %v3087_v62  ;;  %v3952_v20 = vadd.f32 %v11507_v16, %v3094_v41  ;;  %v11843_v36 = vrot.slane %v4109_v54, %v11504_v32  ;;  %9934 = vmatpush3.bf16.msra.mxu0 %v10760_v48  ;;  %v10763_v48 = vld [vmem:[%s13604_s3 + $0x78] sm:$0xff]  }
 0x152   : > { %v4725_v46 = vrot.slane %v11833_v25, %v11504_v32  ;;  %v11845_v12 = vcombine.low %v4110_v23, %v4111_v11  ;;  %v3111_v37 = vrot.slane %v3097_v51, %v11504_v32  ;;  %v11848_v38 = vpop.f32.mrb[36].mxu0  ;;  %10030 = vmatpush3.bf16.msra.mxu1 %v10756_v2  ;;  %v3951_v55 = vadd.f32 %v11524_v43, %v3095_v57  ;;  %v10762_v23 = vld [vmem:[%s13604_s3 + $0xf8] sm:$0xff]  }
 0x153   : > { %v3953_v60 = vadd.f32 %v11515_v39, %v3096_v17  ;;  %v4112_v45 = vmax.f32 %v3950_v19, 0.0  ;;  %v4114_v18 = vmax.f32 %v3952_v20, 0.0  ;;  %v9829_v62 = vpop.f32.mrb[37].mxu0  ;;  %10031 = vmatprep.subr.bf16.mxu1 %v10759_v58  ;;  %v3112_v41 = vcombine.high %v3104_v53, %v3104_v53  ;;  %9935 = vmatprep.subr.bf16.mxu0 %v10761_v15 }
 0x154   : > { %v3113_v51 = vcombine.high %v3111_v37, %v3111_v37  ;;  %v3954_v54 = vadd.f32 %v11510_v35, %v3104_v53  ;;  %v11861_v11 = vpop.f32.mrb[38].mxu0  ;;  %v4113_v57 = vmax.f32 %v3951_v55, 0.0  ;;  %v3956_v19 = vadd.f32 %v11507_v16, %v3111_v37 }
 0x155   : > { %v4115_v17 = vmax.f32 %v3953_v60, 0.0  ;;  %v4668_v20 = vcombine.low %v4660_v63, %v4667_v50  ;;  %v9830_v62 = vpop.f32.mrb[39].mxu0  ;;  %v3955_v28 = vadd.f32 %v11524_v43, %v3112_v41  ;;  %v4685_v37 = vcombine.low %v4677_v9, %v4684_v6  ;;  %9936 = vmatpush3.bf16.msra.mxu0 %v10761_v15 }
 0x156   : > { %v3957_v2 = vadd.f32 %v11507_v16, %v3113_v51  ;;  %v4116_v53 = vmax.f32 %v3954_v54, 0.0  ;;  %10032 = vmatpush3.bf16.msra.mxu1 %v10759_v58  ;;  %v11878_v52 = vcombine.low %v4112_v45, %v4113_v57  ;;  %v4118_v63 = vmax.f32 %v3956_v19, 0.0  ;;  %9937 = vmatprep.subr.bf16.mxu0 %v10763_v48 }
 0x157   : > { %v11880_v49 = vcombine.low %v4114_v18, %v4115_v17  ;;  %v5292_v50 = vsel %vm3696_vm1, %v4668_v20, 0.0  ;;  %10033 = vmatprep.subr.bf16.mxu1 %v10762_v23  ;;  %v4117_v30 = vmax.f32 %v3955_v28, 0.0  ;;  %v11890_v9 = vpack.c.bf16 %v4685_v37, %v4668_v20 }
 0x158   : > { %v11892_v6 = vpack.c.bf16 %v4685_v37, %v5292_v50  ;;  %v11896_v58 = vpack.c.bf16 %v11746_v34, %v11746_v34  ;;  %v4749_v55 = vrot.slane %v11878_v52, %v11504_v32  ;;  %v11903_v45 = vrot.slane %v4118_v63, %v11504_v32 }
 0x159   : > { %13672 = vst [vmem:[#allocation10_spill] sm:$0xff] %v11890_v9  ;;  %v3114_v28 = vcombine.high %v11790_v5, %v11790_v5  ;;  %v11907_v18 = vcombine.low %v4116_v53, %v4117_v30  ;;  %9899 = vmatprep.mubr.msk.bf16.mxu0 %vm11573_vm3, %v11890_v9  ;;  %v3121_v51 = vrot.slane %v11790_v5, %v11504_v32  ;;  %v4119_v17 = vmax.f32 %v3957_v2, 0.0 }
 0x15a   : > { %v6145_v34 = vrot.slane %v11892_v6, 1  ;;  %v6146_v41 = vrot.slane %v11896_v58, 1  ;;  %v11916_v54 = vpop.f32.mrb[40].mxu0  ;;  %10034 = vmatpush3.bf16.msra.mxu1 %v10762_v23  ;;  %v3131_v15 = vcombine.high %v11809_v24, %v11809_v24  ;;  %v3138_v19 = vrot.slane %v11809_v24, %v11504_v32  ;;  %9938 = vmatpush3.bf16.msra.mxu0 %v10763_v48 }
 0x15b   : > { %v3128_v57 = vrot.slane %v3114_v28, %v11504_v32  ;;  %v9833_v20 = vpop.f32.mrb[41].mxu0  ;;  %10067 = vmatprep.subr.bf16.mxu1 %v10764_v42  ;;  %v4766_v62 = vrot.slane %v11907_v18, %v11504_v32  ;;  %v3129_v53 = vcombine.high %v3121_v51, %v3121_v51  ;;  %v3958_v23 = vadd.f32 %v11515_v39, %v3121_v51 }
 0x15c   : > { %v11926_v5 = vsel %vm6132_vm5, %v6145_v34, %v6146_v41  ;;  %v11929_v37 = vpop.f32.mrb[42].mxu0  ;;  %v3145_v24 = vrot.slane %v3131_v15, %v11504_v32  ;;  %v3146_v50 = vcombine.high %v3138_v19, %v3138_v19  ;;  %v3962_v18 = vadd.f32 %v11515_v39, %v3138_v19 }
 0x15d   : > { %13673 = vst [vmem:[#allocation11_spill] sm:$0xff] %v11926_v5  ;;  %9995 = vmatprep.mubr.bf16.mxu1 %v11926_v5  ;;  %v3130_v2 = vcombine.high %v3128_v57, %v3128_v57  ;;  %v3960_v63 = vadd.f32 %v11524_v43, %v3128_v57  ;;  %v9834_v42 = vpop.f32.mrb[43].mxu0  ;;  %v3959_v30 = vadd.f32 %v11510_v35, %v3129_v53  ;;  %v4120_v28 = vmax.f32 %v3958_v23, 0.0 }
 0x15e   : > { %v4709_v34 = vcombine.low %v4701_v7, %v4708_v0  ;;  %v3147_v57 = vcombine.high %v3145_v24, %v3145_v24  ;;  %v3963_v15 = vadd.f32 %v11510_v35, %v3146_v50  ;;  %v3964_v53 = vadd.f32 %v11524_v43, %v3145_v24 }
 0x15f   : > { %v3961_v41 = vadd.f32 %v11507_v16, %v3130_v2  ;;  %v4122_v51 = vmax.f32 %v3960_v63, 0.0  ;;  %v4121_v20 = vmax.f32 %v3959_v30, 0.0  ;;  %v11944_v42 = vcombine.low %v4119_v17, %v4120_v28 }
 0x160   : > { %v4124_v19 = vmax.f32 %v3962_v18, 0.0  ;;  %v3965_v23 = vadd.f32 %v11507_v16, %v3147_v57  ;;  %v4125_v60 = vmax.f32 %v3963_v15, 0.0  ;;  %v4726_v27 = vcombine.low %v4718_v26, %v4725_v46 }
 0x161   : > { %v4123_v47 = vmax.f32 %v3961_v41, 0.0  ;;  %v11954_v7 = vcombine.low %v4121_v20, %v4122_v51  ;;  %v4126_v48 = vmax.f32 %v3964_v53, 0.0  ;;  %v5295_v17 = vsel %vm3696_vm1, %v4709_v34, 0.0 }
 0x162   : > { %v11960_v2 = vpop.f32.mrb[44].mxu0  ;;  %v4127_v63 = vmax.f32 %v3965_v23, 0.0  ;;  %v11964_v50 = vpack.c.bf16 %v4726_v27, %v4709_v34  ;;  %v5297_v61 = vsel %vm3701_vm4, %v11843_v36, 0.0  ;;  %v11973_v30 = vpack.c.bf16 %v4726_v27, %v5295_v17 }
 0x163   : > { %v11962_v24 = vcombine.low %v4123_v47, %v4124_v19  ;;  %v9837_v26 = vpop.f32.mrb[45].mxu0  ;;  %v11971_v46 = vcombine.low %v4125_v60, %v4126_v48  ;;  %v11975_v28 = vpack.c.bf16 %v5297_v61, %v5297_v61  ;;  %v3148_v36 = vcombine.high %v11848_v38, %v11848_v38 }
 0x164   : > { %13674 = vst [vmem:[#allocation12_spill] sm:$0xff] %v11964_v50  ;;  %v11977_v18 = vpop.f32.mrb[46].mxu0  ;;  %v11982_v41 = vrot.slane %v4127_v63, %v11504_v32  ;;  %9900 = vmatmul.mubr.msk.bf16.gmra.mrb[92].mxu0 %vm11573_vm3, %v11964_v50  ;;  %v3155_v60 = vrot.slane %v11848_v38, %v11504_v32  ;;  %v6148_v15 = vrot.slane %v11973_v30, 1  ;;  %v3165_v53 = vcombine.high %v11861_v11, %v11861_v11 }
 0x165   : > { %v9838_v51 = vpop.f32.mrb[47].mxu0  ;;  %v6149_v20 = vrot.slane %v11975_v28, 1  ;;  %v3162_v19 = vrot.slane %v3148_v36, %v11504_v32  ;;  %v3172_v27 = vrot.slane %v11861_v11, %v11504_v32  ;;  %v13676_v17 = vrot.slane %v11845_v12, %v11504_v32 }
 0x166   : > { %v3163_v23 = vcombine.high %v3155_v60, %v3155_v60  ;;  %v3966_v47 = vadd.f32 %v11507_v16, %v3155_v60  ;;  %v3179_v48 = vrot.slane %v3165_v53, %v11504_v32  ;;  %v13677_v61 = vrot.slane %v11880_v49, %v11504_v32 }
 0x167   : > { %v12002_v38 = vsel %vm6132_vm5, %v6148_v15, %v6149_v20  ;;  %v4750_v63 = vcombine.low %v13676_v17, %v4749_v55  ;;  %v3164_v36 = vcombine.high %v3162_v19, %v3162_v19  ;;  %v3968_v60 = vadd.f32 %v11510_v35, %v3162_v19 }
 0x168   : > { %13675 = vst [vmem:[#allocation13_spill] sm:$0xff] %v12002_v38  ;;  %v4767_v26 = vcombine.low %v13677_v61, %v4766_v62  ;;  %9996 = vmatmul.mubr.bf16.gmra.mrb[8].mxu1 %v12002_v38  ;;  %v3967_v11 = vadd.f32 %v11515_v39, %v3163_v23  ;;  %v4128_v51 = vmax.f32 %v3966_v47, 0.0  ;;  %v3180_v15 = vcombine.high %v3172_v27, %v3172_v27 }
 0x169   : > { %v3181_v20 = vcombine.high %v3179_v48, %v3179_v48  ;;  %v3970_v52 = vadd.f32 %v11507_v16, %v3172_v27  ;;  %v3972_v53 = vadd.f32 %v11510_v35, %v3179_v48  ;;  %v3969_v55 = vadd.f32 %v11524_v43, %v3164_v36 }
 0x16a   : > { %v12019_v12 = vpop.f32.mrb[48].mxu0  ;;  %v4129_v49 = vmax.f32 %v3967_v11, 0.0  ;;  %v4130_v62 = vmax.f32 %v3968_v60, 0.0  ;;  %v5298_v17 = vsel %vm3696_vm1, %v4750_v63, 0.0  ;;  %v3971_v23 = vadd.f32 %v11515_v39, %v3180_v15 }
 0x16b   : > { %v9841_v61 = vpop.f32.mrb[49].mxu0  ;;  %v3973_v19 = vadd.f32 %v11524_v43, %v3181_v20  ;;  %v4132_v47 = vmax.f32 %v3970_v52, 0.0  ;;  %v4134_v34 = vmax.f32 %v3972_v53, 0.0  ;;  %v4131_v27 = vmax.f32 %v3969_v55, 0.0 }
 0x16c   : > { %v12026_v57 = vpop.f32.mrb[50].mxu0  ;;  %v12028_v48 = vcombine.low %v4128_v51, %v4129_v49  ;;  %v12030_v0 = vpack.c.bf16 %v4767_v26, %v4750_v63  ;;  %v5300_v36 = vsel %vm3701_vm4, %v11903_v45, 0.0  ;;  %v4133_v60 = vmax.f32 %v3971_v23, 0.0 }
 0x16d   : > { %v9842_v11 = vpop.f32.mrb[51].mxu0  ;;  %v4135_v61 = vmax.f32 %v3973_v19, 0.0  ;;  %v12035_v25 = vpack.c.bf16 %v4767_v26, %v5298_v17  ;;  %v12037_v15 = vpack.c.bf16 %v5300_v36, %v5300_v36  ;;  %v12039_v20 = vcombine.low %v4130_v62, %v4131_v27 }
 0x16e   : > { %13678 = vst [vmem:[#allocation14_spill] sm:$0xff] %v12030_v0  ;;  %9903 = vmatprep.mubr.msk.bf16.mxu0 %vm11573_vm3, %v12030_v0  ;;  %v3182_v63 = vcombine.high %v11916_v54, %v11916_v54  ;;  %v3189_v45 = vrot.slane %v11916_v54, %v11504_v32  ;;  %v12050_v51 = vcombine.low %v4132_v47, %v4133_v60 }
 0x16f   : > { %v12052_v26 = vcombine.low %v4134_v34, %v4135_v61  ;;  %v6151_v53 = vrot.slane %v12035_v25, 1  ;;  %v6152_v55 = vrot.slane %v12037_v15, 1  ;;  %v3199_v47 = vcombine.high %v11929_v37, %v11929_v37 }
 0x170   : > { %v3196_v62 = vrot.slane %v3182_v63, %v11504_v32  ;;  %v3197_v17 = vcombine.high %v3189_v45, %v3189_v45  ;;  %v3974_v23 = vadd.f32 %v11507_v16, %v3189_v45  ;;  %v3206_v45 = vrot.slane %v11929_v37, %v11504_v32 }
 0x171   : > { %v12065_v34 = vsel %vm6132_vm5, %v6151_v53, %v6152_v55  ;;  %v3213_v53 = vrot.slane %v3199_v47, %v11504_v32  ;;  %v13680_v55 = vrot.slane %v11954_v7, %v11504_v32  ;;  %v13681_v19 = vrot.slane %v11944_v42, %v11504_v32 }
 0x172   : > { %13679 = vst [vmem:[#allocation15_spill] sm:$0xff] %v12065_v34  ;;  %v12069_v27 = vpop.f32.mrb[52].mxu0  ;;  %9999 = vmatprep.mubr.bf16.mxu1 %v12065_v34  ;;  %v3198_v36 = vcombine.high %v3196_v62, %v3196_v62  ;;  %v3975_v11 = vadd.f32 %v11507_v16, %v3197_v17  ;;  %v3976_v60 = vadd.f32 %v11515_v39, %v3196_v62  ;;  %v4136_v61 = vmax.f32 %v3974_v23, 0.0 }
 0x173   : > { %v9845_v63 = vpop.f32.mrb[53].mxu0  ;;  %v4791_v54 = vcombine.low %v13681_v19, %v13680_v55  ;;  %v13682_v52 = vrot.slane %v11971_v46, %v11504_v32  ;;  %v13683_v62 = vrot.slane %v11962_v24, %v11504_v32  ;;  %v3214_v29 = vcombine.high %v3206_v45, %v3206_v45  ;;  %v12098_v24 = vld [vmem:[%s13604_s3 + $0x200] sm:$0xff]  }
 0x174   : > { %v12089_v23 = vpop.f32.mrb[54].mxu0  ;;  %v3977_v37 = vadd.f32 %v11510_v35, %v3198_v36  ;;  %v4137_v63 = vmax.f32 %v3975_v11, 0.0  ;;  %v4138_v47 = vmax.f32 %v3976_v60, 0.0  ;;  %v4856_v49 = vrot.slane %v4136_v61, %v11504_v32  ;;  %10259 = vmatprep.subr.bf16.mxu0 %v12098_v24 }
 0x175   : > { %v4808_v17 = vcombine.low %v13683_v62, %v13682_v52  ;;  %v9846_v7 = vpop.f32.mrb[55].mxu0  ;;  %v3215_v59 = vcombine.high %v3213_v53, %v3213_v53  ;;  %v3978_v42 = vadd.f32 %v11524_v43, %v3206_v45  ;;  %v3980_v19 = vadd.f32 %v11515_v39, %v3213_v53 }
 0x176   : > { %v12100_v46 = vcombine.low %v4137_v63, %v4138_v47  ;;  %v12104_v52 = vsel %vm3701_vm4, %v4856_v49, 0.0  ;;  %v4139_v36 = vmax.f32 %v3977_v37, 0.0  ;;  %v5301_v11 = vsel %vm3696_vm1, %v4791_v54, 0.0 }
 0x177   : > { %v3979_v60 = vadd.f32 %v11507_v16, %v3214_v29  ;;  %v3981_v61 = vadd.f32 %v11510_v35, %v3215_v59  ;;  %v4140_v45 = vmax.f32 %v3978_v42, 0.0  ;;  %v4142_v53 = vmax.f32 %v3980_v19, 0.0 }
 0x178   : > { %v12113_v62 = vpack.c.bf16 %v4808_v17, %v4791_v54  ;;  %v5303_v49 = vsel %vm3701_vm4, %v11982_v41, 0.0  ;;  %v12118_v37 = vpack.c.bf16 %v4808_v17, %v5301_v11  ;;  %v3216_v59 = vcombine.high %v11960_v2, %v11960_v2 }
 0x179   : > { %v4141_v63 = vmax.f32 %v3979_v60, 0.0  ;;  %v12120_v47 = vcombine.low %v4139_v36, %v4140_v45  ;;  %v12122_v29 = vpack.c.bf16 %v5303_v49, %v5303_v49  ;;  %v3223_v41 = vrot.slane %v11960_v2, %v11504_v32 }
 0x17a   : > { %13684 = vst [vmem:[#allocation16_spill] sm:$0xff] %v12113_v62  ;;  %v12126_v7 = vpop.f32.mrb[56].mxu0  ;;  %9904 = vmatmul.mubr.msk.bf16.gmra.mrb[96].mxu0 %vm11573_vm3, %v12113_v62  ;;  %v6154_v54 = vrot.slane %v12118_v37, 1  ;;  %v4143_v17 = vmax.f32 %v3981_v61, 0.0  ;;  %v3233_v42 = vcombine.high %v11977_v18, %v11977_v18  ;;  %v3230_v45 = vrot.slane %v3216_v59, %v11504_v32 }
 0x17b   : > { %v9849_v19 = vpop.f32.mrb[57].mxu0  ;;  %v12138_v11 = vcombine.low %v4141_v63, %v4142_v53  ;;  %v6155_v60 = vrot.slane %v12122_v29, 1  ;;  %v3231_v55 = vcombine.high %v3223_v41, %v3223_v41  ;;  %v3982_v34 = vadd.f32 %v11524_v43, %v3223_v41 }
 0x17c   : > { %v12142_v49 = vpop.f32.mrb[58].mxu0  ;;  %v3240_v2 = vrot.slane %v11977_v18, %v11504_v32  ;;  %v3247_v61 = vrot.slane %v3233_v42, %v11504_v32  ;;  %v3232_v63 = vcombine.high %v3230_v45, %v3230_v45  ;;  %v3984_v59 = vadd.f32 %v11507_v16, %v3230_v45 }
 0x17d   : > { %v9850_v19 = vpop.f32.mrb[59].mxu0  ;;  %v12151_v53 = vsel %vm6132_vm5, %v6154_v54, %v6155_v60  ;;  %v3983_v38 = vadd.f32 %v11507_v16, %v3231_v55  ;;  %v4144_v41 = vmax.f32 %v3982_v34, 0.0  ;;  %v13686_v34 = vrot.slane %v12039_v20, %v11504_v32 }
 0x17e   : > { %13685 = vst [vmem:[#allocation17_spill] sm:$0xff] %v12151_v53  ;;  %10000 = vmatmul.mubr.bf16.gmra.mrb[12].mxu1 %v12151_v53  ;;  %v3248_v5 = vcombine.high %v3240_v2, %v3240_v2  ;;  %v3249_v31 = vcombine.high %v3247_v61, %v3247_v61  ;;  %v3985_v18 = vadd.f32 %v11515_v39, %v3232_v63  ;;  %v4146_v42 = vmax.f32 %v3984_v59, 0.0 }
 0x17f   : > { %v3986_v19 = vadd.f32 %v11510_v35, %v3240_v2  ;;  %v3988_v36 = vadd.f32 %v11507_v16, %v3247_v61  ;;  %v4145_v14 = vmax.f32 %v3983_v38, 0.0  ;;  %v4875_v54 = vcombine.low %v4143_v17, %v4144_v41 }
 0x180   : > { %v3987_v60 = vadd.f32 %v11524_v43, %v3248_v5  ;;  %v3989_v45 = vadd.f32 %v11515_v39, %v3249_v31  ;;  %v4147_v62 = vmax.f32 %v3985_v18, 0.0  ;;  %v13687_v55 = vrot.slane %v12028_v48, %v11504_v32 }
 0x181   : > { %v4148_v53 = vmax.f32 %v3986_v19, 0.0  ;;  %v4150_v0 = vmax.f32 %v3988_v36, 0.0  ;;  %v4889_v2 = vrot.slane %v4875_v54, %v11504_v32  ;;  %v12171_v38 = vrot.slane %v4145_v14, %v11504_v32 }
 0x182   : > { %v4832_v63 = vcombine.low %v13687_v55, %v13686_v34  ;;  %v12167_v59 = vpop.f32.mrb[60].mxu0  ;;  %v4149_v5 = vmax.f32 %v3987_v60, 0.0  ;;  %v4151_v17 = vmax.f32 %v3989_v45, 0.0  ;;  %v12173_v61 = vcombine.low %v4146_v42, %v4147_v62 }
 0x183   : > { %v9853_v31 = vpop.f32.mrb[61].mxu0  ;;  %v13688_v36 = vrot.slane %v12052_v26, %v11504_v32  ;;  %v13689_v20 = vrot.slane %v12050_v51, %v11504_v32  ;;  %v3250_v18 = vcombine.high %v12019_v12, %v12019_v12  ;;  %v3257_v62 = vrot.slane %v12019_v12, %v11504_v32 }
 0x184   : > { %v5304_v41 = vsel %vm3696_vm1, %v4832_v63, 0.0  ;;  %v12185_v14 = vpop.f32.mrb[62].mxu0  ;;  %v12187_v19 = vcombine.low %v4148_v53, %v4149_v5  ;;  %v12189_v54 = vcombine.low %v4150_v0, %v4151_v17  ;;  %v12195_v26 = vpack.c.bf16 %v12104_v52, %v12104_v52 }
 0x185   : > { %v4849_v48 = vcombine.low %v13689_v20, %v13688_v36  ;;  %v9854_v51 = vpop.f32.mrb[63].mxu0  ;;  %v3264_v45 = vrot.slane %v3250_v18, %v11504_v32  ;;  %v3265_v53 = vcombine.high %v3257_v62, %v3257_v62  ;;  %v3990_v52 = vadd.f32 %v11510_v35, %v3257_v62 }
 0x186   : > { %13690 = vst [vmem:[#allocation18_spill] sm:$0xff] %v12195_v26  ;;  %v6158_v17 = vrot.slane %v12195_v26, 1  ;;  %v3267_v20 = vcombine.high %v12026_v57, %v12026_v57  ;;  %v13693_v51 = vrot.slane %v12120_v47, %v11504_v32  ;;  %v13695_v47 = vrot.slane %v12138_v11, %v11504_v32 }
 0x187   : > { %v12199_v60 = vpack.c.bf16 %v4849_v48, %v4832_v63  ;;  %v12202_v34 = vpack.c.bf16 %v4849_v48, %v5304_v41  ;;  %v3266_v55 = vcombine.high %v3264_v45, %v3264_v45  ;;  %v3992_v63 = vadd.f32 %v11507_v16, %v3264_v45 }
 0x188   : > { %v3991_v31 = vadd.f32 %v11524_v43, %v3265_v53  ;;  %v4152_v36 = vmax.f32 %v3990_v52, 0.0  ;;  %v3274_v48 = vrot.slane %v12026_v57, %v11504_v32  ;;  %v13694_v45 = vrot.slane %v12100_v46, %v11504_v32 }
 0x189   : > { %13691 = vst [vmem:[#allocation19_spill] sm:$0xff] %v12199_v60  ;;  %9907 = vmatprep.mubr.msk.bf16.mxu0 %vm11573_vm3, %v12199_v60  ;;  %v6157_v5 = vrot.slane %v12202_v34, 1  ;;  %v3993_v41 = vadd.f32 %v11507_v16, %v3266_v55  ;;  %v4154_v18 = vmax.f32 %v3992_v63, 0.0  ;;  %v3281_v57 = vrot.slane %v3267_v20, %v11504_v32 }
 0x18a   : > { %v4873_v53 = vcombine.low %v13694_v45, %v13693_v51  ;;  %v12230_v52 = vpop.f32.mrb[64].mxu0  ;;  %v4153_v12 = vmax.f32 %v3991_v31, 0.0  ;;  %v3282_v42 = vcombine.high %v3274_v48, %v3274_v48  ;;  %v3994_v55 = vadd.f32 %v11515_v39, %v3274_v48 }
 0x18b   : > { %v12222_v62 = vsel %vm6132_vm5, %v6157_v5, %v6158_v17  ;;  %v9857_v63 = vpop.f32.mrb[65].mxu0  ;;  %v12236_v5 = vrot.slane %v4154_v18, %v11504_v32  ;;  %v4155_v17 = vmax.f32 %v3993_v41, 0.0  ;;  %v4890_v46 = vcombine.low %v13695_v47, %v4889_v2 }
 0x18c   : > { %13692 = vst [vmem:[#allocation20_spill] sm:$0xff] %v12222_v62  ;;  %10003 = vmatprep.mubr.bf16.mxu1 %v12222_v62  ;;  %v5307_v51 = vsel %vm3696_vm1, %v4873_v53, 0.0  ;;  %v12243_v31 = vpop.f32.mrb[66].mxu0  ;;  %v4916_v45 = vcombine.low %v4152_v36, %v4153_v12  ;;  %v3283_v0 = vcombine.high %v3281_v57, %v3281_v57  ;;  %v3995_v20 = vadd.f32 %v11510_v35, %v3282_v42 }
 0x18d   : > { %v3996_v48 = vadd.f32 %v11524_v43, %v3281_v57  ;;  %v9858_v63 = vpop.f32.mrb[67].mxu0  ;;  %v4156_v62 = vmax.f32 %v3994_v55, 0.0  ;;  %v12247_v18 = vpack.c.bf16 %v4890_v46, %v4873_v53  ;;  %v3284_v41 = vcombine.high %v12069_v27, %v12069_v27 }
 0x18e   : > { %v3291_v11 = vrot.slane %v12069_v27, %v11504_v32  ;;  %v4930_v2 = vrot.slane %v4916_v45, %v11504_v32  ;;  %v3997_v47 = vadd.f32 %v11507_v16, %v3283_v0  ;;  %v4157_v12 = vmax.f32 %v3995_v20, 0.0 }
 0x18f   : > { %13696 = vst [vmem:[#allocation21_spill] sm:$0xff] %v12247_v18  ;;  %v4158_v36 = vmax.f32 %v3996_v48, 0.0  ;;  %v12255_v60 = vcombine.low %v4155_v17, %v4156_v62  ;;  %9908 = vmatmul.mubr.msk.bf16.gmra.mrb[100].mxu0 %vm11573_vm3, %v12247_v18  ;;  %v3298_v42 = vrot.slane %v3284_v41, %v11504_v32  ;;  %v3301_v45 = vcombine.high %v12089_v23, %v12089_v23 }
 0x190   : > { %v3299_v53 = vcombine.high %v3291_v11, %v3291_v11  ;;  %v3998_v57 = vadd.f32 %v11515_v39, %v3291_v11  ;;  %v4159_v27 = vmax.f32 %v3997_v47, 0.0  ;;  %v3308_v0 = vrot.slane %v12089_v23, %v11504_v32 }
 0x191   : > { %v12262_v55 = vcombine.low %v4157_v12, %v4158_v36  ;;  %v3300_v17 = vcombine.high %v3298_v42, %v3298_v42  ;;  %v4000_v48 = vadd.f32 %v11524_v43, %v3298_v42  ;;  %v3315_v47 = vrot.slane %v3301_v45, %v11504_v32 }
 0x192   : > { %v3999_v20 = vadd.f32 %v11510_v35, %v3299_v53  ;;  %v12272_v63 = vpop.f32.mrb[68].mxu0  ;;  %v4160_v11 = vmax.f32 %v3998_v57, 0.0  ;;  %v3316_v12 = vcombine.high %v3308_v0, %v3308_v0  ;;  %v4002_v62 = vadd.f32 %v11507_v16, %v3308_v0 }
 0x193   : > { %v9861_v36 = vpop.f32.mrb[69].mxu0  ;;  %v4001_v23 = vadd.f32 %v11507_v16, %v3300_v17  ;;  %v4162_v50 = vmax.f32 %v4000_v48, 0.0  ;;  %v3317_v42 = vcombine.high %v3315_v47, %v3315_v47  ;;  %v4004_v41 = vadd.f32 %v11510_v35, %v3315_v47 }
 0x194   : > { %v4161_v18 = vmax.f32 %v3999_v20, 0.0  ;;  %v12279_v9 = vpop.f32.mrb[70].mxu0  ;;  %v12281_v53 = vcombine.low %v4159_v27, %v4160_v11  ;;  %v4003_v26 = vadd.f32 %v11515_v39, %v3316_v12  ;;  %v4164_v36 = vmax.f32 %v4002_v62, 0.0 }
 0x195   : > { %v9862_v57 = vpop.f32.mrb[71].mxu0  ;;  %v4163_v22 = vmax.f32 %v4001_v23, 0.0  ;;  %v5309_v17 = vsel %vm3701_vm4, %v12171_v38, 0.0  ;;  %v4005_v27 = vadd.f32 %v11524_v43, %v3317_v42  ;;  %v4166_v48 = vmax.f32 %v4004_v41, 0.0 }
 0x196   : > { %v12285_v45 = vcombine.low %v4161_v18, %v4162_v50  ;;  %v4165_v20 = vmax.f32 %v4003_v26, 0.0  ;;  %v12298_v50 = vpack.c.bf16 %v4890_v46, %v5307_v51  ;;  %v12300_v18 = vpack.c.bf16 %v5309_v17, %v5309_v17 }
 0x197   : > { %v12296_v47 = vrot.slane %v4163_v22, %v11504_v32  ;;  %v4167_v62 = vmax.f32 %v4005_v27, 0.0  ;;  %v3318_v38 = vcombine.high %v12126_v7, %v12126_v7  ;;  %v3325_v26 = vrot.slane %v12126_v7, %v11504_v32 }
 0x198   : > { %13697 = vst [vmem:[#allocation22_spill] sm:$0xff] %v12300_v18  ;;  %v12302_v12 = vcombine.low %v4164_v36, %v4165_v20  ;;  %v6160_v41 = vrot.slane %v12298_v50, 1  ;;  %v6161_v23 = vrot.slane %v12300_v18, 1  ;;  %v13698_v22 = vrot.slane %v12187_v19, %v11504_v32 }
 0x199   : > { %v13699_v46 = vrot.slane %v12173_v61, %v11504_v32  ;;  %v13700_v42 = vrot.slane %v12189_v54, %v11504_v32  ;;  %v12321_v17 = vcombine.low %v4166_v48, %v4167_v62  ;;  %v3332_v27 = vrot.slane %v3318_v38, %v11504_v32 }
 0x19a   : > { %v12319_v36 = vpop.f32.mrb[72].mxu0  ;;  %v3333_v20 = vcombine.high %v3325_v26, %v3325_v26  ;;  %v12327_v19 = vsel %vm6132_vm5, %v6160_v41, %v6161_v23  ;;  %v4006_v61 = vadd.f32 %v11507_v16, %v3325_v26  ;;  %v3335_v26 = vcombine.high %v12142_v49, %v12142_v49 }
 0x19b   : > { %v4914_v51 = vcombine.low %v13699_v46, %v13698_v22  ;;  %v4931_v57 = vcombine.low %v13700_v42, %v4930_v2  ;;  %v9865_v0 = vpop.f32.mrb[73].mxu0  ;;  %13701 = vst [vmem:[#allocation23_spill] sm:$0xff] %v12327_v19  ;;  %10004 = vmatmul.mubr.bf16.gmra.mrb[16].mxu1 %v12327_v19  ;;  %v3334_v62 = vcombine.high %v3332_v27, %v3332_v27 }
 0x19c   : > { %v12334_v22 = vpop.f32.mrb[74].mxu0  ;;  %v4007_v0 = vadd.f32 %v11515_v39, %v3333_v20  ;;  %v4008_v38 = vadd.f32 %v11510_v35, %v3332_v27  ;;  %v4168_v23 = vmax.f32 %v4006_v61, 0.0  ;;  %v3342_v46 = vrot.slane %v12142_v49, %v11504_v32 }
 0x19d   : > { %v5310_v54 = vsel %vm3696_vm1, %v4914_v51, 0.0  ;;  %v12332_v2 = vpack.c.bf16 %v4931_v57, %v4914_v51  ;;  %v9866_v41 = vpop.f32.mrb[75].mxu0  ;;  %v5312_v51 = vsel %vm3701_vm4, %v12236_v5, 0.0  ;;  %v4009_v42 = vadd.f32 %v11524_v43, %v3334_v62 }
 0x19e   : > { %v4169_v20 = vmax.f32 %v4007_v0, 0.0  ;;  %v4170_v27 = vmax.f32 %v4008_v38, 0.0  ;;  %v12352_v41 = vpack.c.bf16 %v4931_v57, %v5310_v54  ;;  %v3349_v61 = vrot.slane %v3335_v26, %v11504_v32 }
 0x19f   : > { %13702 = vst [vmem:[#allocation24_spill] sm:$0xff] %v12332_v2  ;;  %9911 = vmatprep.mubr.msk.bf16.mxu0 %vm11573_vm3, %v12332_v2  ;;  %v3350_v7 = vcombine.high %v3342_v46, %v3342_v46  ;;  %v4010_v48 = vadd.f32 %v11507_v16, %v3342_v46  ;;  %v12356_v11 = vpack.c.bf16 %v5312_v51, %v5312_v51  ;;  %v4171_v19 = vmax.f32 %v4009_v42, 0.0 }
 0x1a0   : > { %13703 = vst [vmem:[#allocation25_spill] sm:$0xff] %v12352_v41  ;;  %v12358_v2 = vcombine.low %v4168_v23, %v4169_v20  ;;  %v6163_v49 = vrot.slane %v12352_v41, 1  ;;  %v3352_v5 = vcombine.high %v12167_v59, %v12167_v59  ;;  %v3351_v62 = vcombine.high %v3349_v61, %v3349_v61 }
 0x1a1   : > { %13704 = vst [vmem:[#allocation26_spill] sm:$0xff] %v12356_v11  ;;  %v4011_v0 = vadd.f32 %v11507_v16, %v3350_v7  ;;  %v4012_v57 = vadd.f32 %v11515_v39, %v3349_v61  ;;  %v4172_v54 = vmax.f32 %v4010_v48, 0.0  ;;  %v12367_v26 = vcombine.low %v4170_v27, %v4171_v19 }
 0x1a2   : > { %v12365_v38 = vpop.f32.mrb[76].mxu0  ;;  %v6164_v23 = vrot.slane %v12356_v11, 1  ;;  %v3359_v51 = vrot.slane %v12167_v59, %v11504_v32  ;;  %v4013_v20 = vadd.f32 %v11510_v35, %v3351_v62  ;;  %v3366_v46 = vrot.slane %v3352_v5, %v11504_v32 }
 0x1a3   : > { %13705 = vst [vmem:[#allocation27_spill] sm:$0xff] %v12365_v38  ;;  %v9869_v42 = vpop.f32.mrb[77].mxu0  ;;  %v4173_v18 = vmax.f32 %v4011_v0, 0.0  ;;  %v4174_v7 = vmax.f32 %v4012_v57, 0.0  ;;  %v5020_v61 = vrot.slane %v4172_v54, %v11504_v32  ;;  %v13707_v5 = vrot.slane %v12262_v55, %v11504_v32 }
 0x1a4   : > { %v2790_v48 = vpop.f32.mrb[78].mxu0  ;;  %v12379_v27 = vsel %vm6132_vm5, %v6163_v49, %v6164_v23  ;;  %v3367_v38 = vcombine.high %v3359_v51, %v3359_v51  ;;  %v4014_v62 = vadd.f32 %v11524_v43, %v3359_v51  ;;  %v4175_v0 = vmax.f32 %v4013_v20, 0.0 }
 0x1a5   : > { %13706 = vst [vmem:[#allocation28_spill] sm:$0xff] %v12379_v27  ;;  %v9870_v11 = vpop.f32.mrb[79].mxu0  ;;  %v12382_v41 = vcombine.low %v4173_v18, %v4174_v7  ;;  %v12386_v59 = vsel %vm3701_vm4, %v5020_v61, 0.0  ;;  %10007 = vmatprep.mubr.bf16.mxu1 %v12379_v27  ;;  %v3368_v57 = vcombine.high %v3366_v46, %v3366_v46  ;;  %v4016_v49 = vadd.f32 %v11515_v39, %v3366_v46 }
 0x1a6   : > { %v4015_v54 = vadd.f32 %v11507_v16, %v3367_v38  ;;  %v13708_v11 = vrot.slane %v12255_v60, %v11504_v32  ;;  %v4176_v42 = vmax.f32 %v4014_v62, 0.0  ;;  %v13709_v51 = vrot.slane %v12285_v45, %v11504_v32 }
 0x1a7   : > { %v13710_v20 = vrot.slane %v12281_v53, %v11504_v32  ;;  %v3369_v46 = vcombine.high %v12185_v14, %v12185_v14  ;;  %v4017_v55 = vadd.f32 %v11510_v35, %v3368_v57  ;;  %v4178_v61 = vmax.f32 %v4016_v49, 0.0 }
 0x1a8   : > { %v4955_v18 = vcombine.low %v13708_v11, %v13707_v5  ;;  %v4177_v7 = vmax.f32 %v4015_v54, 0.0  ;;  %v12411_v48 = vcombine.low %v4175_v0, %v4176_v42  ;;  %v3376_v45 = vrot.slane %v12185_v14, %v11504_v32 }
 0x1a9   : > { %v4972_v38 = vcombine.low %v13710_v20, %v13709_v51  ;;  %v3383_v53 = vrot.slane %v3369_v46, %v11504_v32  ;;  %v4179_v51 = vmax.f32 %v4017_v55, 0.0  ;;  %v5315_v57 = vsel %vm3701_vm4, %v12296_v47, 0.0 }
 0x1aa   : > { %v5313_v60 = vsel %vm3696_vm1, %v4955_v18, 0.0  ;;  %v2795_v5 = vpop.f32.mrb[80].mxu0  ;;  %v12418_v11 = vcombine.low %v4177_v7, %v4178_v61  ;;  %v3384_v14 = vcombine.high %v3376_v45, %v3376_v45  ;;  %v4018_v42 = vadd.f32 %v11524_v43, %v3376_v45 }
 0x1ab   : > { %v12413_v62 = vpack.c.bf16 %v4972_v38, %v4955_v18  ;;  %v12423_v54 = vpack.c.bf16 %v4972_v38, %v5313_v60  ;;  %v9873_v49 = vpop.f32.mrb[81].mxu0  ;;  %v3385_v18 = vcombine.high %v3383_v53, %v3383_v53  ;;  %v4020_v47 = vadd.f32 %v11507_v16, %v3383_v53 }
 0x1ac   : > { %v2798_v20 = vpop.f32.mrb[82].mxu0  ;;  %v12434_v38 = vpack.c.bf16 %v5315_v57, %v5315_v57  ;;  %v4019_v61 = vadd.f32 %v11507_v16, %v3384_v14  ;;  %v4180_v5 = vmax.f32 %v4018_v42, 0.0  ;;  %v3386_v49 = vcombine.high %v12230_v52, %v12230_v52 }
 0x1ad   : > { %13711 = vst [vmem:[#allocation29_spill] sm:$0xff] %v12413_v62  ;;  %9912 = vmatmul.mubr.msk.bf16.gmra.mrb[104].mxu0 %vm11573_vm3, %v12413_v62  ;;  %v6166_v55 = vrot.slane %v12423_v54, 1  ;;  %v9874_v7 = vpop.f32.mrb[83].mxu0  ;;  %v4021_v60 = vadd.f32 %v11515_v39, %v3385_v18  ;;  %v4182_v45 = vmax.f32 %v4020_v47, 0.0  ;;  %v3393_v46 = vrot.slane %v12230_v52, %v11504_v32 }
 0x1ae   : > { %v6167_v20 = vrot.slane %v12434_v38, 1  ;;  %v3403_v53 = vcombine.high %v12243_v31, %v12243_v31  ;;  %v4181_v57 = vmax.f32 %v4019_v61, 0.0  ;;  %v12446_v7 = vcombine.low %v4179_v51, %v4180_v5 }
 0x1af   : > { %v4183_v23 = vmax.f32 %v4021_v60, 0.0  ;;  %v3400_v14 = vrot.slane %v3386_v49, %v11504_v32  ;;  %v3401_v42 = vcombine.high %v3393_v46, %v3393_v46  ;;  %v4022_v47 = vadd.f32 %v11510_v35, %v3393_v46 }
 0x1b0   : > { %v12450_v18 = vsel %vm6132_vm5, %v6166_v55, %v6167_v20  ;;  %v3410_v0 = vrot.slane %v12243_v31, %v11504_v32  ;;  %v12458_v19 = vrot.slane %v4181_v57, %v11504_v32  ;;  %v3417_v46 = vrot.slane %v3403_v53, %v11504_v32 }
 0x1b1   : > { %13712 = vst [vmem:[#allocation30_spill] sm:$0xff] %v12450_v18  ;;  %v12460_v61 = vcombine.low %v4182_v45, %v4183_v23  ;;  %10008 = vmatmul.mubr.bf16.gmra.mrb[20].mxu1 %v12450_v18  ;;  %v3402_v51 = vcombine.high %v3400_v14, %v3400_v14  ;;  %v4023_v55 = vadd.f32 %v11524_v43, %v3401_v42  ;;  %v4184_v5 = vmax.f32 %v4022_v47, 0.0 }
 0x1b2   : > { %v4024_v60 = vadd.f32 %v11507_v16, %v3400_v14  ;;  %v3418_v20 = vcombine.high %v3410_v0, %v3410_v0  ;;  %v4026_v57 = vadd.f32 %v11510_v35, %v3410_v0  ;;  %v3419_v52 = vcombine.high %v3417_v46, %v3417_v46 }
 0x1b3   : > { %v4025_v49 = vadd.f32 %v11515_v39, %v3402_v51  ;;  %v4185_v23 = vmax.f32 %v4023_v55, 0.0  ;;  %v4028_v18 = vadd.f32 %v11507_v16, %v3417_v46  ;;  %v13713_v53 = vrot.slane %v12321_v17, %v11504_v32 }
 0x1b4   : > { %v4186_v45 = vmax.f32 %v4024_v60, 0.0  ;;  %v4027_v42 = vadd.f32 %v11524_v43, %v3418_v20  ;;  %v4188_v14 = vmax.f32 %v4026_v57, 0.0  ;;  %v13714_v47 = vrot.slane %v12302_v12, %v11504_v32 }
 0x1b5   : > { %v4187_v27 = vmax.f32 %v4025_v49, 0.0  ;;  %v5063_v51 = vcombine.low %v4184_v5, %v4185_v23  ;;  %v4029_v62 = vadd.f32 %v11507_v16, %v3419_v52  ;;  %v4190_v0 = vmax.f32 %v4028_v18, 0.0 }
 0x1b6   : > { %v4996_v31 = vcombine.low %v13714_v47, %v13713_v53  ;;  %v13715_v55 = vrot.slane %v12367_v26, %v11504_v32  ;;  %v13716_v60 = vrot.slane %v12358_v2, %v11504_v32  ;;  %v4189_v20 = vmax.f32 %v4027_v42, 0.0 }
 0x1b7   : > { %v12485_v49 = vcombine.low %v4186_v45, %v4187_v27  ;;  %v12491_v12 = vpack.c.bf16 %v12386_v59, %v12386_v59  ;;  %v5077_v52 = vrot.slane %v5063_v51, %v11504_v32  ;;  %v5102_v18 = vrot.slane %v4190_v0, %v11504_v32 }
 0x1b8   : > { %v5013_v46 = vcombine.low %v13716_v60, %v13715_v55  ;;  %v5316_v17 = vsel %vm3696_vm1, %v4996_v31, 0.0  ;;  %v5080_v27 = vcombine.low %v4188_v14, %v4189_v20  ;;  %v3420_v23 = vcombine.high %v12272_v63, %v12272_v63 }
 0x1b9   : > { %13717 = vst [vmem:[#allocation31_spill] sm:$0xff] %v12491_v12  ;;  %v5087_v2 = vrot.slane %v12485_v49, %v11504_v32  ;;  %v6170_v57 = vrot.slane %v12491_v12, 1  ;;  %v4191_v45 = vmax.f32 %v4029_v62, 0.0  ;;  %v3437_v42 = vcombine.high %v12279_v9, %v12279_v9 }
 0x1ba   : > { %v12495_v5 = vpack.c.bf16 %v5013_v46, %v4996_v31  ;;  %v12497_v26 = vpack.c.bf16 %v5013_v46, %v5316_v17  ;;  %v3427_v31 = vrot.slane %v12272_v63, %v11504_v32  ;;  %v5094_v14 = vrot.slane %v5080_v27, %v11504_v32 }
 0x1bb   : > { %v3434_v53 = vrot.slane %v3420_v23, %v11504_v32  ;;  %v3444_v47 = vrot.slane %v12279_v9, %v11504_v32  ;;  %v13719_v51 = vrot.slane %v12411_v48, %v11504_v32  ;;  %v13720_v0 = vrot.slane %v12382_v41, %v11504_v32 }
 0x1bc   : > { %13718 = vst [vmem:[#allocation32_spill] sm:$0xff] %v12495_v5  ;;  %9915 = vmatprep.mubr.msk.bf16.mxu0 %vm11573_vm3, %v12495_v5  ;;  %v6169_v59 = vrot.slane %v12497_v26, 1  ;;  %v3435_v62 = vcombine.high %v3427_v31, %v3427_v31  ;;  %v4030_v60 = vadd.f32 %v11515_v39, %v3427_v31  ;;  %v3451_v46 = vrot.slane %v3437_v42, %v11504_v32 }
 0x1bd   : > { %v5037_v55 = vcombine.low %v13720_v0, %v13719_v51  ;;  %v3436_v49 = vcombine.high %v3434_v53, %v3434_v53  ;;  %v4032_v9 = vadd.f32 %v11524_v43, %v3434_v53  ;;  %v3452_v20 = vcombine.high %v3444_v47, %v3444_v47 }
 0x1be   : > { %v12523_v63 = vsel %vm6132_vm5, %v6169_v59, %v6170_v57  ;;  %v4034_v48 = vadd.f32 %v11515_v39, %v3444_v47  ;;  %v4031_v17 = vadd.f32 %v11510_v35, %v3435_v62  ;;  %v4192_v41 = vmax.f32 %v4030_v60, 0.0 }
 0x1bf   : > { %13721 = vst [vmem:[#allocation33_spill] sm:$0xff] %v12523_v63  ;;  %10011 = vmatprep.mubr.bf16.mxu1 %v12523_v63  ;;  %v3453_v27 = vcombine.high %v3451_v46, %v3451_v46  ;;  %v4036_v57 = vadd.f32 %v11524_v43, %v3451_v46  ;;  %v4033_v23 = vadd.f32 %v11507_v16, %v3436_v49  ;;  %v4194_v59 = vmax.f32 %v4032_v9, 0.0 }
 0x1c0   : > { %v4035_v31 = vadd.f32 %v11510_v35, %v3452_v20  ;;  %v4196_v42 = vmax.f32 %v4034_v48, 0.0  ;;  %v4193_v51 = vmax.f32 %v4031_v17, 0.0  ;;  %v5103_v0 = vcombine.low %v4191_v45, %v4192_v41 }
 0x1c1   : > { %v4037_v63 = vadd.f32 %v11507_v16, %v3453_v27  ;;  %v4198_v53 = vmax.f32 %v4036_v57, 0.0  ;;  %v4195_v5 = vmax.f32 %v4033_v23, 0.0  ;;  %v13722_v47 = vrot.slane %v12446_v7, %v11504_v32 }
 0x1c2   : > { %v4197_v12 = vmax.f32 %v4035_v31, 0.0  ;;  %v13723_v62 = vrot.slane %v12418_v11, %v11504_v32  ;;  %v5319_v46 = vsel %vm3696_vm1, %v5037_v55, 0.0  ;;  %v5104_v49 = vcombine.low %v4193_v51, %v4194_v59 }
 0x1c3   : > { %v5111_v9 = vrot.slane %v5103_v0, %v11504_v32  ;;  %v4199_v20 = vmax.f32 %v4037_v63, 0.0  ;;  %v5321_v45 = vsel %vm3701_vm4, %v12458_v19, 0.0  ;;  %v5120_v48 = vcombine.low %v4195_v5, %v4196_v42 }
 0x1c4   : > { %v5054_v60 = vcombine.low %v13723_v62, %v13722_v47  ;;  %v5121_v17 = vcombine.low %v4197_v12, %v4198_v53  ;;  %v5118_v11 = vrot.slane %v5104_v49, %v11504_v32  ;;  %v12553_v57 = vpack.c.bf16 %v5321_v45, %v5321_v45 }
 0x1c5   : > { %v5143_v27 = vrot.slane %v4199_v20, %v11504_v32  ;;  %v13724_v23 = vrot.slane %v12460_v61, %v11504_v32  ;;  %v5128_v59 = vrot.slane %v5120_v48, %v11504_v32  ;;  %v5095_v5 = vcombine.low %v5087_v2, %v5094_v14 }
 0x1c6   : > { %v12547_v41 = vpack.c.bf16 %v5054_v60, %v5037_v55  ;;  %v12549_v7 = vpack.c.bf16 %v5054_v60, %v5319_v46  ;;  %v5135_v19 = vrot.slane %v5121_v17, %v11504_v32  ;;  %v6173_v55 = vrot.slane %v12553_v57, 1 }
 0x1c7   : > { %v5078_v63 = vcombine.low %v13724_v23, %v5077_v52  ;;  %v5324_v61 = vsel %vm3701_vm4, %v5102_v18, 0.0  ;;  %v5119_v52 = vcombine.low %v5111_v9, %v5118_v11  ;;  %v5327_v14 = vsel %vm3701_vm4, %v5143_v27, 0.0 }
 0x1c8   : > { %9916 = vmatmul.mubr.msk.bf16.gmra.mrb[108].mxu0 %vm11573_vm3, %v12547_v41  ;;  %v6172_v12 = vrot.slane %v12549_v7, 1  ;;  %v12573_v0 = vpack.c.bf16 %v5324_v61, %v5324_v61  ;;  %v5136_v53 = vcombine.low %v5128_v59, %v5135_v19  ;;  %v12592_v49 = vpack.c.bf16 %v5327_v14, %v5327_v14 }
 0x1c9   : > { %v5322_v31 = vsel %vm3696_vm1, %v5078_v63, 0.0  ;;  %v12569_v42 = vpack.c.bf16 %v5095_v5, %v5078_v63  ;;  %v5325_v2 = vsel %vm3696_vm1, %v5119_v52, 0.0  ;;  %v10996_v9 = vmov 0  }
 0x1ca   : > { %v12571_v51 = vpack.c.bf16 %v5095_v5, %v5322_v31  ;;  %v12576_v47 = vsel %vm6132_vm5, %v6172_v12, %v6173_v55  ;;  %v6176_v62 = vrot.slane %v12573_v0, 1  ;;  %v12588_v60 = vpack.c.bf16 %v5136_v53, %v5119_v52 }
 0x1cb   : > { %10012 = vmatmul.mubr.bf16.gmra.mrb[24].mxu1 %v12576_v47  ;;  %9919 = vmatprep.mubr.msk.bf16.mxu0 %vm11573_vm3, %v12569_v42  ;;  %v12590_v46 = vpack.c.bf16 %v5136_v53, %v5325_v2  ;;  %v12594_v20 = vrot.slane %v10996_v9, 1  ;;  %v5650_v45 = vshll.u32 %v11642_v40, 16  ;;  %v5655_v11 = vshll.u32 %v11644_v44, 16 }
 0x1cc   : > { %v6175_v18 = vrot.slane %v12571_v51, 1  ;;  %v6179_v27 = vrot.slane %v12592_v49, 1  ;;  %v5662_v63 = vshll.u32 %v11703_v1, 16  ;;  %v5648_v59 = vshrl.u32 %v11642_v40, 16 }
 0x1cd   : > { %13725 = vst [vmem:[#allocation34_spill] sm:$0xff] %v12594_v20  ;;  %v6178_v17 = vrot.slane %v12590_v46, 1  ;;  %v5652_v23 = vrot.slane %v5650_v45, 1  ;;  %v5674_v19 = vshll.u32 %v11788_v56, 16  ;;  %v5660_v44 = vshrl.u32 %v11703_v1, 16 }
 0x1ce   : > { %v12598_v48 = vsel %vm6132_vm5, %v6175_v18, %v6176_v62  ;;  %v5664_v5 = vrot.slane %v5662_v63, 1  ;;  %v5667_v55 = vshll.u32 %v11705_v21, 16  ;;  %v5672_v31 = vshrl.u32 %v11788_v56, 16 }
 0x1cf   : > { %10015 = vmatprep.mubr.bf16.mxu1 %v12598_v48  ;;  %v12611_v12 = vsel %vm6132_vm5, %v6178_v17, %v6179_v27  ;;  %v5676_v61 = vrot.slane %v5674_v19, 1  ;;  %v5679_v52 = vshll.u32 %v11802_v33, 16  ;;  %v5686_v53 = vshll.u32 %v11892_v6, 16 }
 0x1d0   : > { %9920 = vmatmul.mubr.msk.bf16.gmra.mrb[112].mxu0 %vm11573_vm3, %v12588_v60  ;;  %v5653_v40 = vor.u32 %v5652_v23, %v5648_v59  ;;  %v5657_v2 = vrot.slane %v5655_v11, 1  ;;  %v5684_v14 = vshrl.u32 %v11892_v6, 16  ;;  %v5698_v18 = vshll.u32 %v11973_v30, 16  ;;  %v12632_v23 = vld [vmem:[%s13604_s3 + $0x208] sm:$0xff]  }
 0x1d1   : > { %9939 = vmatprep.mubr.bf16.mxu0 %v12594_v20  ;;  %v5665_v62 = vor.u32 %v5664_v5, %v5660_v44  ;;  %v5677_v1 = vor.u32 %v5676_v61, %v5672_v31  ;;  %v5688_v9 = vrot.slane %v5686_v53, 1  ;;  %v5691_v21 = vshll.u32 %v11896_v58, 16 }
 0x1d2   : > { %v5696_v56 = vshrl.u32 %v11973_v30, 16  ;;  %v5700_v33 = vrot.slane %v5698_v18, 1  ;;  %v5703_v45 = vshll.u32 %v11975_v28, 16  ;;  %v5710_v6 = vshll.u32 %v12035_v25, 16 }
 0x1d3   : > { %10016 = vmatmul.mubr.bf16.gmra.mrb[28].mxu1 %v12611_v12  ;;  %v5669_v17 = vrot.slane %v5667_v55, 1  ;;  %v5681_v11 = vrot.slane %v5679_v52, 1  ;;  %v5689_v27 = vor.u32 %v5688_v9, %v5684_v14  ;;  %v12635_v58 = vsel %vm5634_vm6, %v5653_v40, %v5657_v2  ;;  %v10765_v52 = vld [vmem:[%s13604_s3 + $0x108] sm:$0xff]  }
 0x1d4   : > { %10035 = vmatprep.mubr.msk.bf16.mxu1 %vm11573_vm3, %v11579_v4  ;;  %v5701_v63 = vor.u32 %v5700_v33, %v5696_v56  ;;  %v5715_v4 = vshll.u32 %v12037_v15, 16  ;;  %v5722_v30 = vshll.u32 %v12118_v37, 16  ;;  %v5693_v19 = vrot.slane %v5691_v21, 1  ;;  %v13726_v21 = vld [vmem:[#allocation8_spill] sm:$0xff] }
 0x1d5   : > { %v12641_v28 = vsel %vm5634_vm6, %v5665_v62, %v5669_v17  ;;  %v12644_v59 = vsel %vm5634_vm6, %v5677_v1, %v5681_v11  ;;  %v5708_v44 = vshrl.u32 %v12035_v25, 16  ;;  %v5705_v5 = vrot.slane %v5703_v45, 1  ;;  %v10766_v17 = vld [vmem:[%s13604_s3 + $0x110] sm:$0xff]   ;;  %v13727_v11 = vld [vmem:[#allocation18_spill] sm:$0xff] }
 0x1d6   : > { %v5712_v55 = vrot.slane %v5710_v6, 1  ;;  %v5724_v31 = vrot.slane %v5722_v30, 1  ;;  %v5734_v15 = vshll.u32 %v12202_v34, 16  ;;  %v12651_v61 = vsel %vm5634_vm6, %v5689_v27, %v5693_v19 }
 0x1d7   : > { %v5720_v53 = vshrl.u32 %v12118_v37, 16  ;;  %v3454_v25 = vcombine.high %v12319_v36, %v12319_v36  ;;  %v3461_v40 = vrot.slane %v12319_v36, %v11504_v32  ;;  %v12663_v2 = vsel %vm5634_vm6, %v5701_v63, %v5705_v5  ;;  %v12671_v37 = vld [vmem:[%s13604_s3 + $0x210] sm:$0xff]   ;;  %v12700_v5 = vld [vmem:[%s13604_s3 + $0x218] sm:$0xff]  }
 0x1d8   : > { %9940 = vmatmul.mubr.bf16.vlgmr.msra.gmra.mrb[84].mxu0 %v12635_v58  ;;  %v5727_v14 = vshll.u32 %v12122_v29, 16  ;;  %v3471_v18 = vcombine.high %v12334_v22, %v12334_v22  ;;  %v5736_v36 = vrot.slane %v5734_v15, 1  ;;  %v10812_v29 = vld [vmem:[%s13604_s3 + $0x100] sm:$0xff]   ;;  %v5713_v56 = vor.u32 %v5712_v55, %v5708_v44 }
 0x1d9   : > { %9943 = vmatprep.mubr.bf16.mxu0 %v12641_v28  ;;  %10260 = vmatpush3.bf16.msra.mxu0 %v12098_v24  ;;  %v5717_v24 = vrot.slane %v5715_v4, 1  ;;  %v3468_v62 = vrot.slane %v3454_v25, %v11504_v32  ;;  %v3469_v1 = vcombine.high %v3461_v40, %v3461_v40  ;;  %v4038_v9 = vadd.f32 %v11507_v16, %v3461_v40 }
 0x1da   : > { %10261 = vmatprep.subr.bf16.mxu0 %v12632_v23  ;;  %v5725_v33 = vor.u32 %v5724_v31, %v5720_v53  ;;  %v5732_v45 = vshrl.u32 %v12202_v34, 16  ;;  %v3478_v6 = vrot.slane %v12334_v22, %v11504_v32  ;;  %v5739_v27 = vshll.u32 %v13727_v11, 16 }
 0x1db   : > { %10036 = vmatmul.mubr.msk.bf16.vlgmr.msra.gmra.mrb[0].mxu1 %vm11573_vm3, %v11688_v13  ;;  %v3470_v63 = vcombine.high %v3468_v62, %v3468_v62  ;;  %v4039_v4 = vadd.f32 %v11515_v39, %v3469_v1  ;;  %v4040_v30 = vadd.f32 %v11510_v35, %v3468_v62  ;;  %v4200_v19 = vmax.f32 %v4038_v9, 0.0 }
 0x1dc   : > { %10068 = vmatpush3.bf16.msra.mxu1 %v10812_v29  ;;  %10039 = vmatprep.mubr.msk.bf16.mxu1 %vm11573_vm3, %v13726_v21  ;;  %v3485_v34 = vrot.slane %v3471_v18, %v11504_v32  ;;  %v3486_v44 = vcombine.high %v3478_v6, %v3478_v6  ;;  %v4042_v22 = vadd.f32 %v11507_v16, %v3478_v6  ;;  %v5729_v1 = vrot.slane %v5727_v14, 1  ;;  %v13728_v14 = vld [vmem:[#allocation10_spill] sm:$0xff] }
 0x1dd   : > { %10069 = vmatprep.subr.bf16.mxu1 %v10765_v52  ;;  %10262 = vmatpush3.bf16.msra.mxu0 %v12632_v23  ;;  %v5737_v55 = vor.u32 %v5736_v36, %v5732_v45  ;;  %v4041_v31 = vadd.f32 %v11524_v43, %v3470_v63  ;;  %v4201_v15 = vmax.f32 %v4039_v4, 0.0  ;;  %v4202_v53 = vmax.f32 %v4040_v30, 0.0  ;;  %v10767_v36 = vld [vmem:[%s13604_s3 + $0x118] sm:$0xff]  }
 0x1de   : > { %10263 = vmatprep.subr.bf16.mxu0 %v12671_v37  ;;  %v3487_v25 = vcombine.high %v3485_v34, %v3485_v34  ;;  %v4043_v40 = vadd.f32 %v11515_v39, %v3486_v44  ;;  %v4044_v18 = vadd.f32 %v11510_v35, %v3485_v34  ;;  %v4204_v62 = vmax.f32 %v4042_v22, 0.0  ;;  %v12719_v35 = vld [vmem:[%s13604_s3 + $0x220] sm:$0xff]   ;;  %v13729_v30 = vld [vmem:[#allocation12_spill] sm:$0xff]  ;;  %v13731_v22 = vld [vmem:[#allocation22_spill] sm:$0xff] }
 0x1df   : > { %v5741_v9 = vrot.slane %v5739_v27, 1  ;;  %v4203_v29 = vmax.f32 %v4041_v31, 0.0  ;;  %v5746_v45 = vshll.u32 %v12298_v50, 16  ;;  %v12712_v6 = vcombine.low %v4200_v19, %v4201_v15 }
 0x1e0   : > { %9944 = vmatmul.mubr.bf16.gmra.mrb[88].mxu0 %v12644_v59  ;;  %10070 = vmatpush3.bf16.msra.mxu1 %v10765_v52  ;;  %v4045_v52 = vadd.f32 %v11524_v43, %v3487_v25  ;;  %v4205_v39 = vmax.f32 %v4043_v40, 0.0  ;;  %v4206_v11 = vmax.f32 %v4044_v18, 0.0  ;;  %v12725_v27 = vsel %vm5634_vm6, %v5713_v56, %v5717_v24  ;;  %v13730_v24 = vld [vmem:[#allocation25_spill] sm:$0xff]  ;;  %v13732_v18 = vld [vmem:[#allocation26_spill] sm:$0xff] }
 0x1e1   : > { %9947 = vmatprep.mubr.bf16.mxu0 %v12651_v61  ;;  %10071 = vmatprep.subr.bf16.mxu1 %v10766_v17  ;;  %v12728_v63 = vsel %vm5634_vm6, %v5725_v33, %v5729_v1  ;;  %v12730_v43 = vcombine.low %v4202_v53, %v4203_v29  ;;  %v12737_v19 = vsel %vm5634_vm6, %v5737_v55, %v5741_v9  ;;  %v5758_v56 = vshll.u32 %v13730_v24, 16  ;;  %v10769_v53 = vld [vmem:[%s13604_s3 + $0x120] sm:$0xff]   ;;  %v12762_v1 = vld [vmem:[%s13604_s3 + $0x228] sm:$0xff]  }
 0x1e2   : > { %10264 = vmatpush3.bf16.msra.mxu0 %v12671_v37  ;;  %v4207_v34 = vmax.f32 %v4045_v52, 0.0  ;;  %v12739_v44 = vcombine.low %v4204_v62, %v4205_v39  ;;  %v12742_v33 = vrot.slane %v5746_v45, 1  ;;  %v5152_v55 = vrot.slane %v12712_v6, %v11504_v32  ;;  %v13733_v6 = vld [vmem:[#allocation27_spill] sm:$0xff] }
 0x1e3   : > { %10265 = vmatprep.subr.bf16.mxu0 %v12700_v5  ;;  %10040 = vmatmul.mubr.msk.bf16.gmra.mrb[4].mxu1 %vm11573_vm3, %v13728_v14  ;;  %v5159_v25 = vrot.slane %v12730_v43, %v11504_v32  ;;  %v5768_v9 = vshrl.u32 %v12423_v54, 16  ;;  %v5775_v45 = vshll.u32 %v12434_v38, 16  ;;  %v3495_v52 = vrot.slane %v13733_v6, %v11504_v32  ;;  %v10772_v6 = vld [vmem:[%s13604_s3 + $0x128] sm:$0xff]  }
 0x1e4   : > { %10043 = vmatprep.mubr.msk.bf16.mxu1 %vm11573_vm3, %v13729_v30  ;;  %10072 = vmatpush3.bf16.msra.mxu1 %v10766_v17  ;;  %v5770_v17 = vshll.u32 %v12423_v54, 16  ;;  %v12755_v40 = vcombine.low %v4206_v11, %v4207_v34  ;;  %v5169_v39 = vrot.slane %v12739_v44, %v11504_v32  ;;  %v5760_v11 = vrot.slane %v5758_v56, 1  ;;  %v13734_v34 = vld [vmem:[#allocation31_spill] sm:$0xff] }
 0x1e5   : > { %10073 = vmatprep.subr.bf16.mxu1 %v10767_v36  ;;  %v5782_v43 = vshll.u32 %v12497_v26, 16  ;;  %v5787_v62 = vshll.u32 %v13734_v34, 16  ;;  %v5777_v54 = vrot.slane %v5775_v45, 1  ;;  %v5780_v38 = vshrl.u32 %v12497_v26, 16  ;;  %v13735_v26 = vld [vmem:[#allocation14_spill] sm:$0xff] }
 0x1e6   : > { %10266 = vmatpush3.bf16.msra.mxu0 %v12700_v5  ;;  %v5772_v29 = vrot.slane %v5770_v17, 1  ;;  %v4046_v17 = vadd.f32 %v11507_v16, %v3495_v52  ;;  %v5792_v56 = vshrl.u32 %v12549_v7, 16  ;;  %v5794_v34 = vshll.u32 %v12549_v7, 16  ;;  %v12788_v16 = vld [vmem:[%s13604_s3 + $0x230] sm:$0xff]   ;;  %v13736_v52 = vld [vmem:[#allocation16_spill] sm:$0xff] }
 0x1e7   : > { %10267 = vmatprep.subr.bf16.mxu0 %v12719_v35  ;;  %v5784_v44 = vrot.slane %v5782_v43, 1  ;;  %v5799_v45 = vshll.u32 %v12553_v57, 16  ;;  %v5806_v15 = vshll.u32 %v12571_v51, 16  ;;  %v5811_v4 = vshll.u32 %v12573_v0, 16  ;;  %v10775_v57 = vld [vmem:[%s13604_s3 + $0x130] sm:$0xff]  }
 0x1e8   : > { %9948 = vmatmul.mubr.bf16.gmra.mrb[92].mxu0 %v12663_v2  ;;  %10074 = vmatpush3.bf16.msra.mxu1 %v10767_v36  ;;  %v5773_v31 = vor.u32 %v5772_v29, %v5768_v9  ;;  %v5176_v36 = vrot.slane %v12755_v40, %v11504_v32  ;;  %v4208_v40 = vmax.f32 %v4046_v17, 0.0  ;;  %v5789_v29 = vrot.slane %v5787_v62, 1 }
 0x1e9   : > { %9951 = vmatprep.mubr.bf16.mxu0 %v12725_v27  ;;  %10075 = vmatprep.subr.bf16.mxu1 %v10769_v53  ;;  %v5785_v7 = vor.u32 %v5784_v44, %v5780_v38  ;;  %v5796_v43 = vrot.slane %v5794_v34, 1  ;;  %v5808_v38 = vrot.slane %v5806_v15, 1  ;;  %v5816_v0 = vshrl.u32 %v12590_v46, 16 }
 0x1ea   : > { %10268 = vmatpush3.bf16.msra.mxu0 %v12719_v35  ;;  %v12794_v9 = vsel %vm5634_vm6, %v5773_v31, %v5777_v54  ;;  %v5184_v20 = vrot.slane %v4208_v40, %v11504_v32  ;;  %v5801_v31 = vrot.slane %v5799_v45, 1  ;;  %v5804_v54 = vshrl.u32 %v12571_v51, 16  ;;  %v12817_v32 = vld [vmem:[%s13604_s3 + $0x238] sm:$0xff]  }
 0x1eb   : > { %10269 = vmatprep.subr.bf16.mxu0 %v12762_v1  ;;  %10044 = vmatmul.mubr.msk.bf16.gmra.mrb[8].mxu1 %vm11573_vm3, %v13735_v26  ;;  %v12810_v62 = vsel %vm5634_vm6, %v5785_v7, %v5789_v29  ;;  %v5797_v17 = vor.u32 %v5796_v43, %v5792_v56  ;;  %v5823_v34 = vshll.u32 %v12592_v49, 16  ;;  %v5160_v40 = vcombine.low %v5152_v55, %v5159_v25 }
 0x1ec   : > { %10047 = vmatprep.mubr.msk.bf16.mxu1 %vm11573_vm3, %v13736_v52  ;;  %10076 = vmatpush3.bf16.msra.mxu1 %v10769_v53  ;;  %v5818_v53 = vshll.u32 %v12590_v46, 16  ;;  %v5330_v51 = vsel %vm3701_vm4, %v5184_v20, 0.0  ;;  %v5809_v56 = vor.u32 %v5808_v38, %v5804_v54  ;;  %v5813_v29 = vrot.slane %v5811_v4, 1 }
 0x1ed   : > { %10077 = vmatprep.subr.bf16.mxu1 %v10772_v6  ;;  %v5367_v15 = vpack.c.bf16 %v5330_v51, %v5330_v51  ;;  %v12825_v46 = vsel %vm5634_vm6, %v5797_v17, %v5801_v31  ;;  %v5825_v7 = vrot.slane %v5823_v34, 1  ;;  %v5177_v49 = vcombine.low %v5169_v39, %v5176_v36  ;;  %v13739_v31 = vld [vmem:[#allocation19_spill] sm:$0xff]  ;;  %v10780_v17 = vld [vmem:[%s13604_s3 + $0x140] sm:$0xff]   ;;  %v13743_v34 = vld [vmem:[#allocation24_spill] sm:$0xff] }
 0x1ee   : > { %10270 = vmatpush3.bf16.msra.mxu0 %v12762_v1  ;;  %v5820_v44 = vrot.slane %v5818_v53, 1  ;;  %v5328_v20 = vsel %vm3696_vm1, %v5160_v40, 0.0  ;;  %v13737_v55 = vshrl.u32 %v12298_v50, 16  ;;  %v12839_v43 = vsel %vm5634_vm6, %v5809_v56, %v5813_v29  ;;  %v13744_v56 = vld [vmem:[#allocation29_spill] sm:$0xff]  ;;  %v13745_v29 = vld [vmem:[#allocation32_spill] sm:$0xff] }
 0x1ef   : > { %10271 = vmatprep.subr.bf16.mxu0 %v12788_v16  ;;  %v5366_v8 = vpack.c.bf16 %v5177_v49, %v5328_v20  ;;  %v12848_v36 = vpack.c.bf16 %v5177_v49, %v5160_v40  ;;  %v6719_v50 = vshll.u32 %v5367_v15, 16  ;;  %v13742_v54 = vshll.u32 %v13732_v18, 16  ;;  %v13746_v49 = vld [vmem:[#allocation7_spill] sm:$0xff] }
 0x1f0   : > { %9952 = vmatmul.mubr.bf16.gmra.mrb[96].mxu0 %v12728_v63  ;;  %10078 = vmatpush3.bf16.msra.mxu1 %v10772_v6  ;;  %v5821_v45 = vor.u32 %v5820_v44, %v5816_v0  ;;  %v5749_v25 = vor.u32 %v12742_v33, %v13737_v55  ;;  %v13738_v6 = vshrl.u32 %v13730_v24, 16  ;;  %v13740_v33 = vld [vmem:[#allocation21_spill] sm:$0xff]  ;;  %v13741_v24 = vshll.u32 %v13731_v22, 16  ;;  %v13748_v20 = vld [vmem:[#allocation11_spill] sm:$0xff]  ;;  %v10781_v55 = vld [vmem:[%s13604_s3 + $0x148] sm:$0xff]  }
 0x1f1   : > { %9955 = vmatprep.mubr.bf16.mxu0 %v12737_v19  ;;  %10079 = vmatprep.subr.bf16.mxu1 %v10775_v57  ;;  %v5765_v53 = vrot.slane %v13742_v54, 1  ;;  %v6712_v38 = vshrl.u32 %v5366_v8, 16  ;;  %v6714_v0 = vshll.u32 %v5366_v8, 16  ;;  %v6721_v18 = vrot.slane %v6719_v50, 1  ;;  %v13751_v50 = vld [vmem:[#allocation17_spill] sm:$0xff]  ;;  %v10786_v54 = vld [vmem:[%s13604_s3 + $0x170] sm:$0xff]  }
 0x1f2   : > { %10272 = vmatpush3.bf16.msra.mxu0 %v12788_v16  ;;  %v5761_v4 = vor.u32 %v5760_v11, %v13738_v6  ;;  %v12846_v39 = vsel %vm5634_vm6, %v5821_v45, %v5825_v7  ;;  %v5753_v11 = vrot.slane %v13741_v24, 1  ;;  %v6983_v45 = vrot.slane %v5366_v8, 1  ;;  %v13749_v6 = vld [vmem:[#allocation13_spill] sm:$0xff]  ;;  %v13752_v24 = vld [vmem:[#allocation20_spill] sm:$0xff] }
 0x1f3   : > { %10273 = vmatprep.subr.bf16.mxu0 %v12817_v32  ;;  %10048 = vmatmul.mubr.msk.bf16.gmra.mrb[12].mxu1 %vm11573_vm3, %v13739_v31  ;;  %v6984_v7 = vrot.slane %v5367_v15, 1  ;;  %v13747_v15 = vld [vmem:[#allocation9_spill] sm:$0xff] }
 0x1f4   : > { %10051 = vmatprep.mubr.msk.bf16.mxu1 %vm11573_vm3, %v13740_v33  ;;  %10080 = vmatpush3.bf16.msra.mxu1 %v10775_v57  ;;  %v12862_v51 = vsel %vm5634_vm6, %v5749_v25, %v5753_v11  ;;  %v12866_v22 = vsel %vm5634_vm6, %v5761_v4, %v5765_v53  ;;  %v6716_v57 = vrot.slane %v6714_v0, 1  ;;  %v10782_v25 = vld [vmem:[%s13604_s3 + $0x150] sm:$0xff]   ;;  %v10783_v4 = vld [vmem:[%s13604_s3 + $0x158] sm:$0xff]   ;;  %v10784_v8 = vld [vmem:[%s13604_s3 + $0x160] sm:$0xff]  }
 0x1f5   : > { %10081 = vmatprep.subr.bf16.mxu1 %v10778_v10  ;;  %v10785_v11 = vld [vmem:[%s13604_s3 + $0x168] sm:$0xff]   ;;  %v13753_v53 = vld [vmem:[#allocation23_spill] sm:$0xff]  ;;  %v10788_v0 = vld [vmem:[%s13604_s3 + $0x180] sm:$0xff]  }
 0x1f6   : > { %10274 = vmatpush3.bf16.msra.mxu0 %v12817_v32  ;;  %v6717_v44 = vor.u32 %v6716_v57, %v6712_v38  ;;  %v10787_v38 = vld [vmem:[%s13604_s3 + $0x178] sm:$0xff]   ;;  %v13755_v57 = vld [vmem:[#allocation30_spill] sm:$0xff] }
 0x1f8   : > { %9956 = vmatmul.mubr.bf16.gmra.mrb[100].mxu0 %v12862_v51  ;;  %10082 = vmatpush3.bf16.msra.mxu1 %v10778_v10  ;;  %v12873_v40 = vsel %vm5634_vm6, %v6717_v44, %v6721_v18  ;;  %v12888_v10 = vsel %vm6132_vm5, %v6983_v45, %v6984_v7  ;;  %v13756_v18 = vld [vmem:[#allocation6_spill] sm:$0xff]  ;;  %v10790_v45 = vld [vmem:[%s13604_s3 + $0x190] sm:$0xff]   ;;  %v10791_v7 = vld [vmem:[%s13604_s3 + $0x198] sm:$0xff]  }
 0x1f9   : > { %9959 = vmatprep.mubr.bf16.mxu0 %v12866_v22  ;;  %10115 = vmatprep.subr.bf16.mxu1 %v10780_v17  ;;  %v10789_v44 = vld [vmem:[%s13604_s3 + $0x188] sm:$0xff]  }
 0x1fb   : > { %10052 = vmatmul.mubr.msk.bf16.gmra.mrb[16].mxu1 %vm11573_vm3, %v13743_v34 }
 0x1fc   : > { %10055 = vmatprep.mubr.msk.bf16.mxu1 %vm11573_vm3, %v13744_v56 }
 0x200   : > { %9960 = vmatmul.mubr.bf16.gmra.mrb[104].mxu0 %v12794_v9 }
 0x201   : > { %9963 = vmatprep.mubr.bf16.mxu0 %v12810_v62 }
 0x203   : > { %10056 = vmatmul.mubr.msk.bf16.gmra.mrb[20].mxu1 %vm11573_vm3, %v13745_v29 }
 0x204   : > { %10059 = vmatprep.mubr.msk.bf16.mxu1 %vm11573_vm3, %v12547_v41 }
 0x208   : > { %9964 = vmatmul.mubr.bf16.gmra.mrb[108].mxu0 %v12825_v46 }
 0x209   : > { %9967 = vmatprep.mubr.bf16.mxu0 %v12839_v43 }
 0x20b   : > { %10060 = vmatmul.mubr.msk.bf16.gmra.mrb[24].mxu1 %vm11573_vm3, %v12569_v42 }
 0x20c   : > { %10063 = vmatprep.mubr.msk.bf16.mxu1 %vm11573_vm3, %v12588_v60 }
 0x210   : > { %9968 = vmatmul.mubr.bf16.gmra.mrb[112].mxu0 %v12846_v39 }
 0x211   : > { %10275 = vmatprep.mubr.bf16.mxu0 %v13746_v49 }
 0x213   : > { %10064 = vmatmul.mubr.msk.bf16.gmra.mrb[28].mxu1 %vm11573_vm3, %v12848_v36 }
 0x214   : > { %10083 = vmatprep.mubr.bf16.mxu1 %v12635_v58  ;;  %v13750_v58 = vld [vmem:[#allocation15_spill] sm:$0xff] }
 0x218   : > { %10276 = vmatmul.mubr.bf16.vlgmr.msra.gmra.mrb[116].mxu0 %v13747_v15 }
 0x219   : > { %10279 = vmatprep.mubr.bf16.mxu0 %v13748_v20 }
 0x21b   : > { %10084 = vmatmul.mubr.bf16.vlgmr.msra.gmra.mrb[0].mxu1 %v12641_v28 }
 0x21c   : > { %10116 = vmatpush3.bf16.msra.mxu1 %v10780_v17  ;;  %10087 = vmatprep.mubr.bf16.mxu1 %v12644_v59  ;;  %v13754_v17 = vld [vmem:[#allocation28_spill] sm:$0xff] }
 0x21d   : > { %10117 = vmatprep.subr.bf16.mxu1 %v10781_v55 }
 0x220   : > { %10280 = vmatmul.mubr.bf16.gmra.mrb[120].mxu0 %v13749_v6  ;;  %10118 = vmatpush3.bf16.msra.mxu1 %v10781_v55  ;;  %v10795_v55 = vld [vmem:[%s13604_s3 + $0x1b8] sm:$0xff]  }
 0x221   : > { %10283 = vmatprep.mubr.bf16.mxu0 %v13750_v58  ;;  %10119 = vmatprep.subr.bf16.mxu1 %v10782_v25 }
 0x223   : > { %10088 = vmatmul.mubr.bf16.gmra.mrb[4].mxu1 %v12651_v61 }
 0x224   : > { %10091 = vmatprep.mubr.bf16.mxu1 %v12663_v2  ;;  %10120 = vmatpush3.bf16.msra.mxu1 %v10782_v25  ;;  %v10796_v25 = vld [vmem:[%s13604_s3 + $0x1c0] sm:$0xff]  }
 0x225   : > { %10121 = vmatprep.subr.bf16.mxu1 %v10783_v4 }
 0x228   : > { %10284 = vmatmul.mubr.bf16.gmra.mrb[124].mxu0 %v13751_v50  ;;  %10122 = vmatpush3.bf16.msra.mxu1 %v10783_v4  ;;  %v10798_v4 = vld [vmem:[%s13604_s3 + $0x1d0] sm:$0xff]  }
 0x229   : > { %10287 = vmatprep.mubr.bf16.mxu0 %v13752_v24  ;;  %10123 = vmatprep.subr.bf16.mxu1 %v10784_v8 }
 0x22b   : > { %10092 = vmatmul.mubr.bf16.gmra.mrb[8].mxu1 %v12725_v27 }
 0x22c   : > { %10095 = vmatprep.mubr.bf16.mxu1 %v12728_v63  ;;  %10124 = vmatpush3.bf16.msra.mxu1 %v10784_v8 }
 0x22d   : > { %10125 = vmatprep.subr.bf16.mxu1 %v10785_v11 }
 0x230   : > { %10288 = vmatmul.mubr.bf16.gmra.mrb[128].mxu0 %v13753_v53  ;;  %10126 = vmatpush3.bf16.msra.mxu1 %v10785_v11 }
 0x231   : > { %10291 = vmatprep.mubr.bf16.mxu0 %v13754_v17  ;;  %10127 = vmatprep.subr.bf16.mxu1 %v10786_v54 }
 0x233   : > { %10096 = vmatmul.mubr.bf16.gmra.mrb[12].mxu1 %v12737_v19 }
 0x234   : > { %10099 = vmatprep.mubr.bf16.mxu1 %v12862_v51  ;;  %10128 = vmatpush3.bf16.msra.mxu1 %v10786_v54  ;;  %v10806_v54 = vld [vmem:[%s13606_s5 + $0x10] sm:$0xff]  }
 0x235   : > { %10129 = vmatprep.subr.bf16.mxu1 %v10787_v38 }
 0x238   : > { %10292 = vmatmul.mubr.bf16.gmra.mrb[132].mxu0 %v13755_v57  ;;  %10130 = vmatpush3.bf16.msra.mxu1 %v10787_v38  ;;  %v10807_v38 = vld [vmem:[%s13606_s5 + $0x18] sm:$0xff]  }
 0x239   : > { %10163 = vmatprep.subr.bf16.mxu1 %v10788_v0 }
 0x23b   : > { %10100 = vmatmul.mubr.bf16.gmra.mrb[16].mxu1 %v12866_v22 }
 0x23c   : > { %10103 = vmatprep.mubr.bf16.mxu1 %v12794_v9 }
 0x243   : > { %10104 = vmatmul.mubr.bf16.gmra.mrb[20].mxu1 %v12810_v62 }
 0x244   : > { %10107 = vmatprep.mubr.bf16.mxu1 %v12825_v46 }
 0x24b   : > { %10108 = vmatmul.mubr.bf16.gmra.mrb[24].mxu1 %v12839_v43 }
 0x24c   : > { %10111 = vmatprep.mubr.bf16.mxu1 %v12846_v39 }
 0x253   : > { %10112 = vmatmul.mubr.bf16.gmra.mrb[28].mxu1 %v12873_v40 }
 0x254   : > { %10131 = vmatprep.mubr.bf16.mxu1 %v13756_v18  ;;  %v10813_v18 = vld [vmem:[%s13604_s3 + $0x200] sm:$0xff]  }
 0x25b   : > { %10132 = vmatmul.mubr.bf16.vlgmr.msra.gmra.mrb[0].mxu1 %v13746_v49  ;;  %v10792_v49 = vld [vmem:[%s13604_s3 + $0x1a0] sm:$0xff]  }
 0x25c   : > { %10164 = vmatpush3.bf16.msra.mxu1 %v10788_v0  ;;  %10135 = vmatprep.mubr.bf16.mxu1 %v13747_v15  ;;  %v10793_v15 = vld [vmem:[%s13604_s3 + $0x1a8] sm:$0xff]  }
 0x25d   : > { %10165 = vmatprep.subr.bf16.mxu1 %v10789_v44 }
 0x260   : > { %10166 = vmatpush3.bf16.msra.mxu1 %v10789_v44 }
 0x261   : > { %10167 = vmatprep.subr.bf16.mxu1 %v10790_v45 }
 0x263   : > { %10136 = vmatmul.mubr.bf16.gmra.mrb[4].mxu1 %v13748_v20  ;;  %v10794_v20 = vld [vmem:[%s13604_s3 + $0x1b0] sm:$0xff]  }
 0x264   : > { %10139 = vmatprep.mubr.bf16.mxu1 %v13749_v6  ;;  %10168 = vmatpush3.bf16.msra.mxu1 %v10790_v45  ;;  %v13757_v6 = vld [vmem:[#allocation33_spill] sm:$0xff] }
 0x265   : > { %10169 = vmatprep.subr.bf16.mxu1 %v10791_v7 }
 0x268   : > { %10170 = vmatpush3.bf16.msra.mxu1 %v10791_v7 }
 0x269   : > { %10171 = vmatprep.subr.bf16.mxu1 %v10792_v49 }
 0x26b   : > { %10140 = vmatmul.mubr.bf16.gmra.mrb[8].mxu1 %v13750_v58  ;;  %v10797_v58 = vld [vmem:[%s13604_s3 + $0x1c8] sm:$0xff]  }
 0x26c   : > { %10143 = vmatprep.mubr.bf16.mxu1 %v13751_v50  ;;  %10172 = vmatpush3.bf16.msra.mxu1 %v10792_v49  ;;  %v10805_v50 = vld [vmem:[%s13606_s5 + $0x8] sm:$0xff]  }
 0x26d   : > { %10173 = vmatprep.subr.bf16.mxu1 %v10793_v15 }
 0x270   : > { %10174 = vmatpush3.bf16.msra.mxu1 %v10793_v15 }
 0x271   : > { %10175 = vmatprep.subr.bf16.mxu1 %v10794_v20 }
 0x273   : > { %10144 = vmatmul.mubr.bf16.gmra.mrb[12].mxu1 %v13752_v24 }
 0x274   : > { %10147 = vmatprep.mubr.bf16.mxu1 %v13753_v53  ;;  %10176 = vmatpush3.bf16.msra.mxu1 %v10794_v20 }
 0x275   : > { %10177 = vmatprep.subr.bf16.mxu1 %v10795_v55 }
 0x278   : > { %10178 = vmatpush3.bf16.msra.mxu1 %v10795_v55 }
 0x279   : > { %10211 = vmatprep.subr.bf16.mxu1 %v10796_v25 }
 0x27b   : > { %10148 = vmatmul.mubr.bf16.gmra.mrb[16].mxu1 %v13754_v17 }
 0x27c   : > { %10151 = vmatprep.mubr.bf16.mxu1 %v13755_v57 }
 0x283   : > { %10152 = vmatmul.mubr.bf16.gmra.mrb[20].mxu1 %v13757_v6 }
 0x284   : > { %10155 = vmatprep.mubr.bf16.mxu1 %v12576_v47 }
 0x28b   : > { %10156 = vmatmul.mubr.bf16.gmra.mrb[24].mxu1 %v12598_v48 }
 0x28c   : > { %10159 = vmatprep.mubr.bf16.mxu1 %v12611_v12 }
 0x293   : > { %10160 = vmatmul.mubr.bf16.gmra.mrb[28].mxu1 %v12888_v10 }
 0x294   : > { %10179 = vmatprep.mubr.msk.bf16.mxu1 %vm11573_vm3, %v11688_v13  ;;  %v10799_v13 = vld [vmem:[%s13604_s3 + $0x1d8] sm:$0xff]  }
 0x29b   : > { %10180 = vmatmul.mubr.msk.bf16.vlgmr.msra.gmra.mrb[0].mxu1 %vm11573_vm3, %v13726_v21  ;;  %v10800_v21 = vld [vmem:[%s13604_s3 + $0x1e0] sm:$0xff]  }
 0x29c   : > { %10212 = vmatpush3.bf16.msra.mxu1 %v10796_v25  ;;  %10183 = vmatprep.mubr.msk.bf16.mxu1 %vm11573_vm3, %v13728_v14  ;;  %v10801_v14 = vld [vmem:[%s13604_s3 + $0x1e8] sm:$0xff]  }
 0x29d   : > { %10213 = vmatprep.subr.bf16.mxu1 %v10797_v58 }
 0x2a0   : > { %10214 = vmatpush3.bf16.msra.mxu1 %v10797_v58 }
 0x2a1   : > { %10215 = vmatprep.subr.bf16.mxu1 %v10798_v4 }
 0x2a3   : > { %10184 = vmatmul.mubr.msk.bf16.gmra.mrb[4].mxu1 %vm11573_vm3, %v13729_v30 }
 0x2a4   : > { %10187 = vmatprep.mubr.msk.bf16.mxu1 %vm11573_vm3, %v13735_v26  ;;  %10216 = vmatpush3.bf16.msra.mxu1 %v10798_v4  ;;  %v10804_v26 = vld [vmem:[%s13606_s5] sm:$0xff]  }
 0x2a5   : > { %10217 = vmatprep.subr.bf16.mxu1 %v10799_v13  ;;  %10307 = vmatprep.subr.bf16.mxu0 %v10804_v26 }
 0x2a6   : > { %10308 = vmatpush3.bf16.msra.mxu0 %v10804_v26 }
 0x2a7   : > { %10309 = vmatprep.subr.bf16.mxu0 %v10805_v50 }
 0x2a8   : > { %10218 = vmatpush3.bf16.msra.mxu1 %v10799_v13 }
 0x2a9   : > { %10219 = vmatprep.subr.bf16.mxu1 %v10800_v21 }
 0x2aa   : > { %10310 = vmatpush3.bf16.msra.mxu0 %v10805_v50 }
 0x2ab   : > { %v13021_v8 = vpop.f32.mrb[84].mxu0  ;;  %10188 = vmatmul.mubr.msk.bf16.gmra.mrb[8].mxu1 %vm11573_vm3, %v13736_v52  ;;  %v10802_v52 = vld [vmem:[%s13604_s3 + $0x1f0] sm:$0xff]   ;;  %10311 = vmatprep.subr.bf16.mxu0 %v10806_v54 }
 0x2ac   : > { %v13026_v30 = vpop.f32.mrb[85].mxu0  ;;  %10191 = vmatprep.mubr.msk.bf16.mxu1 %vm11573_vm3, %v13739_v31  ;;  %10220 = vmatpush3.bf16.msra.mxu1 %v10800_v21  ;;  %v10803_v31 = vld [vmem:[%s13604_s3 + $0x1f8] sm:$0xff]  }
 0x2ad   : > { %v13037_v24 = vpop.f32.mrb[86].mxu0  ;;  %10221 = vmatprep.subr.bf16.mxu1 %v10801_v14 }
 0x2ae   : > { %v13039_v11 = vpop.f32.mrb[87].mxu0  ;;  %10312 = vmatpush3.bf16.msra.mxu0 %v10806_v54 }
 0x2af   : > { %10313 = vmatprep.subr.bf16.mxu0 %v10807_v38 }
 0x2b0   : > { %10222 = vmatpush3.bf16.msra.mxu1 %v10801_v14 }
 0x2b1   : > { %10223 = vmatprep.subr.bf16.mxu1 %v10802_v52 }
 0x2b2   : > { %10314 = vmatpush3.bf16.msra.mxu0 %v10807_v38 }
 0x2b3   : > { %v13050_v53 = vpop.f32.mrb[88].mxu0  ;;  %10192 = vmatmul.mubr.msk.bf16.gmra.mrb[12].mxu1 %vm11573_vm3, %v13740_v33  ;;  %v10808_v33 = vld [vmem:[%s13606_s5 + $0x20] sm:$0xff]  }
 0x2b4   : > { %v13055_v17 = vpop.f32.mrb[89].mxu0  ;;  %10195 = vmatprep.mubr.msk.bf16.mxu1 %vm11573_vm3, %v13743_v34  ;;  %10224 = vmatpush3.bf16.msra.mxu1 %v10802_v52 }
 0x2b5   : > { %v13063_v0 = vpop.f32.mrb[90].mxu0  ;;  %10225 = vmatprep.subr.bf16.mxu1 %v10803_v31  ;;  %10315 = vmatprep.subr.bf16.mxu0 %v10808_v33 }
 0x2b6   : > { %v13065_v57 = vpop.f32.mrb[91].mxu0  ;;  %10316 = vmatpush3.bf16.msra.mxu0 %v10808_v33 }
 0x2b8   : > { %10226 = vmatpush3.bf16.msra.mxu1 %v10803_v31 }
 0x2b9   : > { %10355 = vmatprep.subr.bf16.mxu1 %v10813_v18 }
 0x2bb   : > { %v13073_v44 = vpop.f32.mrb[92].mxu0  ;;  %10196 = vmatmul.mubr.msk.bf16.gmra.mrb[16].mxu1 %vm11573_vm3, %v13744_v56 }
 0x2bc   : > { %v13078_v34 = vpop.f32.mrb[93].mxu0  ;;  %10199 = vmatprep.mubr.msk.bf16.mxu1 %vm11573_vm3, %v13745_v29 }
 0x2bd   : > { %v13083_v45 = vpop.f32.mrb[94].mxu0 }
 0x2be   : > { %v13085_v7 = vpop.f32.mrb[95].mxu0 }
 0x2c3   : > { %v13087_v49 = vpop.f32.mrb[96].mxu0  ;;  %10200 = vmatmul.mubr.msk.bf16.gmra.mrb[20].mxu1 %vm11573_vm3, %v12547_v41 }
 0x2c4   : > { %v13092_v15 = vpop.f32.mrb[97].mxu0  ;;  %10203 = vmatprep.mubr.msk.bf16.mxu1 %vm11573_vm3, %v12569_v42  ;;  %v13118_v42 = vld [vmem:[%s13605_s4] ss:$0 sm:$0xff] }
 0x2c5   : > { %v13097_v56 = vpop.f32.mrb[98].mxu0 }
 0x2c6   : > { %v13099_v29 = vpop.f32.mrb[99].mxu0 }
 0x2cb   : > { %v13101_v20 = vpop.f32.mrb[100].mxu0  ;;  %10204 = vmatmul.mubr.msk.bf16.gmra.mrb[24].mxu1 %vm11573_vm3, %v12588_v60  ;;  %v13758_v60 = vmov 0.0|0.0  }
 0x2cc   : > { %v13106_v55 = vpop.f32.mrb[101].mxu0  ;;  %10207 = vmatprep.mubr.msk.bf16.mxu1 %vm11573_vm3, %v12848_v36 }
 0x2cd   : > { %v13111_v41 = vpop.f32.mrb[102].mxu0 }
 0x2ce   : > { %v13113_v25 = vpop.f32.mrb[103].mxu0 }
 0x2d3   : > { %v9961_v58 = vpop.f32.mrb[104].mxu0  ;;  %10208 = vmatmul.mubr.bf16.gmra.mrb[28].mxu1 %v13758_v60 }
 0x2d4   : > { %v13121_v4 = vadd.f32 %v9961_v58, %v13118_v42  ;;  %v6021_v13 = vpop.f32.mrb[105].mxu0  ;;  %10227 = vmatprep.mubr.bf16.mxu1 %v12641_v28 }
 0x2d5   : > { %v13125_v21 = vadd.f32 %v13118_v42, %v6021_v13  ;;  %v9962_v3 = vpop.f32.mrb[106].mxu0 }
 0x2d6   : > { %v13129_v36 = vadd.f32 %v9962_v3, %v13118_v42  ;;  %v6024_v14 = vpop.f32.mrb[107].mxu0 }
 0x2d7   : > { %v13132_v26 = vadd.f32 %v13118_v42, %v6024_v14 }
 0x2db   : > { %v9965_v50 = vpop.f32.mrb[108].mxu0  ;;  %10228 = vmatmul.mubr.bf16.vlgmr.msra.gmra.mrb[0].mxu1 %v12644_v59 }
 0x2dc   : > { %v13135_v52 = vadd.f32 %v9965_v50, %v13118_v42  ;;  %v6037_v54 = vpop.f32.mrb[109].mxu0  ;;  %10363 = vmatpush3.bf16.msra.mxu1 %v10813_v18  ;;  %10231 = vmatprep.mubr.bf16.mxu1 %v12651_v61 }
 0x2dd   : > { %v13139_v31 = vadd.f32 %v13118_v42, %v6037_v54  ;;  %v9966_v28 = vpop.f32.mrb[110].mxu0  ;;  %10356 = vmatprep.subr.bf16.mxu1 %v12632_v23 }
 0x2de   : > { %v13143_v38 = vadd.f32 %v9966_v28, %v13118_v42  ;;  %v6040_v33 = vpop.f32.mrb[111].mxu0 }
 0x2df   : > { %v13147_v58 = vadd.f32 %v13118_v42, %v6040_v33 }
 0x2e0   : > { %10364 = vmatpush3.bf16.msra.mxu1 %v12632_v23 }
 0x2e1   : > { %10357 = vmatprep.subr.bf16.mxu1 %v12671_v37 }
 0x2e3   : > { %v9969_v59 = vpop.f32.mrb[112].mxu0  ;;  %10232 = vmatmul.mubr.bf16.gmra.mrb[4].mxu1 %v12663_v2 }
 0x2e4   : > { %v13152_v18 = vadd.f32 %v9969_v59, %v13118_v42  ;;  %v6053_v61 = vpop.f32.mrb[113].mxu0  ;;  %10235 = vmatprep.mubr.bf16.mxu1 %v12725_v27  ;;  %10365 = vmatpush3.bf16.msra.mxu1 %v12671_v37 }
 0x2e5   : > { %v13156_v60 = vadd.f32 %v13118_v42, %v6053_v61  ;;  %v9970_v13 = vpop.f32.mrb[114].mxu0  ;;  %10358 = vmatprep.subr.bf16.mxu1 %v12700_v5 }
 0x2e6   : > { %13759 = vst [vmem:[#allocation8_spill] sm:$0xff] %v13152_v18  ;;  %v13161_v3 = vadd.f32 %v9970_v13, %v13118_v42  ;;  %v6056_v23 = vpop.f32.mrb[115].mxu0  ;;  %v10383_v18 = vadd.f32 %v13050_v53, %v13118_v42 }
 0x2e7   : > { %13760 = vst [vmem:[#allocation18_spill] sm:$0xff] %v13156_v60  ;;  %v13165_v14 = vadd.f32 %v13118_v42, %v6056_v23 }
 0x2e8   : > { %13761 = vst [vmem:[#allocation10_spill] sm:$0xff] %v13161_v3  ;;  %10366 = vmatpush3.bf16.msra.mxu1 %v12700_v5 }
 0x2e9   : > { %13762 = vst [vmem:[#allocation12_spill] sm:$0xff] %v13165_v14  ;;  %10359 = vmatprep.subr.bf16.mxu1 %v12719_v35 }
 0x2eb   : > { %v10277_v2 = vpop.f32.mrb[116].mxu0  ;;  %10236 = vmatmul.mubr.bf16.gmra.mrb[8].mxu1 %v12728_v63 }
 0x2ec   : > { %v13170_v27 = vpop.f32.mrb[117].mxu0  ;;  %10239 = vmatprep.mubr.bf16.mxu1 %v12737_v19  ;;  %10367 = vmatpush3.bf16.msra.mxu1 %v12719_v35 }
 0x2ed   : > { %v13173_v37 = vpop.f32.mrb[118].mxu0  ;;  %10360 = vmatprep.subr.bf16.mxu1 %v12762_v1 }
 0x2ee   : > { %v7878_v50 = vpop.f32.mrb[119].mxu0 }
 0x2f0   : > { %10368 = vmatpush3.bf16.msra.mxu1 %v12762_v1 }
 0x2f1   : > { %10361 = vmatprep.subr.bf16.mxu1 %v12788_v16 }
 0x2f3   : > { %v13179_v5 = vpop.f32.mrb[120].mxu0  ;;  %10240 = vmatmul.mubr.bf16.gmra.mrb[12].mxu1 %v12862_v51 }
 0x2f4   : > { %v13182_v63 = vpop.f32.mrb[121].mxu0  ;;  %10243 = vmatprep.mubr.bf16.mxu1 %v12866_v22  ;;  %10369 = vmatpush3.bf16.msra.mxu1 %v12788_v16 }
 0x2f5   : > { %v13185_v19 = vpop.f32.mrb[122].mxu0  ;;  %10362 = vmatprep.subr.bf16.mxu1 %v12817_v32 }
 0x2f6   : > { %v13188_v35 = vpop.f32.mrb[123].mxu0 }
 0x2f8   : > { %10370 = vmatpush3.bf16.msra.mxu1 %v12817_v32 }
 0x2fb   : > { %v13192_v1 = vpop.f32.mrb[124].mxu0  ;;  %10244 = vmatmul.mubr.bf16.gmra.mrb[16].mxu1 %v12794_v9 }
 0x2fc   : > { %v13195_v54 = vpop.f32.mrb[125].mxu0  ;;  %10247 = vmatprep.mubr.bf16.mxu1 %v12810_v62 }
 0x2fd   : > { %v13198_v51 = vpop.f32.mrb[126].mxu0 }
 0x2fe   : > { %v13200_v22 = vpop.f32.mrb[127].mxu0 }
 0x303   : > { %v13202_v28 = vpop.f32.mrb[128].mxu0  ;;  %10248 = vmatmul.mubr.bf16.gmra.mrb[20].mxu1 %v12825_v46  ;;  %v13763_v46 = vld [vmem:[#allocation34_spill] sm:$0xff] }
 0x304   : > { %v13205_v16 = vpop.f32.mrb[129].mxu0  ;;  %10251 = vmatprep.mubr.bf16.mxu1 %v12839_v43  ;;  %v13764_v43 = vld [vmem:[#allocation5_spill] sm:$0xff] }
 0x305   : > { %v13208_v32 = vpop.f32.mrb[130].mxu0 }
 0x306   : > { %v13210_v33 = vpop.f32.mrb[131].mxu0 }
 0x30b   : > { %v13212_v9 = vpop.f32.mrb[132].mxu0  ;;  %10252 = vmatmul.mubr.bf16.gmra.mrb[24].mxu1 %v12846_v39  ;;  %v10809_v39 = vld [vmem:[%s13606_s5 + $0x28] sm:$0xff]  }
 0x30c   : > { %v13215_v62 = vpop.f32.mrb[133].mxu0  ;;  %10255 = vmatprep.mubr.bf16.mxu1 %v12873_v40  ;;  %10317 = vmatprep.subr.bf16.mxu0 %v10809_v39  ;;  %v10810_v40 = vld [vmem:[%s13606_s5 + $0x30] sm:$0xff]  }
 0x30d   : > { %v13218_v59 = vpop.f32.mrb[134].mxu0  ;;  %10318 = vmatpush3.bf16.msra.mxu0 %v10809_v39 }
 0x30e   : > { %v13220_v61 = vpop.f32.mrb[135].mxu0  ;;  %10319 = vmatprep.subr.bf16.mxu0 %v10810_v40 }
 0x311   : > { %10320 = vmatpush3.bf16.msra.mxu0 %v10810_v40 }
 0x313   : > { %10256 = vmatmul.mubr.bf16.gmra.mrb[28].mxu1 %v13763_v46  ;;  %v10380_v46 = vadd.f32 %v13118_v42, %v13039_v11 }
 0x314   : > { %10295 = vmatprep.mubr.bf16.mxu1 %v13757_v6  ;;  %v10377_v6 = vadd.f32 %v13037_v24, %v13118_v42 }
 0x31b   : > { %10296 = vmatmul.mubr.bf16.vlgmr.msra.gmra.mrb[20].mxu1 %v12576_v47  ;;  %v10811_v47 = vld [vmem:[%s13606_s5 + $0x38] sm:$0xff]  }
 0x31c   : > { %10299 = vmatprep.mubr.bf16.mxu1 %v12598_v48  ;;  %10321 = vmatprep.subr.bf16.mxu0 %v10811_v47  ;;  %v10371_v48 = vadd.f32 %v13021_v8, %v13118_v42 }
 0x31d   : > { %10322 = vmatpush3.bf16.msra.mxu0 %v10811_v47 }
 0x323   : > { %10300 = vmatmul.mubr.bf16.gmra.mrb[24].mxu1 %v12611_v12  ;;  %v10374_v12 = vadd.f32 %v13118_v42, %v13026_v30 }
 0x324   : > { %10303 = vmatprep.mubr.bf16.mxu1 %v12888_v10 }
 0x32b   : > { %10304 = vmatmul.mubr.bf16.gmra.mrb[28].mxu1 %v13764_v43 }
 0x3ae   : > { %v10229_v10 = vpop.f32.mrb[0].mxu1 }
 0x3af   : > { %v10372_v13 = vadd.f32 %v10371_v48, %v10229_v10  ;;  %v7612_v23 = vpop.f32.mrb[1].mxu1  ;;  %v10386_v10 = vadd.f32 %v13118_v42, %v13055_v17 }
 0x3b0   : > { %v10375_v43 = vadd.f32 %v10374_v12, %v7612_v23  ;;  %v10230_v39 = vpop.f32.mrb[2].mxu1 }
 0x3b1   : > { %v10373_v40 = vadd.f32 %v10372_v13, %v10277_v2  ;;  %v10378_v14 = vadd.f32 %v10377_v6, %v10230_v39  ;;  %v7615_v47 = vpop.f32.mrb[3].mxu1  ;;  %v10389_v2 = vadd.f32 %v13063_v0, %v13118_v42 }
 0x3b2   : > { %v10376_v3 = vadd.f32 %v10375_v43, %v13170_v27  ;;  %v10381_v8 = vadd.f32 %v10380_v46, %v7615_v47  ;;  %v10398_v47 = vadd.f32 %v13118_v42, %v13078_v34 }
 0x3b3   : > { %v10379_v60 = vadd.f32 %v10378_v14, %v13173_v37  ;;  %v8036_v24 = vmax.f32 %v10373_v40, 0.0  ;;  %v10392_v14 = vadd.f32 %v13118_v42, %v13065_v57 }
 0x3b4   : > { %v10382_v30 = vadd.f32 %v10381_v8, %v7878_v50  ;;  %v8034_v11 = vmax.f32 %v10376_v3, 0.0 }
 0x3b5   : > { %v8037_v48 = vmax.f32 %v10379_v60, 0.0 }
 0x3b6   : > { %v8035_v12 = vmax.f32 %v10382_v30, 0.0  ;;  %v10233_v23 = vpop.f32.mrb[4].mxu1 }
 0x3b7   : > { %v8067_v6 = vpack.c.bf16 %v8037_v48, %v8036_v24  ;;  %v10384_v27 = vadd.f32 %v10383_v18, %v10233_v23  ;;  %v7628_v13 = vpop.f32.mrb[5].mxu1  ;;  %v10395_v18 = vadd.f32 %v13073_v44, %v13118_v42 }
 0x3b8   : > { %v10387_v37 = vadd.f32 %v10386_v10, %v7628_v13  ;;  %v10234_v50 = vpop.f32.mrb[6].mxu1  ;;  %v8066_v53 = vpack.c.bf16 %v8035_v12, %v8034_v11  ;;  %v10407_v13 = vadd.f32 %v13087_v49, %v13118_v42 }
 0x3b9   : > { %v10385_v60 = vadd.f32 %v10384_v27, %v13179_v5  ;;  %v10390_v46 = vadd.f32 %v10389_v2, %v10234_v50  ;;  %v7631_v43 = vpop.f32.mrb[7].mxu1 }
 0x3ba   : > { %v10388_v17 = vadd.f32 %v10387_v37, %v13182_v63  ;;  %v10393_v3 = vadd.f32 %v10392_v14, %v7631_v43  ;;  %10323 = vmatprep.mubr.bf16.mxu0 %v8066_v53  ;;  %v10401_v63 = vadd.f32 %v13083_v45, %v13118_v42  ;;  %v10410_v37 = vadd.f32 %v13118_v42, %v13092_v15 }
 0x3bb   : > { %v10391_v39 = vadd.f32 %v10390_v46, %v13185_v19  ;;  %10324 = vmatmul.mubr.bf16.vlgmr.msra.gmra.mrb[136].mxu0 %v8067_v6  ;;  %v8040_v57 = vmax.f32 %v10385_v60, 0.0 }
 0x3bc   : > { %v10394_v0 = vadd.f32 %v10393_v3, %v13188_v35  ;;  %v8038_v5 = vmax.f32 %v10388_v17, 0.0  ;;  %v10404_v35 = vadd.f32 %v13118_v42, %v13085_v7 }
 0x3bd   : > { %v8041_v40 = vmax.f32 %v10391_v39, 0.0 }
 0x3be   : > { %v8039_v8 = vmax.f32 %v10394_v0, 0.0  ;;  %v10237_v30 = vpop.f32.mrb[8].mxu1 }
 0x3bf   : > { %v10396_v24 = vadd.f32 %v10395_v18, %v10237_v30  ;;  %v7644_v48 = vpop.f32.mrb[9].mxu1  ;;  %v8069_v19 = vpack.c.bf16 %v8041_v40, %v8040_v57  ;;  %v10419_v40 = vadd.f32 %v13101_v20, %v13118_v42 }
 0x3c0   : > { %v10399_v10 = vadd.f32 %v10398_v47, %v7644_v48  ;;  %v10238_v11 = vpop.f32.mrb[10].mxu1  ;;  %v8068_v44 = vpack.c.bf16 %v8039_v8, %v8038_v5  ;;  %v10422_v5 = vadd.f32 %v13118_v42, %v13106_v55 }
 0x3c1   : > { %v10397_v12 = vadd.f32 %v10396_v24, %v13192_v1  ;;  %v10402_v23 = vadd.f32 %v10401_v63, %v10238_v11  ;;  %v7647_v2 = vpop.f32.mrb[11].mxu1 }
 0x3c2   : > { %v10400_v34 = vadd.f32 %v10399_v10, %v13195_v54  ;;  %v10405_v6 = vadd.f32 %v10404_v35, %v7647_v2  ;;  %10327 = vmatprep.mubr.bf16.mxu0 %v8068_v44  ;;  %v10413_v54 = vadd.f32 %v13097_v56, %v13118_v42 }
 0x3c3   : > { %v10403_v27 = vadd.f32 %v10402_v23, %v13198_v51  ;;  %10328 = vmatmul.mubr.bf16.gmra.mrb[140].mxu0 %v8069_v19  ;;  %v8044_v7 = vmax.f32 %v10397_v12, 0.0 }
 0x3c4   : > { %v10406_v45 = vadd.f32 %v10405_v6, %v13200_v22  ;;  %v8042_v1 = vmax.f32 %v10400_v34, 0.0  ;;  %v10416_v22 = vadd.f32 %v13118_v42, %v13099_v29 }
 0x3c5   : > { %v8045_v14 = vmax.f32 %v10403_v27, 0.0 }
 0x3c6   : > { %v8043_v50 = vmax.f32 %v10406_v45, 0.0  ;;  %v10241_v53 = vpop.f32.mrb[12].mxu1 }
 0x3c7   : > { %v10408_v60 = vadd.f32 %v10407_v13, %v10241_v53  ;;  %v7660_v46 = vpop.f32.mrb[13].mxu1  ;;  %v8071_v51 = vpack.c.bf16 %v8045_v14, %v8044_v7 }
 0x3c8   : > { %v10411_v43 = vadd.f32 %v10410_v37, %v7660_v46  ;;  %v10242_v17 = vpop.f32.mrb[14].mxu1  ;;  %v8070_v49 = vpack.c.bf16 %v8043_v50, %v8042_v1 }
 0x3c9   : > { %v10409_v3 = vadd.f32 %v10408_v60, %v13202_v28  ;;  %v10414_v39 = vadd.f32 %v10413_v54, %v10242_v17  ;;  %v7663_v0 = vpop.f32.mrb[15].mxu1 }
 0x3ca   : > { %v10412_v15 = vadd.f32 %v10411_v43, %v13205_v16  ;;  %v10417_v18 = vadd.f32 %v10416_v22, %v7663_v0  ;;  %10331 = vmatprep.mubr.bf16.mxu0 %v8070_v49  ;;  %v10425_v16 = vadd.f32 %v13111_v41, %v13118_v42 }
 0x3cb   : > { %v10415_v57 = vadd.f32 %v10414_v39, %v13208_v32  ;;  %10332 = vmatmul.mubr.bf16.gmra.mrb[144].mxu0 %v8071_v51  ;;  %v8048_v29 = vmax.f32 %v10409_v3, 0.0 }
 0x3cc   : > { %v10418_v56 = vadd.f32 %v10417_v18, %v13210_v33  ;;  %v8046_v28 = vmax.f32 %v10412_v15, 0.0  ;;  %v10428_v33 = vadd.f32 %v13118_v42, %v13113_v25  ;;  %v13765_v18 = vld [vmem:[#allocation8_spill] sm:$0xff] }
 0x3cd   : > { %v8049_v47 = vmax.f32 %v10415_v57, 0.0 }
 0x3ce   : > { %v8047_v8 = vmax.f32 %v10418_v56, 0.0  ;;  %v10245_v30 = vpop.f32.mrb[16].mxu1  ;;  %v13766_v56 = vld [vmem:[#allocation18_spill] sm:$0xff] }
 0x3cf   : > { %v10420_v63 = vadd.f32 %v10419_v40, %v10245_v30  ;;  %v7676_v24 = vpop.f32.mrb[17].mxu1  ;;  %v8073_v32 = vpack.c.bf16 %v8049_v47, %v8048_v29 }
 0x3d0   : > { %v10423_v48 = vadd.f32 %v10422_v5, %v7676_v24  ;;  %v10246_v19 = vpop.f32.mrb[18].mxu1  ;;  %v8072_v20 = vpack.c.bf16 %v8047_v8, %v8046_v28 }
 0x3d1   : > { %v10421_v35 = vadd.f32 %v10420_v63, %v13212_v9  ;;  %v10426_v10 = vadd.f32 %v10425_v16, %v10246_v19  ;;  %v7679_v11 = vpop.f32.mrb[19].mxu1 }
 0x3d2   : > { %v10424_v55 = vadd.f32 %v10423_v48, %v13215_v62  ;;  %v10429_v44 = vadd.f32 %v10428_v33, %v7679_v11  ;;  %10335 = vmatprep.mubr.bf16.mxu0 %v8072_v20  ;;  %v10816_v11 = vld [vmem:[%s11114_s8 + $0xc] sm:$0xf] }
 0x3d3   : > { %v10427_v12 = vadd.f32 %v10426_v10, %v13218_v59  ;;  %10336 = vmatmul.mubr.bf16.gmra.mrb[148].mxu0 %v8073_v32  ;;  %v8052_v23 = vmax.f32 %v10421_v35, 0.0  ;;  %v10814_v32 = vld [vmem:[%s11114_s8 + $0x18] sm:$0xf]  ;;  %v10815_v35 = vld [vmem:[%s11114_s8 + $0x1c] sm:$0xf] }
 0x3d4   : > { %v10430_v41 = vadd.f32 %v10429_v44, %v13220_v61  ;;  %v8050_v34 = vmax.f32 %v10424_v55, 0.0  ;;  %v8342_v33 = vshrl.u32 %v10814_v32, 16  ;;  %v8345_v48 = vshll.u32 %v10814_v32, 16 }
 0x3d5   : > { %v8053_v2 = vmax.f32 %v10427_v12, 0.0  ;;  %v8351_v10 = vshll.u32 %v10815_v35, 16  ;;  %v8318_v55 = vshrl.u32 %v10816_v11, 16  ;;  %v8321_v44 = vshll.u32 %v10816_v11, 16  ;;  %v10828_v11 = vld [vmem:[%s11114_s8 + $0x40] sm:$0xf] }
 0x3d6   : > { %v8051_v25 = vmax.f32 %v10430_v41, 0.0  ;;  %v8344_v19 = vrot.slane %v8342_v33, 4  ;;  %v8347_v20 = vrot.slane %v8345_v48, 5  ;;  %v8355_v12 = vshrl.u32 %v10815_v35, 16  ;;  %v10827_v35 = vld [vmem:[%s11114_s8 + $0x38] sm:$0x1] }
 0x3d7   : > { %v8075_v42 = vpack.c.bf16 %v8053_v2, %v8052_v23  ;;  %v13311_v23 = vrot.slane %v8351_v10, 5  ;;  %v8320_v2 = vrot.slane %v8318_v55, 4  ;;  %v8409_v10 = vshll.u32 %v10827_v35, 16  ;;  %v10834_v35 = vld [vmem:[%s11114_s8 + $0x64] sm:$0xf] }
 0x3d8   : > { %v8074_v6 = vpack.c.bf16 %v8051_v25, %v8050_v34  ;;  %v8348_v41 = vor.u32 %v8347_v20, %v8344_v19  ;;  %v8323_v34 = vrot.slane %v8321_v44, 5  ;;  %v10817_v25 = vld [vmem:[%s11114_s8 + $0x10] sm:$0xf]  ;;  %v8423_v55 = vshll.u32 %v10828_v11, 16 }
 0x3d9   : > { %v8427_v44 = vshrl.u32 %v10828_v11, 16 }
 0x3da   : > { %10339 = vmatprep.mubr.bf16.mxu0 %v8074_v6  ;;  %v8357_v6 = vrot.slane %v8355_v12, 4 }
 0x3db   : > { %10340 = vmatmul.mubr.bf16.gmra.mrb[152].mxu0 %v8075_v42  ;;  %v8327_v42 = vshll.u32 %v10817_v25, 16 }
 0x3ee   : > { %v10297_v9 = vpop.f32.mrb[20].mxu1 }
 0x3ef   : > { %v10432_v27 = vadd.f32 %v13121_v4, %v10297_v9  ;;  %v7955_v45 = vpop.f32.mrb[21].mxu1  ;;  %v8331_v9 = vshrl.u32 %v10817_v25, 16 }
 0x3f0   : > { %v10434_v62 = vadd.f32 %v13125_v21, %v7955_v45  ;;  %v10298_v13 = vpop.f32.mrb[22].mxu1 }
 0x3f1   : > { %v10436_v59 = vadd.f32 %v13129_v36, %v10298_v13  ;;  %v7958_v7 = vpop.f32.mrb[23].mxu1  ;;  %v8056_v14 = vmax.f32 %v10432_v27, 0.0  ;;  %v10818_v27 = vld [vmem:[%s11114_s8 + $0x30] sm:$0xf]  ;;  %v10819_v13 = vld [vmem:[%s11114_s8 + $0x20] sm:$0x1] }
 0x3f2   : > { %v10438_v61 = vadd.f32 %v13132_v26, %v7958_v7  ;;  %v8054_v1 = vmax.f32 %v10434_v62, 0.0  ;;  %v8390_v45 = vshrl.u32 %v10818_v27, 16  ;;  %v8393_v62 = vshll.u32 %v10818_v27, 16 }
 0x3f3   : > { %v8057_v37 = vmax.f32 %v10436_v59, 0.0  ;;  %v8361_v59 = vshll.u32 %v10819_v13, 16  ;;  %v13316_v7 = vrot.slane %v8348_v41, 4 }
 0x3f4   : > { %v8055_v50 = vmax.f32 %v10438_v61, 0.0  ;;  %v8324_v61 = vor.u32 %v8323_v34, %v8320_v2  ;;  %v10829_v34 = vld [vmem:[%s11114_s8 + $0x2c] sm:$0x1] }
 0x3f5   : > { %v8077_v53 = vpack.c.bf16 %v8057_v37, %v8056_v14  ;;  %v13318_v14 = vrot.slane %v8327_v42, 5  ;;  %v8358_v37 = vor.u32 %v8357_v6, %v13311_v23  ;;  %v8385_v25 = vshll.u32 %v10829_v34, 16 }
 0x3f6   : > { %v8076_v54 = vpack.c.bf16 %v8055_v50, %v8054_v1  ;;  %v10301_v60 = vpop.f32.mrb[24].mxu1  ;;  %v8333_v1 = vrot.slane %v8331_v9, 4  ;;  %v10820_v50 = vld [vmem:[%s11114_s8 + $0x14] sm:$0x1]  ;;  %v8354_v42 = vsel %vm13332_vm9, %v13316_v7, %v13311_v23  ;;  %v8425_v23 = vrot.slane %v8423_v55, 5 }
 0x3f7   : > { %v10440_v46 = vadd.f32 %v13135_v52, %v10301_v60  ;;  %v7971_v51 = vpop.f32.mrb[25].mxu1  ;;  %v8429_v7 = vrot.slane %v8427_v44, 4 }
 0x3f8   : > { %v10442_v4 = vadd.f32 %v13139_v31, %v7971_v51  ;;  %v10302_v22 = vpop.f32.mrb[26].mxu1  ;;  %10343 = vmatprep.mubr.bf16.mxu0 %v8076_v54  ;;  %v10821_v54 = vld [vmem:[%s11114_s8 + $0x34] sm:$0xf] }
 0x3f9   : > { %v10444_v21 = vadd.f32 %v13143_v38, %v10302_v22  ;;  %v7974_v36 = vpop.f32.mrb[27].mxu1  ;;  %10344 = vmatmul.mubr.bf16.gmra.mrb[156].mxu0 %v8077_v53  ;;  %v8060_v43 = vmax.f32 %v10440_v46, 0.0  ;;  %v13767_v38 = vld [vmem:[#allocation10_spill] sm:$0xff]  ;;  %v8337_v53 = vshll.u32 %v10820_v50, 16  ;;  %v8399_v60 = vshll.u32 %v10821_v54, 16 }
 0x3fa   : > { %v10446_v26 = vadd.f32 %v13147_v58, %v7974_v36  ;;  %v8058_v49 = vmax.f32 %v10442_v4, 0.0  ;;  %v13768_v58 = vld [vmem:[#allocation12_spill] sm:$0xff]  ;;  %v10822_v46 = vld [vmem:[%s11114_s8 + $0x24] sm:$0xf]  ;;  %v8392_v4 = vrot.slane %v8390_v45, 4  ;;  %v8395_v22 = vrot.slane %v8393_v62, 5 }
 0x3fb   : > { %v8061_v17 = vmax.f32 %v10444_v21, 0.0  ;;  %v8366_v51 = vshrl.u32 %v10822_v46, 16  ;;  %v8369_v21 = vshll.u32 %v10822_v46, 16  ;;  %v8403_v36 = vshrl.u32 %v10821_v54, 16  ;;  %v10830_v46 = vld [vmem:[%s11114_s8 + $0x60] sm:$0xf] }
 0x3fc   : > { %v8059_v3 = vmax.f32 %v10446_v26, 0.0  ;;  %v10823_v26 = vld [vmem:[%s11114_s8 + $0x28] sm:$0xf] }
 0x3fd   : > { %v8079_v39 = vpack.c.bf16 %v8061_v17, %v8060_v43  ;;  %v8375_v43 = vshll.u32 %v10823_v26, 16  ;;  %v8379_v17 = vshrl.u32 %v10823_v26, 16  ;;  %v10831_v26 = vld [vmem:[%s11114_s8 + $0x50] sm:$0x1] }
 0x3fe   : > { %v8078_v0 = vpack.c.bf16 %v8059_v3, %v8058_v49  ;;  %v10305_v15 = vpop.f32.mrb[28].mxu1  ;;  %v10824_v49 = vld [vmem:[%s11114_s8 + $0x48] sm:$0xf] }
 0x3ff   : > { %v10448_v52 = vadd.f32 %v13765_v18, %v10305_v15  ;;  %v7987_v57 = vpop.f32.mrb[29].mxu1  ;;  %v8438_v3 = vshrl.u32 %v10824_v49, 16  ;;  %v8363_v15 = vrot.slane %v8361_v59, 5  ;;  %v10825_v18 = vld [vmem:[%s11114_s8 + $0x3c] sm:$0xf] }
 0x400   : > { %v10450_v31 = vadd.f32 %v13766_v56, %v7987_v57  ;;  %v10306_v40 = vpop.f32.mrb[30].mxu1  ;;  %10347 = vmatprep.mubr.bf16.mxu0 %v8078_v0  ;;  %v8325_v0 = vrot.slane %v8324_v61, 4  ;;  %v8417_v57 = vshll.u32 %v10825_v18, 16  ;;  %v8359_v56 = vrot.slane %v8358_v37, 4 }
 0x401   : > { %v10452_v29 = vadd.f32 %v13767_v38, %v10306_v40  ;;  %v7990_v47 = vpop.f32.mrb[31].mxu1  ;;  %10348 = vmatmul.mubr.bf16.gmra.mrb[160].mxu0 %v8079_v39  ;;  %v8064_v28 = vmax.f32 %v10448_v52, 0.0  ;;  %v8441_v39 = vshll.u32 %v10824_v49, 16  ;;  %v8414_v52 = vshrl.u32 %v10825_v18, 16 }
 0x402   : > { %v10454_v5 = vadd.f32 %v13768_v58, %v7990_v47  ;;  %v8062_v30 = vmax.f32 %v10450_v31, 0.0  ;;  %v8334_v31 = vor.u32 %v8333_v1, %v13318_v14  ;;  %v8339_v40 = vrot.slane %v8337_v53, 5 }
 0x403   : > { %v8065_v8 = vmax.f32 %v10452_v29, 0.0  ;;  %v8401_v38 = vrot.slane %v8399_v60, 5  ;;  %v8396_v29 = vor.u32 %v8395_v22, %v8392_v4  ;;  %v8368_v47 = vrot.slane %v8366_v51, 4 }
 0x404   : > { %v8063_v16 = vmax.f32 %v10454_v5, 0.0  ;;  %v8371_v58 = vrot.slane %v8369_v21, 5  ;;  %v8405_v5 = vrot.slane %v8403_v36, 4  ;;  %v8416_v33 = vrot.slane %v8414_v52, 4 }
 0x405   : > { %v8081_v63 = vpack.c.bf16 %v8065_v8, %v8064_v28  ;;  %v13328_v28 = vrot.slane %v8375_v43, 5  ;;  %v8381_v8 = vrot.slane %v8379_v17, 4  ;;  %v8419_v48 = vrot.slane %v8417_v57, 5 }
 0x406   : > { %v8080_v24 = vpack.c.bf16 %v8063_v16, %v8062_v30  ;;  %v8440_v30 = vrot.slane %v8438_v3, 4  ;;  %v8443_v16 = vrot.slane %v8441_v39, 5  ;;  %v8335_v20 = vrot.slane %v8334_v31, 4  ;;  %v10832_v39 = vld [vmem:[%s11114_s8 + $0x44] sm:$0x1] }
 0x407   : > { %v8397_v12 = vrot.slane %v8396_v29, 4  ;;  %v8372_v41 = vor.u32 %v8371_v58, %v8368_v47  ;;  %v8406_v2 = vor.u32 %v8405_v5, %v8401_v38  ;;  %v8330_v6 = vsel %vm13332_vm9, %v8325_v0, %v13318_v14  ;;  %v13371_v29 = vld [vmem:[%s13607_s6] ss:$0 sm:$0xff] }
 0x408   : > { %10351 = vmatprep.mubr.bf16.mxu0 %v8080_v24  ;;  %v10826_v24 = vld [vmem:[%s11114_s8 + $0x4c] sm:$0xf]  ;;  %v8382_v9 = vor.u32 %v8381_v8, %v13328_v28  ;;  %v8444_v27 = vor.u32 %v8443_v16, %v8440_v30  ;;  %v8364_v45 = vsel %vm13332_vm9, %v8359_v56, %v8363_v15  ;;  %v8420_v13 = vor.u32 %v8419_v48, %v8416_v33 }
 0x409   : > { %10352 = vmatmul.mubr.bf16.gmra.mrb[164].mxu0 %v8081_v63  ;;  %v8447_v32 = vshll.u32 %v10826_v24, 16  ;;  %v8451_v19 = vshrl.u32 %v10826_v24, 16  ;;  %v8340_v61 = vsel %vm13332_vm9, %v8335_v20, %v8339_v40  ;;  %v8411_v37 = vrot.slane %v8409_v10, 5 }
 0x40a   : > { %v8402_v14 = vsel %vm13332_vm9, %v8397_v12, %v8401_v38  ;;  %v8373_v1 = vrot.slane %v8372_v41, 4  ;;  %v8407_v50 = vrot.slane %v8406_v2, 4  ;;  %v8387_v53 = vrot.slane %v8385_v25, 5 }
 0x40b   : > { %v8449_v62 = vrot.slane %v8447_v32, 5  ;;  %v8453_v59 = vrot.slane %v8451_v19, 4  ;;  %v8383_v54 = vrot.slane %v8382_v9, 4  ;;  %v8445_v60 = vrot.slane %v8444_v27, 4 }
 0x40c   : > { %v8486_v51 = vshrl.u32 %v10830_v46, 16  ;;  %v8489_v4 = vshll.u32 %v10830_v46, 16  ;;  %v8735_v22 = vunpack.c.l.bf16 %v8354_v42  ;;  %v8421_v21 = vrot.slane %v8420_v13, 4 }
 0x40d   : > { %v8454_v36 = vor.u32 %v8453_v59, %v8449_v62  ;;  %v8457_v43 = vshll.u32 %v10831_v26, 16  ;;  %v8733_v17 = vunpack.c.l.bf16 %v8330_v6  ;;  %v8736_v49 = vunpack.c.l.bf16 %v8364_v45  ;;  %v10835_v6 = vld [vmem:[%s11114_s8 + $0x58] sm:$0xf]  ;;  %v10837_v26 = vld [vmem:[%s11114_s8 + $0x5c] sm:$0x1] }
 0x40e   : > { %v8430_v3 = vor.u32 %v8429_v7, %v8425_v23  ;;  %v8433_v0 = vshll.u32 %v10832_v39, 16  ;;  %v8734_v15 = vunpack.c.l.bf16 %v8340_v61  ;;  %v13357_v18 = vunpack.c.l.bf16 %v8402_v14  ;;  %v10836_v7 = vld [vmem:[%s11114_s8 + $0x68] sm:$0x1] }
 0x40f   : > { %v8378_v52 = vsel %vm13332_vm9, %v8373_v1, %v13328_v28  ;;  %v8412_v57 = vsel %vm13332_vm9, %v8407_v50, %v8411_v37  ;;  %v8388_v56 = vsel %vm13332_vm9, %v8383_v54, %v8387_v53  ;;  %v8450_v31 = vsel %vm13332_vm9, %v8445_v60, %v8449_v62  ;;  %v10833_v28 = vld [vmem:[%s11114_s8 + $0x54] sm:$0xf] }
 0x410   : > { %v8488_v40 = vrot.slane %v8486_v51, 4  ;;  %v8491_v38 = vrot.slane %v8489_v4, 5  ;;  %v8426_v47 = vsel %vm13332_vm9, %v8421_v21, %v8425_v23  ;;  %v8455_v58 = vrot.slane %v8454_v36, 4 }
 0x411   : > { %v8459_v5 = vrot.slane %v8457_v43, 5  ;;  %v8462_v8 = vshrl.u32 %v10833_v28, 16  ;;  %v13376_v30 = vunpack.c.l.bf16 %v8378_v52  ;;  %v8431_v16 = vrot.slane %v8430_v3, 4 }
 0x412   : > { %v8435_v24 = vrot.slane %v8433_v0, 5  ;;  %v8465_v32 = vshll.u32 %v10833_v28, 16  ;;  %v13378_v48 = vunpack.c.l.bf16 %v8412_v57  ;;  %v13380_v19 = vunpack.c.l.bf16 %v8388_v56  ;;  %v10838_v0 = vld [vmem:[%s11114_s8 + $0x78] sm:$0xf] }
 0x413   : > { %v13382_v20 = vunpack.c.l.bf16 %v8450_v31  ;;  %v8495_v10 = vshll.u32 %v10834_v35, 16  ;;  %v13386_v44 = vunpack.c.l.bf16 %v8426_v47  ;;  %v8492_v12 = vor.u32 %v8491_v38, %v8488_v40 }
 0x414   : > { %v8499_v41 = vshrl.u32 %v10834_v35, 16  ;;  %v8460_v25 = vsel %vm13332_vm9, %v8455_v58, %v8459_v5  ;;  %v8464_v42 = vrot.slane %v8462_v8, 4  ;;  %v8471_v9 = vshll.u32 %v10835_v6, 16 }
 0x415   : > { %v8436_v13 = vsel %vm13332_vm9, %v8431_v16, %v8435_v24  ;;  %v8467_v59 = vrot.slane %v8465_v32, 5  ;;  %v13397_v23 = vrot.slane %v8495_v10, 5  ;;  %v8505_v14 = vshll.u32 %v10836_v7, 16 }
 0x416   : > { %v13402_v50 = vunpack.c.l.bf16 %v8460_v25  ;;  %v13404_v53 = vrot.slane %v8492_v12, 4  ;;  %v8501_v54 = vrot.slane %v8499_v41, 4  ;;  %v13406_v46 = vunpack.c.l.bf16 %v8436_v13 }
 0x417   : > { %v13408_v51 = vrot.slane %v8471_v9, 5  ;;  %v8475_v4 = vshrl.u32 %v10835_v6, 16  ;;  %v8468_v36 = vor.u32 %v8467_v59, %v8464_v42  ;;  %v8481_v43 = vshll.u32 %v10837_v26, 16 }
 0x418   : > { %v13411_v39 = vrot.slane %v8505_v14, 5  ;;  %v8534_v52 = vshrl.u32 %v10838_v0, 16  ;;  %v8498_v31 = vsel %vm13332_vm9, %v13404_v53, %v13397_v23  ;;  %v8502_v40 = vor.u32 %v8501_v54, %v13397_v23 }
 0x419   : > { %v8477_v5 = vrot.slane %v8475_v4, 4  ;;  %v8537_v28 = vshll.u32 %v10838_v0, 16  ;;  %v8469_v32 = vrot.slane %v8468_v36, 4 }
 0x41b   : > { %v8478_v6 = vor.u32 %v8477_v5, %v13408_v51  ;;  %v8539_v9 = vrot.slane %v8537_v28, 5 }
 0x48e   : > { %v10325_v33 = vpop.f32.mrb[136].mxu0 }
 0x48f   : > { %v8196_v11 = vadd.f32 %v10325_v33, %v13371_v29  ;;  %v8187_v55 = vpop.f32.mrb[137].mxu0  ;;  %v13426_v33 = vrot.slane %v8481_v43, 5 }
 0x490   : > { %v8188_v2 = vadd.f32 %v13371_v29, %v8187_v55  ;;  %v10326_v34 = vpop.f32.mrb[138].mxu0  ;;  %v10839_v55 = vld [vmem:[%s11114_s8 + $0x7c] sm:$0xf] }
 0x491   : > { %v8767_v27 = vadd.f32 %v8735_v22, %v8196_v11  ;;  %v8199_v45 = vadd.f32 %v10326_v34, %v13371_v29  ;;  %v8190_v62 = vpop.f32.mrb[139].mxu0  ;;  %v8536_v11 = vrot.slane %v8534_v52, 4  ;;  %v8543_v12 = vshll.u32 %v10839_v55, 16  ;;  %v10840_v34 = vld [vmem:[%s11114_s8 + $0x6c] sm:$0xf] }
 0x492   : > { %v8765_v61 = vadd.f32 %v8733_v17, %v8188_v2  ;;  %v8191_v37 = vadd.f32 %v13371_v29, %v8190_v62  ;;  %v8503_v2 = vrot.slane %v8502_v40, 4  ;;  %v8513_v25 = vshll.u32 %v10840_v34, 16  ;;  %v10841_v62 = vld [vmem:[%s11114_s8 + $0x70] sm:$0xf] }
 0x493   : > { %v8768_v1 = vadd.f32 %v8736_v49, %v8199_v45  ;;  %v8799_v22 = vmax.f32 %v8767_v27, 0.0  ;;  %v8547_v27 = vshrl.u32 %v10839_v55, 16  ;;  %v8519_v13 = vshll.u32 %v10841_v62, 16 }
 0x494   : > { %v8766_v60 = vadd.f32 %v8734_v15, %v8191_v37  ;;  %v8797_v17 = vmax.f32 %v8765_v61, 0.0  ;;  %v8523_v59 = vshrl.u32 %v10841_v62, 16  ;;  %v13440_v7 = vrot.slane %v8543_v12, 5 }
 0x495   : > { %v8800_v21 = vmax.f32 %v8768_v1, 0.0  ;;  %v8515_v54 = vrot.slane %v8513_v25, 5  ;;  %v8549_v36 = vrot.slane %v8547_v27, 4  ;;  %v8747_v52 = vunpack.c.l.bf16 %v8498_v31 }
 0x496   : > { %v8798_v3 = vmax.f32 %v8766_v60, 0.0  ;;  %v10329_v49 = vpop.f32.mrb[140].mxu0 }
 0x497   : > { %v9419_v57 = vpack.c.bf16 %v8800_v21, %v8799_v22  ;;  %v8212_v15 = vadd.f32 %v10329_v49, %v13371_v29  ;;  %v8203_v56 = vpop.f32.mrb[141].mxu0  ;;  %v8479_v21 = vrot.slane %v8478_v6, 4 }
 0x498   : > { %v9414_v38 = vpack.c.bf16 %v8798_v3, %v8797_v17  ;;  %v8204_v47 = vadd.f32 %v13371_v29, %v8203_v56  ;;  %v10330_v58 = vpop.f32.mrb[142].mxu0  ;;  %v8521_v17 = vrot.slane %v8519_v13, 5  ;;  %v8525_v3 = vrot.slane %v8523_v59, 4 }
 0x499   : > { %9491 = vst [vmem:[%s13421_s15 + $0x8] sm:$0xff] %v9419_v57   ;;  %v8771_v8 = vadd.f32 %v13357_v18, %v8212_v15  ;;  %v8215_v16 = vadd.f32 %v10330_v58, %v13371_v29  ;;  %v8206_v24 = vpop.f32.mrb[143].mxu0  ;;  %v8510_v18 = vshrl.u32 %v10840_v34, 16  ;;  %v8540_v57 = vor.u32 %v8539_v9, %v8536_v11  ;;  %v10842_v58 = vld [vmem:[%s11114_s8 + $0x80] sm:$0x1] }
 0x49a   : > { %9415 = vst [vmem:[%s13421_s15] sm:$0xff] %v9414_v38   ;;  %v8769_v35 = vadd.f32 %v13376_v30, %v8204_v47  ;;  %v8207_v10 = vadd.f32 %v13371_v29, %v8206_v24  ;;  %v8484_v47 = vsel %vm13332_vm9, %v8479_v21, %v13426_v33  ;;  %v8553_v5 = vshll.u32 %v10842_v58, 16 }
 0x49b   : > { %v8772_v41 = vadd.f32 %v13378_v48, %v8215_v16  ;;  %v8803_v45 = vmax.f32 %v8771_v8, 0.0  ;;  %v8474_v48 = vsel %vm13332_vm9, %v8469_v32, %v13408_v51  ;;  %v8512_v53 = vrot.slane %v8510_v18, 4 }
 0x49c   : > { %v8770_v42 = vadd.f32 %v13380_v19, %v8207_v10  ;;  %v8801_v61 = vmax.f32 %v8769_v35, 0.0  ;;  %v8745_v56 = vunpack.c.l.bf16 %v8474_v48  ;;  %v8526_v8 = vor.u32 %v8525_v3, %v8521_v17 }
 0x49d   : > { %v8804_v30 = vmax.f32 %v8772_v41, 0.0  ;;  %v8516_v40 = vor.u32 %v8515_v54, %v8512_v53  ;;  %v8541_v10 = vrot.slane %v8540_v57, 4  ;;  %v8746_v55 = vunpack.c.l.bf16 %v8484_v47  ;;  %v10845_v47 = vld [vmem:[%s11114_s8 + $0x84] sm:$0xf] }
 0x49e   : > { %v8802_v37 = vmax.f32 %v8770_v42, 0.0  ;;  %v10333_v23 = vpop.f32.mrb[144].mxu0  ;;  %v8555_v25 = vrot.slane %v8553_v5, 5  ;;  %v8527_v27 = vrot.slane %v8526_v8, 4  ;;  %v8561_v58 = vshll.u32 %v10845_v47, 16 }
 0x49f   : > { %v9429_v19 = vpack.c.bf16 %v8804_v30, %v8803_v45  ;;  %v8228_v14 = vadd.f32 %v10333_v23, %v13371_v29  ;;  %v8219_v1 = vpop.f32.mrb[145].mxu0  ;;  %v8517_v12 = vrot.slane %v8516_v40, 4  ;;  %v8546_v13 = vsel %vm13332_vm9, %v8541_v10, %v13440_v7 }
 0x4a0   : > { %v9424_v60 = vpack.c.bf16 %v8802_v37, %v8801_v61  ;;  %v8220_v4 = vadd.f32 %v13371_v29, %v8219_v1  ;;  %v10334_v22 = vpop.f32.mrb[146].mxu0 }
 0x4a1   : > { %9493 = vst [vmem:[%s13421_s15 + $0x18] sm:$0xff] %v9429_v19   ;;  %v8775_v26 = vadd.f32 %v13382_v20, %v8228_v14  ;;  %v8231_v51 = vadd.f32 %v10334_v22, %v13371_v29  ;;  %v8222_v43 = vpop.f32.mrb[147].mxu0  ;;  %v8508_v20 = vsel %vm13332_vm9, %v8503_v2, %v13411_v39  ;;  %v8522_v61 = vsel %vm13332_vm9, %v8517_v12, %v8521_v17 }
 0x4a2   : > { %9492 = vst [vmem:[%s13421_s15 + $0x10] sm:$0xff] %v9424_v60   ;;  %v8773_v49 = vadd.f32 %v13386_v44, %v8220_v4  ;;  %v8223_v0 = vadd.f32 %v13371_v29, %v8222_v43  ;;  %v8550_v44 = vor.u32 %v8549_v36, %v13440_v7  ;;  %v8748_v35 = vunpack.c.l.bf16 %v8508_v20 }
 0x4a3   : > { %v8776_v15 = vadd.f32 %v13402_v50, %v8231_v51  ;;  %v8807_v31 = vmax.f32 %v8775_v26, 0.0  ;;  %v10843_v50 = vld [vmem:[%s11114_s8 + $0x74] sm:$0x1]  ;;  %v8751_v14 = vunpack.c.l.bf16 %v8546_v13  ;;  %v8749_v7 = vunpack.c.l.bf16 %v8522_v61 }
 0x4a4   : > { %v8774_v38 = vadd.f32 %v13406_v46, %v8223_v0  ;;  %v8529_v16 = vshll.u32 %v10843_v50, 16  ;;  %v8805_v24 = vmax.f32 %v8773_v49, 0.0  ;;  %v8551_v18 = vrot.slane %v8550_v44, 4  ;;  %v10846_v50 = vld [vmem:[%s11114_s8 + $0x94] sm:$0xf] }
 0x4a5   : > { %v8808_v28 = vmax.f32 %v8776_v15, 0.0  ;;  %v8558_v44 = vshrl.u32 %v10845_v47, 16  ;;  %v8563_v12 = vrot.slane %v8561_v58, 5 }
 0x4a6   : > { %v8806_v32 = vmax.f32 %v8774_v38, 0.0  ;;  %v10337_v39 = vpop.f32.mrb[148].mxu0  ;;  %v8531_v45 = vrot.slane %v8529_v16, 5  ;;  %v8556_v23 = vsel %vm13332_vm9, %v8551_v18, %v8555_v25  ;;  %v8591_v16 = vshll.u32 %v10846_v50, 16  ;;  %v10848_v25 = vld [vmem:[%s11114_s8 + $0xa8] sm:$0xf] }
 0x4a7   : > { %v9439_v46 = vpack.c.bf16 %v8808_v28, %v8807_v31  ;;  %v8244_v11 = vadd.f32 %v10337_v39, %v13371_v29  ;;  %v8235_v33 = vpop.f32.mrb[149].mxu0  ;;  %v8752_v36 = vunpack.c.l.bf16 %v8556_v23  ;;  %v10851_v23 = vld [vmem:[%s11114_s8 + $0x8c] sm:$0x1] }
 0x4a8   : > { %v9434_v41 = vpack.c.bf16 %v8806_v32, %v8805_v24  ;;  %v8236_v2 = vadd.f32 %v13371_v29, %v8235_v33  ;;  %v10338_v34 = vpop.f32.mrb[150].mxu0  ;;  %v8532_v1 = vsel %vm13332_vm9, %v8527_v27, %v8531_v45  ;;  %v8595_v24 = vshrl.u32 %v10846_v50, 16  ;;  %v10849_v45 = vld [vmem:[%s11114_s8 + $0x9c] sm:$0xf]  ;;  %v10855_v50 = vld [vmem:[%s11114_s8 + $0xa4] sm:$0x1] }
 0x4a9   : > { %9495 = vst [vmem:[%s13421_s15 + $0x28] sm:$0xff] %v9439_v46   ;;  %v8779_v42 = vadd.f32 %v8747_v52, %v8244_v11  ;;  %v8247_v6 = vadd.f32 %v10338_v34, %v13371_v29  ;;  %v8238_v9 = vpop.f32.mrb[151].mxu0  ;;  %v8750_v17 = vunpack.c.l.bf16 %v8532_v1 }
 0x4aa   : > { %9494 = vst [vmem:[%s13421_s15 + $0x20] sm:$0xff] %v9434_v41   ;;  %v8777_v30 = vadd.f32 %v8745_v56, %v8236_v2  ;;  %v8239_v62 = vadd.f32 %v13371_v29, %v8238_v9  ;;  %v10844_v56 = vld [vmem:[%s11114_s8 + $0x90] sm:$0xf]  ;;  %v8593_v41 = vrot.slane %v8591_v16, 5  ;;  %v8597_v2 = vrot.slane %v8595_v24, 4 }
 0x4ab   : > { %v8780_v59 = vadd.f32 %v8748_v35, %v8247_v6  ;;  %v8811_v48 = vmax.f32 %v8779_v42, 0.0  ;;  %v8582_v20 = vshrl.u32 %v10844_v56, 16  ;;  %v8585_v38 = vshll.u32 %v10844_v56, 16  ;;  %v10847_v35 = vld [vmem:[%s11114_s8 + $0x88] sm:$0xf] }
 0x4ac   : > { %v8778_v37 = vadd.f32 %v8746_v55, %v8239_v62  ;;  %v8809_v53 = vmax.f32 %v8777_v30, 0.0  ;;  %v8567_v10 = vshll.u32 %v10847_v35, 16  ;;  %v8571_v46 = vshrl.u32 %v10847_v35, 16  ;;  %v10856_v24 = vld [vmem:[%s11114_s8 + $0xc0] sm:$0xf] }
 0x4ad   : > { %v8812_v19 = vmax.f32 %v8780_v59, 0.0  ;;  %v8584_v39 = vrot.slane %v8582_v20, 4  ;;  %v8587_v33 = vrot.slane %v8585_v38, 5  ;;  %v8560_v55 = vrot.slane %v8558_v44, 4  ;;  %v10850_v59 = vld [vmem:[%s11114_s8 + $0x98] sm:$0x1] }
 0x4ae   : > { %v8810_v54 = vmax.f32 %v8778_v37, 0.0  ;;  %v10341_v60 = vpop.f32.mrb[152].mxu0  ;;  %v8569_v34 = vrot.slane %v8567_v10, 5  ;;  %v8573_v18 = vrot.slane %v8571_v46, 4  ;;  %v8630_v42 = vshrl.u32 %v10848_v25, 16 }
 0x4af   : > { %v9449_v4 = vpack.c.bf16 %v8812_v19, %v8811_v48  ;;  %v8260_v22 = vadd.f32 %v10341_v60, %v13371_v29  ;;  %v8251_v21 = vpop.f32.mrb[153].mxu0  ;;  %v8633_v6 = vshll.u32 %v10848_v25, 16  ;;  %v8588_v9 = vor.u32 %v8587_v33, %v8584_v39  ;;  %v10854_v38 = vld [vmem:[%s11114_s8 + $0xb0] sm:$0x1]  ;;  %v10857_v46 = vld [vmem:[%s11114_s8 + $0xb4] sm:$0xf] }
 0x4b0   : > { %v9444_v26 = vpack.c.bf16 %v8810_v54, %v8809_v53  ;;  %v8252_v51 = vadd.f32 %v13371_v29, %v8251_v21  ;;  %v10342_v43 = vpop.f32.mrb[154].mxu0  ;;  %v8564_v27 = vor.u32 %v8563_v12, %v8560_v55  ;;  %v8606_v30 = vshrl.u32 %v10849_v45, 16  ;;  %v10852_v54 = vld [vmem:[%s11114_s8 + $0xac] sm:$0xf] }
 0x4b1   : > { %9497 = vst [vmem:[%s13421_s15 + $0x38] sm:$0xff] %v9449_v4   ;;  %v8783_v3 = vadd.f32 %v8751_v14, %v8260_v22  ;;  %v8263_v49 = vadd.f32 %v10342_v43, %v13371_v29  ;;  %v8254_v0 = vpop.f32.mrb[155].mxu0  ;;  %v8609_v62 = vshll.u32 %v10849_v45, 16  ;;  %v8598_v13 = vor.u32 %v8597_v2, %v8593_v41 }
 0x4b2   : > { %9496 = vst [vmem:[%s13421_s15 + $0x30] sm:$0xff] %v9444_v26   ;;  %v8781_v52 = vadd.f32 %v8749_v7, %v8252_v51  ;;  %v8255_v57 = vadd.f32 %v13371_v29, %v8254_v0  ;;  %v8601_v61 = vshll.u32 %v10850_v59, 16  ;;  %v8574_v37 = vor.u32 %v8573_v18, %v8569_v34  ;;  %v10853_v26 = vld [vmem:[%s11114_s8 + $0xa0] sm:$0xf] }
 0x4b3   : > { %v8784_v15 = vadd.f32 %v8752_v36, %v8263_v49  ;;  %v8815_v5 = vmax.f32 %v8783_v3, 0.0  ;;  %v8577_v48 = vshll.u32 %v10851_v23, 16  ;;  %v8632_v19 = vrot.slane %v8630_v42, 4  ;;  %v10859_v42 = vld [vmem:[%s11114_s8 + $0xb8] sm:$0xf] }
 0x4b4   : > { %v8782_v40 = vadd.f32 %v8750_v17, %v8255_v57  ;;  %v8813_v28 = vmax.f32 %v8781_v52, 0.0  ;;  %v8635_v14 = vrot.slane %v8633_v6, 5  ;;  %v8589_v1 = vrot.slane %v8588_v9, 4 }
 0x4b5   : > { %v8816_v31 = vmax.f32 %v8784_v15, 0.0  ;;  %v8565_v53 = vrot.slane %v8564_v27, 4  ;;  %v8639_v60 = vshll.u32 %v10852_v54, 16  ;;  %v8643_v7 = vshrl.u32 %v10852_v54, 16 }
 0x4b6   : > { %v8814_v8 = vmax.f32 %v8782_v40, 0.0  ;;  %v8608_v4 = vrot.slane %v8606_v30, 4  ;;  %v8611_v22 = vrot.slane %v8609_v62, 5  ;;  %v8599_v21 = vrot.slane %v8598_v13, 4 }
 0x4b7   : > { %v9459_v32 = vpack.c.bf16 %v8816_v31, %v8815_v5  ;;  %v8603_v36 = vrot.slane %v8601_v61, 5  ;;  %v8615_v51 = vshll.u32 %v10853_v26, 16  ;;  %v8619_v43 = vshrl.u32 %v10853_v26, 16 }
 0x4b8   : > { %v9454_v11 = vpack.c.bf16 %v8814_v8, %v8813_v28  ;;  %v8575_v17 = vrot.slane %v8574_v37, 4  ;;  %v8579_v3 = vrot.slane %v8577_v48, 5  ;;  %v8636_v49 = vor.u32 %v8635_v14, %v8632_v19 }
 0x4b9   : > { %9499 = vst [vmem:[%s13421_s15 + $0x48] sm:$0xff] %v9459_v32   ;;  %v8594_v0 = vsel %vm13332_vm9, %v8589_v1, %v8593_v41  ;;  %v8570_v52 = vsel %vm13332_vm9, %v8565_v53, %v8569_v34  ;;  %v8641_v57 = vrot.slane %v8639_v60, 5  ;;  %v8645_v15 = vrot.slane %v8643_v7, 4  ;;  %v10858_v41 = vld [vmem:[%s11114_s8 + $0xc4] sm:$0xf] }
 0x4ba   : > { %9498 = vst [vmem:[%s13421_s15 + $0x40] sm:$0xff] %v9454_v11   ;;  %v8612_v56 = vor.u32 %v8611_v22, %v8608_v4  ;;  %v8604_v20 = vsel %vm13332_vm9, %v8599_v21, %v8603_v36  ;;  %v8617_v40 = vrot.slane %v8615_v51, 5  ;;  %v8649_v47 = vshll.u32 %v10854_v38, 16 }
 0x4bb   : > { %v8621_v44 = vrot.slane %v8619_v43, 4  ;;  %v8755_v58 = vunpack.c.l.bf16 %v8594_v0  ;;  %v8753_v5 = vunpack.c.l.bf16 %v8570_v52  ;;  %v8580_v31 = vsel %vm13332_vm9, %v8575_v17, %v8579_v3 }
 0x4bc   : > { %v8637_v28 = vrot.slane %v8636_v49, 4  ;;  %v8646_v8 = vor.u32 %v8645_v15, %v8641_v57  ;;  %v8625_v16 = vshll.u32 %v10855_v50, 16  ;;  %v8678_v32 = vshrl.u32 %v10856_v24, 16 }
 0x4bd   : > { %v8681_v39 = vshll.u32 %v10856_v24, 16  ;;  %v8756_v35 = vunpack.c.l.bf16 %v8604_v20  ;;  %v8613_v10 = vrot.slane %v8612_v56, 4  ;;  %v8654_v11 = vshrl.u32 %v10857_v46, 16  ;;  %v10860_v56 = vld [vmem:[%s11114_s8 + $0xc8] sm:$0x1] }
 0x4be   : > { %v8657_v33 = vshll.u32 %v10857_v46, 16  ;;  %v8651_v55 = vrot.slane %v8649_v47, 5  ;;  %v8622_v12 = vor.u32 %v8621_v44, %v8617_v40  ;;  %v8687_v2 = vshll.u32 %v10858_v41, 16  ;;  %v10861_v44 = vld [vmem:[%s11114_s8 + $0xbc] sm:$0x1]  ;;  %s9410_s8 = sshll.u32 %s10980_s27, 11 }
 0x4bf   : > { %v8691_v34 = vshrl.u32 %v10858_v41, 16  ;;  %v8754_v18 = vunpack.c.l.bf16 %v8580_v31  ;;  %v8642_v25 = vsel %vm13332_vm9, %v8637_v28, %v8641_v57  ;;  %v8663_v6 = vshll.u32 %v10859_v42, 16  ;;  %s13547_s19 = scalar_lea.hbm %s13608_s7, %s9410_s8  ;;  %s13555_s27 = scalar_lea.sflag [#allocation3], %s283_s10 }
 0x4c0   : > { %v8667_v9 = vshrl.u32 %v10859_v42, 16  ;;  %v8647_v45 = vrot.slane %v8646_v8, 4  ;;  %v8627_v30 = vrot.slane %v8625_v16, 5  ;;  %v8680_v62 = vrot.slane %v8678_v32, 4 }
 0x4c1   : > { %v8683_v13 = vrot.slane %v8681_v39, 5  ;;  %v8618_v37 = vsel %vm13332_vm9, %v8613_v10, %v8617_v40  ;;  %v8656_v23 = vrot.slane %v8654_v11, 4  ;;  %v8659_v48 = vrot.slane %v8657_v33, 5 }
 0x4c2   : > { %v8623_v1 = vrot.slane %v8622_v12, 4  ;;  %v8689_v53 = vrot.slane %v8687_v2, 5  ;;  %v8693_v54 = vrot.slane %v8691_v34, 4  ;;  %v8665_v22 = vrot.slane %v8663_v6, 5 }
 0x4c3   : > { %v8669_v21 = vrot.slane %v8667_v9, 4  ;;  %v8759_v51 = vunpack.c.l.bf16 %v8642_v25  ;;  %v8684_v43 = vor.u32 %v8683_v13, %v8680_v62  ;;  %v8757_v3 = vunpack.c.l.bf16 %v8618_v37 }
 0x4c4   : > { %v8652_v49 = vsel %vm13332_vm9, %v8647_v45, %v8651_v55  ;;  %v8660_v0 = vor.u32 %v8659_v48, %v8656_v23  ;;  %v8628_v57 = vsel %vm13332_vm9, %v8623_v1, %v8627_v30  ;;  %v8694_v15 = vor.u32 %v8693_v54, %v8689_v53 }
 0x4c5   : > { %v8697_v20 = vshll.u32 %v10860_v56, 16  ;;  %v8670_v47 = vor.u32 %v8669_v21, %v8665_v22  ;;  %v8760_v8 = vunpack.c.l.bf16 %v8652_v49  ;;  %v8685_v50 = vrot.slane %v8684_v43, 4 }
 0x4c6   : > { %v8758_v39 = vunpack.c.l.bf16 %v8628_v57  ;;  %v8695_v33 = vrot.slane %v8694_v15, 4 }
 0x4c7   : > { %v8699_v55 = vrot.slane %v8697_v20, 5  ;;  %v8671_v34 = vrot.slane %v8670_v47, 4  ;;  %v8690_v6 = vsel %vm13332_vm9, %v8685_v50, %v8689_v53 }
 0x4c9   : > { %v8700_v30 = vsel %vm13332_vm9, %v8695_v33, %v8699_v55 }
 0x4ca   : > { %v8764_v54 = vunpack.c.l.bf16 %v8700_v30 }
 0x4cc   : > { %v10345_v27 = vpop.f32.mrb[156].mxu0 }
 0x4cd   : > { %v8276_v59 = vadd.f32 %v10345_v27, %v13371_v29  ;;  %v8267_v61 = vpop.f32.mrb[157].mxu0 }
 0x4ce   : > { %v8268_v19 = vadd.f32 %v13371_v29, %v8267_v61  ;;  %v10346_v14 = vpop.f32.mrb[158].mxu0 }
 0x4cf   : > { %v8787_v60 = vadd.f32 %v8755_v58, %v8276_v59  ;;  %v8279_v7 = vadd.f32 %v10346_v14, %v13371_v29  ;;  %v8270_v4 = vpop.f32.mrb[159].mxu0  ;;  %v8673_v58 = vshll.u32 %v10861_v44, 16  ;;  %v8763_v59 = vunpack.c.l.bf16 %v8690_v6 }
 0x4d0   : > { %v8785_v36 = vadd.f32 %v8753_v5, %v8268_v19  ;;  %v8271_v26 = vadd.f32 %v13371_v29, %v8270_v4 }
 0x4d1   : > { %v8788_v17 = vadd.f32 %v8756_v35, %v8279_v7  ;;  %v8819_v40 = vmax.f32 %v8787_v60, 0.0  ;;  %v8661_v35 = vrot.slane %v8660_v0, 4 }
 0x4d2   : > { %v8786_v52 = vadd.f32 %v8754_v18, %v8271_v26  ;;  %v8817_v5 = vmax.f32 %v8785_v36, 0.0  ;;  %v8675_v18 = vrot.slane %v8673_v58, 5 }
 0x4d3   : > { %v8820_v38 = vmax.f32 %v8788_v17, 0.0  ;;  %v8666_v27 = vsel %vm13332_vm9, %v8661_v35, %v8665_v22 }
 0x4d4   : > { %v8818_v31 = vmax.f32 %v8786_v52, 0.0  ;;  %v10349_v28 = vpop.f32.mrb[160].mxu0  ;;  %v8676_v61 = vsel %vm13332_vm9, %v8671_v34, %v8675_v18  ;;  %v8761_v19 = vunpack.c.l.bf16 %v8666_v27 }
 0x4d5   : > { %v9469_v16 = vpack.c.bf16 %v8820_v38, %v8819_v40  ;;  %v8292_v24 = vadd.f32 %v10349_v28, %v13371_v29  ;;  %v8283_v32 = vpop.f32.mrb[161].mxu0  ;;  %v8762_v22 = vunpack.c.l.bf16 %v8676_v61 }
 0x4d6   : > { %v9464_v10 = vpack.c.bf16 %v8818_v31, %v8817_v5  ;;  %v8284_v46 = vadd.f32 %v13371_v29, %v8283_v32  ;;  %v10350_v11 = vpop.f32.mrb[162].mxu0 }
 0x4d7   : > { %9501 = vst [vmem:[%s13421_s15 + $0x58] sm:$0xff] %v9469_v16   ;;  %v8791_v12 = vadd.f32 %v8759_v51, %v8292_v24  ;;  %v8295_v41 = vadd.f32 %v10350_v11, %v13371_v29  ;;  %v8286_v2 = vpop.f32.mrb[163].mxu0 }
 0x4d8   : > { %9500 = vst [vmem:[%s13421_s15 + $0x50] sm:$0xff] %v9464_v10   ;;  %v8789_v25 = vadd.f32 %v8757_v3, %v8284_v46  ;;  %v8287_v42 = vadd.f32 %v13371_v29, %v8286_v2 }
 0x4d9   : > { %v8792_v9 = vadd.f32 %v8760_v8, %v8295_v41  ;;  %v8823_v62 = vmax.f32 %v8791_v12, 0.0 }
 0x4da   : > { %v8790_v45 = vadd.f32 %v8758_v39, %v8287_v42  ;;  %v8821_v37 = vmax.f32 %v8789_v25, 0.0 }
 0x4db   : > { %v8824_v13 = vmax.f32 %v8792_v9, 0.0 }
 0x4dc   : > { %v8822_v23 = vmax.f32 %v8790_v45, 0.0  ;;  %v10353_v48 = vpop.f32.mrb[164].mxu0 }
 0x4dd   : > { %v9479_v14 = vpack.c.bf16 %v8824_v13, %v8823_v62  ;;  %v8308_v1 = vadd.f32 %v10353_v48, %v13371_v29  ;;  %v8299_v53 = vpop.f32.mrb[165].mxu0 }
 0x4de   : > { %v9474_v60 = vpack.c.bf16 %v8822_v23, %v8821_v37  ;;  %v8300_v7 = vadd.f32 %v13371_v29, %v8299_v53  ;;  %v10354_v4 = vpop.f32.mrb[166].mxu0 }
 0x4df   : > { %9503 = vst [vmem:[%s13421_s15 + $0x68] sm:$0xff] %v9479_v14   ;;  %v8795_v63 = vadd.f32 %v8763_v59, %v8308_v1  ;;  %v8311_v21 = vadd.f32 %v10354_v4, %v13371_v29  ;;  %v8302_v36 = vpop.f32.mrb[167].mxu0 }
 0x4e0   : > { %9502 = vst [vmem:[%s13421_s15 + $0x60] sm:$0xff] %v9474_v60   ;;  %v8793_v26 = vadd.f32 %v8761_v19, %v8300_v7  ;;  %v8303_v51 = vadd.f32 %v13371_v29, %v8302_v36 }
 0x4e1   : > { %v8796_v43 = vadd.f32 %v8764_v54, %v8311_v21  ;;  %v8827_v3 = vmax.f32 %v8795_v63, 0.0 }
 0x4e2   : > { %v8794_v17 = vadd.f32 %v8762_v22, %v8303_v51  ;;  %v8825_v0 = vmax.f32 %v8793_v26, 0.0 }
 0x4e3   : > { %v8828_v49 = vmax.f32 %v8796_v43, 0.0 }
 0x4e4   : > { %v8826_v52 = vmax.f32 %v8794_v17, 0.0 }
 0x4e5   : > { %v9489_v57 = vpack.c.bf16 %v8828_v49, %v8827_v3 }
 0x4e6   : > { %v9484_v29 = vpack.c.bf16 %v8826_v52, %v8825_v0 }
 0x4e7   : > { %9505 = vst [vmem:[%s13421_s15 + $0x78] sm:$0xff] %v9489_v57  }
 0x4e8   : > { %9504 = vst [vmem:[%s13421_s15 + $0x70] sm:$0xff] %v9484_v29  }
 0x4e9   : > { %10923 = shalt.err (!%p10920_p5)
}
 0x4ea   : > { %s10924_s30 = scalar_lea.hbm %s13547_s19, 2048  ;;  %s10928_s15 = scalar_lea.hbm %s13608_s7, 4096 }
 0x4eb   : > { %p10925_p6 = scmp.ne.s32.totalorder %s13547_s19, %s10924_s30  ;;  %p10929_p10 = scmp.lt.u32.totalorder %s13547_s19, %s13608_s7 }
 0x4ec   : > { %p10930_p11 = scmp.lt.u32.totalorder %s10928_s15, %s10924_s30  ;;  %p10932_p13 = scmp.lt.u32.totalorder %s10924_s30, %s13547_s19 }
 0x4ed   : > { %p10926_p7 = pnand %p10925_p6, %p11080_p4 }
 0x4ee   : > { %p10931_p12 = por %p10930_p11, %p10929_p10 }
 0x4ef   : > { %p10927_p9 = pneg %p10926_p7 }
 0x4f0   : > { %p10933_p0 = por %p10932_p13, %p10931_p12 }
 0x4f2   : > { %p10934_p1 = pnand %p10933_p0, %p10927_p9 }
 0x4f4   : > { %10937 = shalt.err (!%p10934_p1)
}
 0x4f5   : > { %s10998_s18 = smov 64   ;;  %s10999_s20 = smov 4  }
 0x4f6   : > { %10660 = dma.vmem_to_hbm [thread:$0]  (%p11080_p4), %s13549_s16, 2048, %s13547_s19, %s13555_s27, %s10998_s18, %s10998_s18, %s10999_s20  }
 0x4f7 PF: > { %p10666_p2 = scmp.ge.s32.totalorder %s10988_s29, 2  ;;  %s9021_s21 = sand.u32 1, %s10968_s24  }
 0x4f8   : > { %s9022_s22 = scalar_lea.sflag [#allocation3], %s9021_s21 }
 0x4f9   : > { %p10663_p3 = pnand %p10666_p2, %p11087_p8 }
 0x4fb   : > { %10963 = dma.done.wait (!%p10663_p3), %s9022_s22, 2048  }
 0x4fc   : > { %10965 = vsyncadd (!%p10663_p3), %s9022_s22, 4294965248  ;;  %s20_s29 = sadd.s32 1, %s10988_s29   ;;  %s13771_s24 = smov %s10972_s25 }
 0x4fd   : > { %p17_p5 = scmp.ge.s32.totalorder %s20_s29, 4   ;;  %s13772_s25 = smov %s10976_s26 }
 0x4fe   : > { %s13773_s26 = smov %s11093_s14  ;;  %s13774_s27 = smov %s10984_s28 }
 0x4ff   : > { %s13775_s28 = smov %s13777_s9  ;;  %19 = sbr.rel (!%p17_p5) target bundleno = 4 (0x4), region = 84 }
 0x506   :  { %9027 = vsyncpa [#allocation3], 1 }
 0x507   :  { %9029 = vsyncpa [#allocation3 + $0x1], 1 }

</bundles_post_ra>
